<compile_context>
chip_gen: v5e
topology: v5e:2x2
jax: 0.10.0
libtpu: 0.0.40
codegen_flags: <defaults>
</compile_context>

<pallas_src>
import numpy as np

import jax
import jax.numpy as jnp
from jax.experimental import pallas as pl
from jax.experimental.pallas import tpu as pltpu

# ---------------------------------------------------------------------------
# Static LeNet-5 geometry
# ---------------------------------------------------------------------------
KSZ = 5                  # conv kernel size
C1, C2 = 6, 16           # conv channel counts
H0 = 32                  # input spatial size
H1 = H0 - KSZ + 1        # 28  conv1 output
P1 = H1 // 2             # 14  pool1 output
H2 = P1 - KSZ + 1        # 10  conv2 output
P2 = H2 // 2             # 5   pool2 output
FC1_IN = C2 * P2 * P2    # 400
FC1_OUT = 120            # == LeNet.fc2.weight.shape[1] -> Embedding vocab size

TB = 2                   # samples per grid step (independent chains interleave)


# ---------------------------------------------------------------------------
# Per-sample fused pipeline (traced inline; everything VMEM/vreg resident)
# ---------------------------------------------------------------------------
def _one_sample(x_ref, x0,
                band1_ref, b1_ref, sr1_ref, sc1_ref,
                band2_ref, b2_ref, sr2_ref, sc2_ref,
                fc1w_ref, fc1b_ref, emb_ref,
                l1w_ref, l1b_ref, l2w_ref, l2b_ref,
                p1_scr, c2p_scr):
    f32 = jnp.float32

    # ---- conv1: 5 banded matmuls over row taps, + bias + ReLU --------------
    # c1[r, o*28 + c] = bias[o] + sum_{di,dj} x[r+di, c+dj] * w1[o, 0, di, dj]
    c1 = jnp.dot(x_ref[pl.ds(x0, H1), :], band1_ref[0],
                 preferred_element_type=f32)
    for di in range(1, KSZ):
        c1 = c1 + jnp.dot(x_ref[pl.ds(x0 + di, H1), :], band1_ref[di],
                          preferred_element_type=f32)
    c1 = jnp.maximum(c1 + b1_ref[...], 0.0)                 # (28, 168)

    # ---- maxpool 2x2 via exact 0/1 selection matmuls -----------------------
    colmax = jnp.maximum(
        jnp.dot(c1, sc1_ref[0], preferred_element_type=f32),
        jnp.dot(c1, sc1_ref[1], preferred_element_type=f32))          # (28, 84)
    p1 = jnp.maximum(
        jnp.dot(sr1_ref[0], colmax, preferred_element_type=f32),
        jnp.dot(sr1_ref[1], colmax, preferred_element_type=f32))      # (14, 84)
    p1_scr[...] = p1                                        # stays in VMEM

    # ---- conv2: 5 banded matmuls (channel contraction inside the band) -----
    c2 = jnp.dot(p1_scr[pl.ds(0, H2), :], band2_ref[0],
                 preferred_element_type=f32)
    for di in range(1, KSZ):
        c2 = c2 + jnp.dot(p1_scr[pl.ds(di, H2), :], band2_ref[di],
                          preferred_element_type=f32)
    c2 = jnp.maximum(c2 + b2_ref[...], 0.0)                 # (10, 160)

    # ---- maxpool 2x2 --------------------------------------------------------
    colmax2 = jnp.maximum(
        jnp.dot(c2, sc2_ref[0], preferred_element_type=f32),
        jnp.dot(c2, sc2_ref[1], preferred_element_type=f32))          # (10, 80)
    c2p = jnp.maximum(
        jnp.dot(sr2_ref[0], colmax2, preferred_element_type=f32),
        jnp.dot(sr2_ref[1], colmax2, preferred_element_type=f32))     # (5, 80)
    c2p_scr[...] = c2p

    # ---- fc1 (400 -> 120) + ReLU; flatten permutation folded into weights ---
    feats = fc1b_ref[...]                                   # (1, 120)
    for i in range(P2):
        feats = feats + jnp.dot(c2p_scr[pl.ds(i, 1), :], fc1w_ref[i],
                                preferred_element_type=f32)
    feats = jnp.maximum(feats, 0.0)                         # (1, 120)

    # ---- DAM head: argmax -> embedding gather (one-hot @ table) -> MLP -----
    iota = jax.lax.broadcasted_iota(jnp.int32, feats.shape, 1)
    m = jnp.max(feats, axis=-1, keepdims=True)
    idx = jnp.min(jnp.where(feats == m, iota, FC1_OUT), axis=-1, keepdims=True)
    onehot = (iota == idx).astype(f32)                      # (1, 120)
    emb = jnp.dot(onehot, emb_ref[...], preferred_element_type=f32)   # (1, 10)
    h = jnp.maximum(
        jnp.dot(emb, l1w_ref[...], preferred_element_type=f32) + l1b_ref[...],
        0.0)
    return jnp.dot(h, l2w_ref[...], preferred_element_type=f32) + l2b_ref[...]


def _dam_emb_kernel(
    x_ref,        # (TB*32, 32)     TB stacked input images
    band1_ref,    # (5, 32, 168)    conv1 banded weights, one per row tap di
    b1_ref,       # (1, 168)        conv1 bias, repeated per output column
    sr1_ref,      # (2, 14, 28)     pool1 row-pick (even/odd) matrices
    sc1_ref,      # (2, 168, 84)    pool1 col-pick (block-diagonal) matrices
    band2_ref,    # (5, 84, 160)    conv2 banded weights
    b2_ref,       # (1, 160)
    sr2_ref,      # (2, 5, 10)
    sc2_ref,      # (2, 160, 80)
    fc1w_ref,     # (5, 80, 120)    fc1 with NCHW-flatten permutation folded in
    fc1b_ref,     # (1, 120)
    emb_ref,      # (120, 10)       embedding table
    l1w_ref,      # (10, 10)
    l1b_ref,      # (1, 10)
    l2w_ref,      # (10, 10)
    l2b_ref,      # (1, 10)
    o_ref,        # (TB, 10)        output block
    *scratch,     # TB x VMEM(14,84), TB x VMEM(5,80)  (per-sample, no aliasing)
):
    p1_scrs = scratch[:TB]
    c2p_scrs = scratch[TB:]
    outs = []
    for s in range(TB):
        outs.append(_one_sample(
            x_ref, s * H0,
            band1_ref, b1_ref, sr1_ref, sc1_ref,
            band2_ref, b2_ref, sr2_ref, sc2_ref,
            fc1w_ref, fc1b_ref, emb_ref,
            l1w_ref, l1b_ref, l2w_ref, l2b_ref,
            p1_scrs[s], c2p_scrs[s]))
    o_ref[...] = jnp.concatenate(outs, axis=0).astype(o_ref.dtype)


# ---------------------------------------------------------------------------
# One-time host-side preparation of the kernel operands
# ---------------------------------------------------------------------------
def _band_from_conv(w, in_w, out_w):
    """conv weight (O, Cin, K, K) -> (K, Cin*in_w, O*out_w) banded matrices.

    band[di, ci*in_w + (j+dj), o*out_w + j] = w[o, ci, di, dj], so that the
    conv becomes  out_slab = sum_di  input_rows[di:di+out_h, :] @ band[di].
    """
    o_, c_, k_, _ = w.shape
    wi = np.arange(in_w)[:, None, None]
    ji = np.arange(out_w)[None, :, None]
    di = np.arange(k_)[None, None, :]
    sel = (wi == ji + di).astype(np.float32)                 # (in_w, out_w, K)
    band = jnp.einsum('wjd,ocid->icwoj', sel, w)             # (K, Cin, in_w, O, out_w)
    return band.reshape(k_, c_ * in_w, o_ * out_w).astype(jnp.float32)


def _selection_matrices():
    """Exact 0/1 pick matrices implementing 2x2 max-pool as matmuls."""
    sr1 = np.zeros((2, P1, H1), np.float32)
    sr2 = np.zeros((2, P2, H2), np.float32)
    for p in range(2):
        for i in range(P1):
            sr1[p, i, 2 * i + p] = 1.0
        for i in range(P2):
            sr2[p, i, 2 * i + p] = 1.0
    sc1 = np.zeros((2, C1 * H1, C1 * P1), np.float32)
    sc2 = np.zeros((2, C2 * H2, C2 * P2), np.float32)
    for p in range(2):
        for o in range(C1):
            for j in range(P1):
                sc1[p, o * H1 + 2 * j + p, o * P1 + j] = 1.0
        for o in range(C2):
            for j in range(P2):
                sc2[p, o * H2 + 2 * j + p, o * P2 + j] = 1.0
    return jnp.asarray(sr1), jnp.asarray(sc1), jnp.asarray(sr2), jnp.asarray(sc2)


def _fc1_rearrange(fc1_w):
    """(400, 120) with PyTorch NCHW flat index o*25 + i*5 + j  ->  (5, 80, 120)
    indexed [i, o*5 + j, n], matching the in-kernel pooled layout."""
    w = fc1_w.reshape(C2, P2, P2, FC1_OUT)      # (o, i, j, n)
    w = jnp.transpose(w, (1, 0, 2, 3))          # (i, o, j, n)
    return w.reshape(P2, C2 * P2, FC1_OUT)


def build_kernel_operands(params):
    sr1, sc1, sr2, sc2 = _selection_matrices()
    return dict(
        band1=_band_from_conv(params["conv1_w"], H0, H1),
        b1=jnp.repeat(params["conv1_b"], H1).reshape(1, C1 * H1),
        sr1=sr1, sc1=sc1,
        band2=_band_from_conv(params["conv2_w"], P1, H2),
        b2=jnp.repeat(params["conv2_b"], H2).reshape(1, C2 * H2),
        sr2=sr2, sc2=sc2,
        fc1w=_fc1_rearrange(params["fc1_w"]),
        fc1b=params["fc1_b"].reshape(1, FC1_OUT),
        emb=params["emb"],
        l1w=params["l1_w"], l1b=params["l1_b"].reshape(1, -1),
        l2w=params["l2_w"], l2b=params["l2_b"].reshape(1, -1),
    )


# ---------------------------------------------------------------------------
# DAMEmb forward (single fused pallas_call)
# ---------------------------------------------------------------------------
def dam_emb_forward(ops, x_nchw):
    B = x_nchw.shape[0]
    E = ops["emb"].shape[1]
    nb = pl.cdiv(B, TB)
    b_pad = nb * TB

    x = x_nchw.reshape(B, H0, H0)               # single input channel
    if b_pad != B:
        x = jnp.pad(x, ((0, b_pad - B), (0, 0), (0, 0)))
    x2d = x.reshape(b_pad * H0, H0)             # TB samples stacked per block

    full = lambda a: pl.BlockSpec(a.shape, lambda b: (0,) * a.ndim)

    grid_spec = pltpu.PrefetchScalarGridSpec(
        num_scalar_prefetch=0,
        grid=(nb,),
        in_specs=[
            pl.BlockSpec((TB * H0, H0), lambda b: (b, 0)),        # x (TB samples)
            full(ops["band1"]), full(ops["b1"]),
            full(ops["sr1"]), full(ops["sc1"]),
            full(ops["band2"]), full(ops["b2"]),
            full(ops["sr2"]), full(ops["sc2"]),
            full(ops["fc1w"]), full(ops["fc1b"]),
            full(ops["emb"]),
            full(ops["l1w"]), full(ops["l1b"]),
            full(ops["l2w"]), full(ops["l2b"]),
        ],
        out_specs=pl.BlockSpec((None, TB, E), lambda b: (b, 0, 0)),
        scratch_shapes=(
            [pltpu.VMEM((P1, C1 * P1), jnp.float32) for _ in range(TB)]   # pool1
            + [pltpu.VMEM((P2, C2 * P2), jnp.float32) for _ in range(TB)]  # pool2
        ),
    )
    out = pl.pallas_call(
        _dam_emb_kernel,
        out_shape=jax.ShapeDtypeStruct((nb, TB, E), jnp.float32),
        grid_spec=grid_spec,
        compiler_params=pltpu.CompilerParams(
            dimension_semantics=("parallel",)),       # v7x: shard batch on 2 TCs
    )(x2d, ops["band1"], ops["b1"], ops["sr1"], ops["sc1"],
      ops["band2"], ops["b2"], ops["sr2"], ops["sc2"],
      ops["fc1w"], ops["fc1b"], ops["emb"],
      ops["l1w"], ops["l1b"], ops["l2w"], ops["l2b"])
    return out.reshape(b_pad, E)[:B]


# ---------------------------------------------------------------------------
# Parameters (LeNet-5 + DAM head).  fc2/fc3 exist in the module but their
# forward outputs are dead in DAMEmb.forward, so no kernel consumes them.
# ---------------------------------------------------------------------------
def init_params(key, output_dim=10):
    ks = jax.random.split(key, 16)
    s = 0.1
    return {
        "conv1_w": s * jax.random.normal(ks[0], (C1, 1, KSZ, KSZ), jnp.float32),
        "conv1_b": s * jax.random.normal(ks[1], (C1,), jnp.float32),
        "conv2_w": s * jax.random.normal(ks[2], (C2, C1, KSZ, KSZ), jnp.float32),
        "conv2_b": s * jax.random.normal(ks[3], (C2,), jnp.float32),
        "fc1_w": s * jax.random.normal(ks[4], (FC1_IN, FC1_OUT), jnp.float32),
        "fc1_b": s * jax.random.normal(ks[5], (FC1_OUT,), jnp.float32),
        # fc2/fc3: present in LeNet, dead in DAMEmb.forward (kept for fidelity).
        "fc2_w": s * jax.random.normal(ks[6], (FC1_OUT, 84), jnp.float32),
        "fc2_b": s * jax.random.normal(ks[7], (84,), jnp.float32),
        "fc3_w": s * jax.random.normal(ks[8], (84, 10), jnp.float32),
        "fc3_b": s * jax.random.normal(ks[9], (10,), jnp.float32),
        # DAM head: Embedding(120, output_dim), Linear, ReLU, Linear
        "emb": s * jax.random.normal(ks[10], (FC1_OUT, output_dim), jnp.float32),
        "l1_w": s * jax.random.normal(ks[11], (output_dim, output_dim), jnp.float32),
        "l1_b": s * jax.random.normal(ks[12], (output_dim,), jnp.float32),
        "l2_w": s * jax.random.normal(ks[13], (output_dim, output_dim), jnp.float32),
        "l2_b": s * jax.random.normal(ks[14], (output_dim,), jnp.float32),
    }


# ---------------------------------------------------------------------------
# Pure-JAX reference (same semantics / same LeNet assumption), for validation
# ---------------------------------------------------------------------------
def _reference_forward(params, x_nchw):
    B = x_nchw.shape[0]
    x = jnp.transpose(x_nchw, (0, 2, 3, 1))                 # NHWC

    def im2col(a, k):
        Bb, H, W, C = a.shape
        Ho, Wo = H - k + 1, W - k + 1
        rows = []
        for di in range(k):
            cols = [a[:, di:di + Ho, dj:dj + Wo, :] for dj in range(k)]
            rows.append(jnp.stack(cols, axis=-1))
        p = jnp.stack(rows, axis=-2)                        # (B,Ho,Wo,C,di,dj)
        return p.reshape(Bb * Ho * Wo, C * k * k)

    def pool(a):
        Bb, H, W, C = a.shape
        return jnp.max(a.reshape(Bb, H // 2, 2, W // 2, 2, C), axis=(2, 4))

    def cw(w):
        O, C, kh, kw = w.shape
        return jnp.transpose(w, (1, 2, 3, 0)).reshape(C * kh * kw, O)

    c1 = jnp.maximum(im2col(x, KSZ) @ cw(params["conv1_w"]) + params["conv1_b"], 0.0)
    c1 = pool(c1.reshape(B, H1, H1, C1))
    c2 = jnp.maximum(im2col(c1, KSZ) @ cw(params["conv2_w"]) + params["conv2_b"], 0.0)
    c2 = pool(c2.reshape(B, H2, H2, C2))
    flat = jnp.transpose(c2, (0, 3, 1, 2)).reshape(B, FC1_IN)
    feats = jnp.maximum(flat @ params["fc1_w"] + params["fc1_b"], 0.0)
    idx = jnp.argmax(feats, axis=-1)
    emb = params["emb"][idx]
    h = jnp.maximum(emb @ params["l1_w"] + params["l1_b"], 0.0)
    return h @ params["l2_w"] + params["l2_b"]


if __name__ == "__main__":
    key = jax.random.PRNGKey(0)
    k_param, k_x = jax.random.split(key)
    params = init_params(k_param, output_dim=10)
    ops = build_kernel_operands(params)

    # LeNet-5 expects (B, 1, 32, 32) NCHW
    x = jax.random.normal(k_x, (2, 1, H0, H0), jnp.float32)

    fwd = jax.jit(dam_emb_forward)
    out = fwd(ops, x)
    out = jax.block_until_ready(out)

    assert out.shape == (2, 10), out.shape
    assert out.dtype == jnp.float32
    assert bool(jnp.all(jnp.isfinite(out)))

    ref = _reference_forward(params, x)
    assert bool(jnp.allclose(out, ref, rtol=2e-2, atol=2e-3)), (
        "max abs diff %s" % float(jnp.max(jnp.abs(out - ref))))

    print("KERNEL_OK")
</pallas_src>

<mosaic_0001>
module attributes {stable_mosaic.version = 11 : i64} {
  func.func @_dam_emb_kernel(%arg0: i32, %arg1: memref<64x32xf32, #tpu.memory_space<vmem>>, %arg2: memref<5x32x168xf32, #tpu.memory_space<vmem>>, %arg3: memref<1x168xf32, #tpu.memory_space<vmem>>, %arg4: memref<2x14x28xf32, #tpu.memory_space<vmem>>, %arg5: memref<2x168x84xf32, #tpu.memory_space<vmem>>, %arg6: memref<5x84x160xf32, #tpu.memory_space<vmem>>, %arg7: memref<1x160xf32, #tpu.memory_space<vmem>>, %arg8: memref<2x5x10xf32, #tpu.memory_space<vmem>>, %arg9: memref<2x160x80xf32, #tpu.memory_space<vmem>>, %arg10: memref<5x80x120xf32, #tpu.memory_space<vmem>>, %arg11: memref<1x120xf32, #tpu.memory_space<vmem>>, %arg12: memref<120x10xf32, #tpu.memory_space<vmem>>, %arg13: memref<10x10xf32, #tpu.memory_space<vmem>>, %arg14: memref<1x10xf32, #tpu.memory_space<vmem>>, %arg15: memref<10x10xf32, #tpu.memory_space<vmem>>, %arg16: memref<1x10xf32, #tpu.memory_space<vmem>>, %arg17: memref<1x2x10xf32, #tpu.memory_space<vmem>>, %arg18: memref<14x84xf32, #tpu.memory_space<vmem>>, %arg19: memref<14x84xf32, #tpu.memory_space<vmem>>, %arg20: memref<5x80xf32, #tpu.memory_space<vmem>>, %arg21: memref<5x80xf32, #tpu.memory_space<vmem>>) attributes {dimension_semantics = [#tpu.dimension_semantics<parallel>], iteration_bounds = array<i64: 1>, scalar_prefetch = 0 : i64, scratch_operands = 4 : i64, tpu.core_type = #tpu.core_type<tc>, window_params = [{transform_indices = @transform_0, window_bounds = array<i64: 64, 32>}, {pipeline_mode = #tpu.pipeline_mode<synchronous>, transform_indices = @transform_1, window_bounds = array<i64: 5, 32, 168>}, {pipeline_mode = #tpu.pipeline_mode<synchronous>, transform_indices = @transform_2, window_bounds = array<i64: 1, 168>}, {pipeline_mode = #tpu.pipeline_mode<synchronous>, transform_indices = @transform_3, window_bounds = array<i64: 2, 14, 28>}, {pipeline_mode = #tpu.pipeline_mode<synchronous>, transform_indices = @transform_4, window_bounds = array<i64: 2, 168, 84>}, {pipeline_mode = #tpu.pipeline_mode<synchronous>, transform_indices = @transform_5, window_bounds = array<i64: 5, 84, 160>}, {pipeline_mode = #tpu.pipeline_mode<synchronous>, transform_indices = @transform_6, window_bounds = array<i64: 1, 160>}, {pipeline_mode = #tpu.pipeline_mode<synchronous>, transform_indices = @transform_7, window_bounds = array<i64: 2, 5, 10>}, {pipeline_mode = #tpu.pipeline_mode<synchronous>, transform_indices = @transform_8, window_bounds = array<i64: 2, 160, 80>}, {pipeline_mode = #tpu.pipeline_mode<synchronous>, transform_indices = @transform_9, window_bounds = array<i64: 5, 80, 120>}, {pipeline_mode = #tpu.pipeline_mode<synchronous>, transform_indices = @transform_10, window_bounds = array<i64: 1, 120>}, {pipeline_mode = #tpu.pipeline_mode<synchronous>, transform_indices = @transform_11, window_bounds = array<i64: 120, 10>}, {pipeline_mode = #tpu.pipeline_mode<synchronous>, transform_indices = @transform_12, window_bounds = array<i64: 10, 10>}, {pipeline_mode = #tpu.pipeline_mode<synchronous>, transform_indices = @transform_13, window_bounds = array<i64: 1, 10>}, {pipeline_mode = #tpu.pipeline_mode<synchronous>, transform_indices = @transform_14, window_bounds = array<i64: 10, 10>}, {pipeline_mode = #tpu.pipeline_mode<synchronous>, transform_indices = @transform_15, window_bounds = array<i64: 1, 10>}, {transform_indices = @transform_16, window_bounds = array<i64: 1, 2, 10>}]} {
    %c0 = arith.constant 0 : index
    %c0_0 = arith.constant 0 : index
    %0 = vector.load %arg1[%c0, %c0_0] : memref<64x32xf32, #tpu.memory_space<vmem>>, vector<28x32xf32>
    %c0_1 = arith.constant 0 : index
    %c0_2 = arith.constant 0 : index
    %c0_3 = arith.constant 0 : index
    %1 = vector.load %arg2[%c0_1, %c0_2, %c0_3] : memref<5x32x168xf32, #tpu.memory_space<vmem>>, vector<1x32x168xf32>
    %2 = vector.shape_cast %1 : vector<1x32x168xf32> to vector<32x168xf32>
    %cst = arith.constant dense<0.000000e+00> : vector<28x168xf32>
    %3 = tpu.matmul %0, %2, %cst {dimension_numbers = #tpu.dot_dimension_numbers<[1], [0], [0], [1], [0, 0, 1, 1], [], []>} : vector<28x32xf32>, vector<32x168xf32>, vector<28x168xf32> -> vector<28x168xf32>
    %c1 = arith.constant 1 : index
    %c0_4 = arith.constant 0 : index
    %4 = vector.load %arg1[%c1, %c0_4] : memref<64x32xf32, #tpu.memory_space<vmem>>, vector<28x32xf32>
    %c1_5 = arith.constant 1 : index
    %c0_6 = arith.constant 0 : index
    %c0_7 = arith.constant 0 : index
    %5 = vector.load %arg2[%c1_5, %c0_6, %c0_7] : memref<5x32x168xf32, #tpu.memory_space<vmem>>, vector<1x32x168xf32>
    %6 = vector.shape_cast %5 : vector<1x32x168xf32> to vector<32x168xf32>
    %cst_8 = arith.constant dense<0.000000e+00> : vector<28x168xf32>
    %7 = tpu.matmul %4, %6, %cst_8 {dimension_numbers = #tpu.dot_dimension_numbers<[1], [0], [0], [1], [0, 0, 1, 1], [], []>} : vector<28x32xf32>, vector<32x168xf32>, vector<28x168xf32> -> vector<28x168xf32>
    %8 = arith.addf %3, %7 : vector<28x168xf32>
    %c2 = arith.constant 2 : index
    %c0_9 = arith.constant 0 : index
    %9 = vector.load %arg1[%c2, %c0_9] : memref<64x32xf32, #tpu.memory_space<vmem>>, vector<28x32xf32>
    %c2_10 = arith.constant 2 : index
    %c0_11 = arith.constant 0 : index
    %c0_12 = arith.constant 0 : index
    %10 = vector.load %arg2[%c2_10, %c0_11, %c0_12] : memref<5x32x168xf32, #tpu.memory_space<vmem>>, vector<1x32x168xf32>
    %11 = vector.shape_cast %10 : vector<1x32x168xf32> to vector<32x168xf32>
    %cst_13 = arith.constant dense<0.000000e+00> : vector<28x168xf32>
    %12 = tpu.matmul %9, %11, %cst_13 {dimension_numbers = #tpu.dot_dimension_numbers<[1], [0], [0], [1], [0, 0, 1, 1], [], []>} : vector<28x32xf32>, vector<32x168xf32>, vector<28x168xf32> -> vector<28x168xf32>
    %13 = arith.addf %8, %12 : vector<28x168xf32>
    %c3 = arith.constant 3 : index
    %c0_14 = arith.constant 0 : index
    %14 = vector.load %arg1[%c3, %c0_14] : memref<64x32xf32, #tpu.memory_space<vmem>>, vector<28x32xf32>
    %c3_15 = arith.constant 3 : index
    %c0_16 = arith.constant 0 : index
    %c0_17 = arith.constant 0 : index
    %15 = vector.load %arg2[%c3_15, %c0_16, %c0_17] : memref<5x32x168xf32, #tpu.memory_space<vmem>>, vector<1x32x168xf32>
    %16 = vector.shape_cast %15 : vector<1x32x168xf32> to vector<32x168xf32>
    %cst_18 = arith.constant dense<0.000000e+00> : vector<28x168xf32>
    %17 = tpu.matmul %14, %16, %cst_18 {dimension_numbers = #tpu.dot_dimension_numbers<[1], [0], [0], [1], [0, 0, 1, 1], [], []>} : vector<28x32xf32>, vector<32x168xf32>, vector<28x168xf32> -> vector<28x168xf32>
    %18 = arith.addf %13, %17 : vector<28x168xf32>
    %c4 = arith.constant 4 : index
    %c0_19 = arith.constant 0 : index
    %19 = vector.load %arg1[%c4, %c0_19] : memref<64x32xf32, #tpu.memory_space<vmem>>, vector<28x32xf32>
    %c4_20 = arith.constant 4 : index
    %c0_21 = arith.constant 0 : index
    %c0_22 = arith.constant 0 : index
    %20 = vector.load %arg2[%c4_20, %c0_21, %c0_22] : memref<5x32x168xf32, #tpu.memory_space<vmem>>, vector<1x32x168xf32>
    %21 = vector.shape_cast %20 : vector<1x32x168xf32> to vector<32x168xf32>
    %cst_23 = arith.constant dense<0.000000e+00> : vector<28x168xf32>
    %22 = tpu.matmul %19, %21, %cst_23 {dimension_numbers = #tpu.dot_dimension_numbers<[1], [0], [0], [1], [0, 0, 1, 1], [], []>} : vector<28x32xf32>, vector<32x168xf32>, vector<28x168xf32> -> vector<28x168xf32>
    %23 = arith.addf %18, %22 : vector<28x168xf32>
    %c0_24 = arith.constant 0 : index
    %c0_25 = arith.constant 0 : index
    %24 = vector.load %arg3[%c0_24, %c0_25] : memref<1x168xf32, #tpu.memory_space<vmem>>, vector<1x168xf32>
    %25 = vector.broadcast %24 : vector<1x168xf32> to vector<28x168xf32>
    %26 = arith.addf %23, %25 : vector<28x168xf32>
    %cst_26 = arith.constant 0.000000e+00 : f32
    %27 = vector.broadcast %cst_26 : f32 to vector<28x168xf32>
    %28 = arith.maximumf %26, %27 : vector<28x168xf32>
    %c0_27 = arith.constant 0 : index
    %c0_28 = arith.constant 0 : index
    %c0_29 = arith.constant 0 : index
    %29 = vector.load %arg5[%c0_27, %c0_28, %c0_29] : memref<2x168x84xf32, #tpu.memory_space<vmem>>, vector<1x168x84xf32>
    %30 = vector.shape_cast %29 : vector<1x168x84xf32> to vector<168x84xf32>
    %cst_30 = arith.constant dense<0.000000e+00> : vector<28x84xf32>
    %31 = tpu.matmul %28, %30, %cst_30 {dimension_numbers = #tpu.dot_dimension_numbers<[1], [0], [0], [1], [0, 0, 1, 1], [], []>} : vector<28x168xf32>, vector<168x84xf32>, vector<28x84xf32> -> vector<28x84xf32>
    %c1_31 = arith.constant 1 : index
    %c0_32 = arith.constant 0 : index
    %c0_33 = arith.constant 0 : index
    %32 = vector.load %arg5[%c1_31, %c0_32, %c0_33] : memref<2x168x84xf32, #tpu.memory_space<vmem>>, vector<1x168x84xf32>
    %33 = vector.shape_cast %32 : vector<1x168x84xf32> to vector<168x84xf32>
    %cst_34 = arith.constant dense<0.000000e+00> : vector<28x84xf32>
    %34 = tpu.matmul %28, %33, %cst_34 {dimension_numbers = #tpu.dot_dimension_numbers<[1], [0], [0], [1], [0, 0, 1, 1], [], []>} : vector<28x168xf32>, vector<168x84xf32>, vector<28x84xf32> -> vector<28x84xf32>
    %35 = arith.maximumf %31, %34 : vector<28x84xf32>
    %c0_35 = arith.constant 0 : index
    %c0_36 = arith.constant 0 : index
    %c0_37 = arith.constant 0 : index
    %36 = vector.load %arg4[%c0_35, %c0_36, %c0_37] : memref<2x14x28xf32, #tpu.memory_space<vmem>>, vector<1x14x28xf32>
    %37 = vector.shape_cast %36 : vector<1x14x28xf32> to vector<14x28xf32>
    %cst_38 = arith.constant dense<0.000000e+00> : vector<14x84xf32>
    %38 = tpu.matmul %37, %35, %cst_38 {dimension_numbers = #tpu.dot_dimension_numbers<[1], [0], [0], [1], [0, 0, 1, 1], [], []>} : vector<14x28xf32>, vector<28x84xf32>, vector<14x84xf32> -> vector<14x84xf32>
    %c1_39 = arith.constant 1 : index
    %c0_40 = arith.constant 0 : index
    %c0_41 = arith.constant 0 : index
    %39 = vector.load %arg4[%c1_39, %c0_40, %c0_41] : memref<2x14x28xf32, #tpu.memory_space<vmem>>, vector<1x14x28xf32>
    %40 = vector.shape_cast %39 : vector<1x14x28xf32> to vector<14x28xf32>
    %cst_42 = arith.constant dense<0.000000e+00> : vector<14x84xf32>
    %41 = tpu.matmul %40, %35, %cst_42 {dimension_numbers = #tpu.dot_dimension_numbers<[1], [0], [0], [1], [0, 0, 1, 1], [], []>} : vector<14x28xf32>, vector<28x84xf32>, vector<14x84xf32> -> vector<14x84xf32>
    %42 = arith.maximumf %38, %41 : vector<14x84xf32>
    %c0_43 = arith.constant 0 : index
    %c0_44 = arith.constant 0 : index
    %43 = vector.load %arg18[%c0_43, %c0_44] : memref<14x84xf32, #tpu.memory_space<vmem>>, vector<14x84xf32>
    tpu.vector_store %arg18[%c0_43, %c0_44], %42 {strides = array<i32>} : memref<14x84xf32, #tpu.memory_space<vmem>>, vector<14x84xf32>,
    %c0_45 = arith.constant 0 : index
    %c0_46 = arith.constant 0 : index
    %44 = vector.load %arg18[%c0_45, %c0_46] : memref<14x84xf32, #tpu.memory_space<vmem>>, vector<10x84xf32>
    %c0_47 = arith.constant 0 : index
    %c0_48 = arith.constant 0 : index
    %c0_49 = arith.constant 0 : index
    %45 = vector.load %arg6[%c0_47, %c0_48, %c0_49] : memref<5x84x160xf32, #tpu.memory_space<vmem>>, vector<1x84x160xf32>
    %46 = vector.shape_cast %45 : vector<1x84x160xf32> to vector<84x160xf32>
    %cst_50 = arith.constant dense<0.000000e+00> : vector<10x160xf32>
    %47 = tpu.matmul %44, %46, %cst_50 {dimension_numbers = #tpu.dot_dimension_numbers<[1], [0], [0], [1], [0, 0, 1, 1], [], []>} : vector<10x84xf32>, vector<84x160xf32>, vector<10x160xf32> -> vector<10x160xf32>
    %c1_51 = arith.constant 1 : index
    %c0_52 = arith.constant 0 : index
    %48 = vector.load %arg18[%c1_51, %c0_52] : memref<14x84xf32, #tpu.memory_space<vmem>>, vector<10x84xf32>
    %c1_53 = arith.constant 1 : index
    %c0_54 = arith.constant 0 : index
    %c0_55 = arith.constant 0 : index
    %49 = vector.load %arg6[%c1_53, %c0_54, %c0_55] : memref<5x84x160xf32, #tpu.memory_space<vmem>>, vector<1x84x160xf32>
    %50 = vector.shape_cast %49 : vector<1x84x160xf32> to vector<84x160xf32>
    %cst_56 = arith.constant dense<0.000000e+00> : vector<10x160xf32>
    %51 = tpu.matmul %48, %50, %cst_56 {dimension_numbers = #tpu.dot_dimension_numbers<[1], [0], [0], [1], [0, 0, 1, 1], [], []>} : vector<10x84xf32>, vector<84x160xf32>, vector<10x160xf32> -> vector<10x160xf32>
    %52 = arith.addf %47, %51 : vector<10x160xf32>
    %c2_57 = arith.constant 2 : index
    %c0_58 = arith.constant 0 : index
    %53 = vector.load %arg18[%c2_57, %c0_58] : memref<14x84xf32, #tpu.memory_space<vmem>>, vector<10x84xf32>
    %c2_59 = arith.constant 2 : index
    %c0_60 = arith.constant 0 : index
    %c0_61 = arith.constant 0 : index
    %54 = vector.load %arg6[%c2_59, %c0_60, %c0_61] : memref<5x84x160xf32, #tpu.memory_space<vmem>>, vector<1x84x160xf32>
    %55 = vector.shape_cast %54 : vector<1x84x160xf32> to vector<84x160xf32>
    %cst_62 = arith.constant dense<0.000000e+00> : vector<10x160xf32>
    %56 = tpu.matmul %53, %55, %cst_62 {dimension_numbers = #tpu.dot_dimension_numbers<[1], [0], [0], [1], [0, 0, 1, 1], [], []>} : vector<10x84xf32>, vector<84x160xf32>, vector<10x160xf32> -> vector<10x160xf32>
    %57 = arith.addf %52, %56 : vector<10x160xf32>
    %c3_63 = arith.constant 3 : index
    %c0_64 = arith.constant 0 : index
    %58 = vector.load %arg18[%c3_63, %c0_64] : memref<14x84xf32, #tpu.memory_space<vmem>>, vector<10x84xf32>
    %c3_65 = arith.constant 3 : index
    %c0_66 = arith.constant 0 : index
    %c0_67 = arith.constant 0 : index
    %59 = vector.load %arg6[%c3_65, %c0_66, %c0_67] : memref<5x84x160xf32, #tpu.memory_space<vmem>>, vector<1x84x160xf32>
    %60 = vector.shape_cast %59 : vector<1x84x160xf32> to vector<84x160xf32>
    %cst_68 = arith.constant dense<0.000000e+00> : vector<10x160xf32>
    %61 = tpu.matmul %58, %60, %cst_68 {dimension_numbers = #tpu.dot_dimension_numbers<[1], [0], [0], [1], [0, 0, 1, 1], [], []>} : vector<10x84xf32>, vector<84x160xf32>, vector<10x160xf32> -> vector<10x160xf32>
    %62 = arith.addf %57, %61 : vector<10x160xf32>
    %c4_69 = arith.constant 4 : index
    %c0_70 = arith.constant 0 : index
    %63 = vector.load %arg18[%c4_69, %c0_70] : memref<14x84xf32, #tpu.memory_space<vmem>>, vector<10x84xf32>
    %c4_71 = arith.constant 4 : index
    %c0_72 = arith.constant 0 : index
    %c0_73 = arith.constant 0 : index
    %64 = vector.load %arg6[%c4_71, %c0_72, %c0_73] : memref<5x84x160xf32, #tpu.memory_space<vmem>>, vector<1x84x160xf32>
    %65 = vector.shape_cast %64 : vector<1x84x160xf32> to vector<84x160xf32>
    %cst_74 = arith.constant dense<0.000000e+00> : vector<10x160xf32>
    %66 = tpu.matmul %63, %65, %cst_74 {dimension_numbers = #tpu.dot_dimension_numbers<[1], [0], [0], [1], [0, 0, 1, 1], [], []>} : vector<10x84xf32>, vector<84x160xf32>, vector<10x160xf32> -> vector<10x160xf32>
    %67 = arith.addf %62, %66 : vector<10x160xf32>
    %c0_75 = arith.constant 0 : index
    %c0_76 = arith.constant 0 : index
    %68 = vector.load %arg7[%c0_75, %c0_76] : memref<1x160xf32, #tpu.memory_space<vmem>>, vector<1x160xf32>
    %69 = vector.broadcast %68 : vector<1x160xf32> to vector<10x160xf32>
    %70 = arith.addf %67, %69 : vector<10x160xf32>
    %cst_77 = arith.constant 0.000000e+00 : f32
    %71 = vector.broadcast %cst_77 : f32 to vector<10x160xf32>
    %72 = arith.maximumf %70, %71 : vector<10x160xf32>
    %c0_78 = arith.constant 0 : index
    %c0_79 = arith.constant 0 : index
    %c0_80 = arith.constant 0 : index
    %73 = vector.load %arg9[%c0_78, %c0_79, %c0_80] : memref<2x160x80xf32, #tpu.memory_space<vmem>>, vector<1x160x80xf32>
    %74 = vector.shape_cast %73 : vector<1x160x80xf32> to vector<160x80xf32>
    %cst_81 = arith.constant dense<0.000000e+00> : vector<10x80xf32>
    %75 = tpu.matmul %72, %74, %cst_81 {dimension_numbers = #tpu.dot_dimension_numbers<[1], [0], [0], [1], [0, 0, 1, 1], [], []>} : vector<10x160xf32>, vector<160x80xf32>, vector<10x80xf32> -> vector<10x80xf32>
    %c1_82 = arith.constant 1 : index
    %c0_83 = arith.constant 0 : index
    %c0_84 = arith.constant 0 : index
    %76 = vector.load %arg9[%c1_82, %c0_83, %c0_84] : memref<2x160x80xf32, #tpu.memory_space<vmem>>, vector<1x160x80xf32>
    %77 = vector.shape_cast %76 : vector<1x160x80xf32> to vector<160x80xf32>
    %cst_85 = arith.constant dense<0.000000e+00> : vector<10x80xf32>
    %78 = tpu.matmul %72, %77, %cst_85 {dimension_numbers = #tpu.dot_dimension_numbers<[1], [0], [0], [1], [0, 0, 1, 1], [], []>} : vector<10x160xf32>, vector<160x80xf32>, vector<10x80xf32> -> vector<10x80xf32>
    %79 = arith.maximumf %75, %78 : vector<10x80xf32>
    %c0_86 = arith.constant 0 : index
    %c0_87 = arith.constant 0 : index
    %c0_88 = arith.constant 0 : index
    %80 = vector.load %arg8[%c0_86, %c0_87, %c0_88] : memref<2x5x10xf32, #tpu.memory_space<vmem>>, vector<1x5x10xf32>
    %81 = vector.shape_cast %80 : vector<1x5x10xf32> to vector<5x10xf32>
    %cst_89 = arith.constant dense<0.000000e+00> : vector<5x80xf32>
    %82 = tpu.matmul %81, %79, %cst_89 {dimension_numbers = #tpu.dot_dimension_numbers<[1], [0], [0], [1], [0, 0, 1, 1], [], []>} : vector<5x10xf32>, vector<10x80xf32>, vector<5x80xf32> -> vector<5x80xf32>
    %c1_90 = arith.constant 1 : index
    %c0_91 = arith.constant 0 : index
    %c0_92 = arith.constant 0 : index
    %83 = vector.load %arg8[%c1_90, %c0_91, %c0_92] : memref<2x5x10xf32, #tpu.memory_space<vmem>>, vector<1x5x10xf32>
    %84 = vector.shape_cast %83 : vector<1x5x10xf32> to vector<5x10xf32>
    %cst_93 = arith.constant dense<0.000000e+00> : vector<5x80xf32>
    %85 = tpu.matmul %84, %79, %cst_93 {dimension_numbers = #tpu.dot_dimension_numbers<[1], [0], [0], [1], [0, 0, 1, 1], [], []>} : vector<5x10xf32>, vector<10x80xf32>, vector<5x80xf32> -> vector<5x80xf32>
    %86 = arith.maximumf %82, %85 : vector<5x80xf32>
    %c0_94 = arith.constant 0 : index
    %c0_95 = arith.constant 0 : index
    %87 = vector.load %arg20[%c0_94, %c0_95] : memref<5x80xf32, #tpu.memory_space<vmem>>, vector<5x80xf32>
    tpu.vector_store %arg20[%c0_94, %c0_95], %86 {strides = array<i32>} : memref<5x80xf32, #tpu.memory_space<vmem>>, vector<5x80xf32>,
    %c0_96 = arith.constant 0 : index
    %c0_97 = arith.constant 0 : index
    %88 = vector.load %arg11[%c0_96, %c0_97] : memref<1x120xf32, #tpu.memory_space<vmem>>, vector<1x120xf32>
    %c0_98 = arith.constant 0 : index
    %c0_99 = arith.constant 0 : index
    %89 = vector.load %arg20[%c0_98, %c0_99] : memref<5x80xf32, #tpu.memory_space<vmem>>, vector<1x80xf32>
    %c0_100 = arith.constant 0 : index
    %c0_101 = arith.constant 0 : index
    %c0_102 = arith.constant 0 : index
    %90 = vector.load %arg10[%c0_100, %c0_101, %c0_102] : memref<5x80x120xf32, #tpu.memory_space<vmem>>, vector<1x80x120xf32>
    %91 = vector.shape_cast %90 : vector<1x80x120xf32> to vector<80x120xf32>
    %cst_103 = arith.constant dense<0.000000e+00> : vector<1x120xf32>
    %92 = tpu.matmul %89, %91, %cst_103 {dimension_numbers = #tpu.dot_dimension_numbers<[1], [0], [0], [1], [0, 0, 1, 1], [], []>} : vector<1x80xf32>, vector<80x120xf32>, vector<1x120xf32> -> vector<1x120xf32>
    %93 = arith.addf %88, %92 : vector<1x120xf32>
    %c1_104 = arith.constant 1 : index
    %c0_105 = arith.constant 0 : index
    %94 = vector.load %arg20[%c1_104, %c0_105] : memref<5x80xf32, #tpu.memory_space<vmem>>, vector<1x80xf32>
    %c1_106 = arith.constant 1 : index
    %c0_107 = arith.constant 0 : index
    %c0_108 = arith.constant 0 : index
    %95 = vector.load %arg10[%c1_106, %c0_107, %c0_108] : memref<5x80x120xf32, #tpu.memory_space<vmem>>, vector<1x80x120xf32>
    %96 = vector.shape_cast %95 : vector<1x80x120xf32> to vector<80x120xf32>
    %cst_109 = arith.constant dense<0.000000e+00> : vector<1x120xf32>
    %97 = tpu.matmul %94, %96, %cst_109 {dimension_numbers = #tpu.dot_dimension_numbers<[1], [0], [0], [1], [0, 0, 1, 1], [], []>} : vector<1x80xf32>, vector<80x120xf32>, vector<1x120xf32> -> vector<1x120xf32>
    %98 = arith.addf %93, %97 : vector<1x120xf32>
    %c2_110 = arith.constant 2 : index
    %c0_111 = arith.constant 0 : index
    %99 = vector.load %arg20[%c2_110, %c0_111] : memref<5x80xf32, #tpu.memory_space<vmem>>, vector<1x80xf32>
    %c2_112 = arith.constant 2 : index
    %c0_113 = arith.constant 0 : index
    %c0_114 = arith.constant 0 : index
    %100 = vector.load %arg10[%c2_112, %c0_113, %c0_114] : memref<5x80x120xf32, #tpu.memory_space<vmem>>, vector<1x80x120xf32>
    %101 = vector.shape_cast %100 : vector<1x80x120xf32> to vector<80x120xf32>
    %cst_115 = arith.constant dense<0.000000e+00> : vector<1x120xf32>
    %102 = tpu.matmul %99, %101, %cst_115 {dimension_numbers = #tpu.dot_dimension_numbers<[1], [0], [0], [1], [0, 0, 1, 1], [], []>} : vector<1x80xf32>, vector<80x120xf32>, vector<1x120xf32> -> vector<1x120xf32>
    %103 = arith.addf %98, %102 : vector<1x120xf32>
    %c3_116 = arith.constant 3 : index
    %c0_117 = arith.constant 0 : index
    %104 = vector.load %arg20[%c3_116, %c0_117] : memref<5x80xf32, #tpu.memory_space<vmem>>, vector<1x80xf32>
    %c3_118 = arith.constant 3 : index
    %c0_119 = arith.constant 0 : index
    %c0_120 = arith.constant 0 : index
    %105 = vector.load %arg10[%c3_118, %c0_119, %c0_120] : memref<5x80x120xf32, #tpu.memory_space<vmem>>, vector<1x80x120xf32>
    %106 = vector.shape_cast %105 : vector<1x80x120xf32> to vector<80x120xf32>
    %cst_121 = arith.constant dense<0.000000e+00> : vector<1x120xf32>
    %107 = tpu.matmul %104, %106, %cst_121 {dimension_numbers = #tpu.dot_dimension_numbers<[1], [0], [0], [1], [0, 0, 1, 1], [], []>} : vector<1x80xf32>, vector<80x120xf32>, vector<1x120xf32> -> vector<1x120xf32>
    %108 = arith.addf %103, %107 : vector<1x120xf32>
    %c4_122 = arith.constant 4 : index
    %c0_123 = arith.constant 0 : index
    %109 = vector.load %arg20[%c4_122, %c0_123] : memref<5x80xf32, #tpu.memory_space<vmem>>, vector<1x80xf32>
    %c4_124 = arith.constant 4 : index
    %c0_125 = arith.constant 0 : index
    %c0_126 = arith.constant 0 : index
    %110 = vector.load %arg10[%c4_124, %c0_125, %c0_126] : memref<5x80x120xf32, #tpu.memory_space<vmem>>, vector<1x80x120xf32>
    %111 = vector.shape_cast %110 : vector<1x80x120xf32> to vector<80x120xf32>
    %cst_127 = arith.constant dense<0.000000e+00> : vector<1x120xf32>
    %112 = tpu.matmul %109, %111, %cst_127 {dimension_numbers = #tpu.dot_dimension_numbers<[1], [0], [0], [1], [0, 0, 1, 1], [], []>} : vector<1x80xf32>, vector<80x120xf32>, vector<1x120xf32> -> vector<1x120xf32>
    %113 = arith.addf %108, %112 : vector<1x120xf32>
    %cst_128 = arith.constant 0.000000e+00 : f32
    %114 = vector.broadcast %cst_128 : f32 to vector<1x120xf32>
    %115 = arith.maximumf %113, %114 : vector<1x120xf32>
    %116 = tpu.iota {dimensions = array<i32: 1>} : vector<1x120xi32>
    %cst_129 = arith.constant dense<0xFF800000> : vector<1xf32>
    %117 = vector.multi_reduction <maximumf>, %115, %cst_129 [1] : vector<1x120xf32> to vector<1xf32>
    %118 = vector.shape_cast %117 : vector<1xf32> to vector<1x1xf32>
    %119 = vector.broadcast %118 : vector<1x1xf32> to vector<1x120xf32>
    %120 = arith.cmpf oeq, %115, %119 : vector<1x120xf32>
    %c120_i32 = arith.constant 120 : i32
    %121 = vector.broadcast %c120_i32 : i32 to vector<1x120xi32>
    %122 = arith.select %120, %116, %121 : vector<1x120xi1>, vector<1x120xi32>
    %cst_130 = arith.constant dense<2147483647> : vector<1xi32>
    %123 = vector.multi_reduction <minsi>, %122, %cst_130 [1] : vector<1x120xi32> to vector<1xi32>
    %124 = vector.shape_cast %123 : vector<1xi32> to vector<1x1xi32>
    %125 = vector.broadcast %124 : vector<1x1xi32> to vector<1x120xi32>
    %126 = arith.cmpi eq, %116, %125 : vector<1x120xi32>
    %127 = arith.extui %126 : vector<1x120xi1> to vector<1x120xi32>
    %128 = arith.sitofp %127 : vector<1x120xi32> to vector<1x120xf32>
    %c0_131 = arith.constant 0 : index
    %c0_132 = arith.constant 0 : index
    %129 = vector.load %arg12[%c0_131, %c0_132] : memref<120x10xf32, #tpu.memory_space<vmem>>, vector<120x10xf32>
    %cst_133 = arith.constant dense<0.000000e+00> : vector<1x10xf32>
    %130 = tpu.matmul %128, %129, %cst_133 {dimension_numbers = #tpu.dot_dimension_numbers<[1], [0], [0], [1], [0, 0, 1, 1], [], []>} : vector<1x120xf32>, vector<120x10xf32>, vector<1x10xf32> -> vector<1x10xf32>
    %c0_134 = arith.constant 0 : index
    %c0_135 = arith.constant 0 : index
    %131 = vector.load %arg13[%c0_134, %c0_135] : memref<10x10xf32, #tpu.memory_space<vmem>>, vector<10x10xf32>
    %cst_136 = arith.constant dense<0.000000e+00> : vector<1x10xf32>
    %132 = tpu.matmul %130, %131, %cst_136 {dimension_numbers = #tpu.dot_dimension_numbers<[1], [0], [0], [1], [0, 0, 1, 1], [], []>} : vector<1x10xf32>, vector<10x10xf32>, vector<1x10xf32> -> vector<1x10xf32>
    %c0_137 = arith.constant 0 : index
    %c0_138 = arith.constant 0 : index
    %133 = vector.load %arg14[%c0_137, %c0_138] : memref<1x10xf32, #tpu.memory_space<vmem>>, vector<1x10xf32>
    %134 = arith.addf %132, %133 : vector<1x10xf32>
    %cst_139 = arith.constant 0.000000e+00 : f32
    %135 = vector.broadcast %cst_139 : f32 to vector<1x10xf32>
    %136 = arith.maximumf %134, %135 : vector<1x10xf32>
    %c0_140 = arith.constant 0 : index
    %c0_141 = arith.constant 0 : index
    %137 = vector.load %arg15[%c0_140, %c0_141] : memref<10x10xf32, #tpu.memory_space<vmem>>, vector<10x10xf32>
    %cst_142 = arith.constant dense<0.000000e+00> : vector<1x10xf32>
    %138 = tpu.matmul %136, %137, %cst_142 {dimension_numbers = #tpu.dot_dimension_numbers<[1], [0], [0], [1], [0, 0, 1, 1], [], []>} : vector<1x10xf32>, vector<10x10xf32>, vector<1x10xf32> -> vector<1x10xf32>
    %c0_143 = arith.constant 0 : index
    %c0_144 = arith.constant 0 : index
    %139 = vector.load %arg16[%c0_143, %c0_144] : memref<1x10xf32, #tpu.memory_space<vmem>>, vector<1x10xf32>
    %140 = arith.addf %138, %139 : vector<1x10xf32>
    %c32 = arith.constant 32 : index
    %c0_145 = arith.constant 0 : index
    %141 = vector.load %arg1[%c32, %c0_145] : memref<64x32xf32, #tpu.memory_space<vmem>>, vector<28x32xf32>
    %c0_146 = arith.constant 0 : index
    %c0_147 = arith.constant 0 : index
    %c0_148 = arith.constant 0 : index
    %142 = vector.load %arg2[%c0_146, %c0_147, %c0_148] : memref<5x32x168xf32, #tpu.memory_space<vmem>>, vector<1x32x168xf32>
    %143 = vector.shape_cast %142 : vector<1x32x168xf32> to vector<32x168xf32>
    %cst_149 = arith.constant dense<0.000000e+00> : vector<28x168xf32>
    %144 = tpu.matmul %141, %143, %cst_149 {dimension_numbers = #tpu.dot_dimension_numbers<[1], [0], [0], [1], [0, 0, 1, 1], [], []>} : vector<28x32xf32>, vector<32x168xf32>, vector<28x168xf32> -> vector<28x168xf32>
    %c33 = arith.constant 33 : index
    %c0_150 = arith.constant 0 : index
    %145 = vector.load %arg1[%c33, %c0_150] : memref<64x32xf32, #tpu.memory_space<vmem>>, vector<28x32xf32>
    %c1_151 = arith.constant 1 : index
    %c0_152 = arith.constant 0 : index
    %c0_153 = arith.constant 0 : index
    %146 = vector.load %arg2[%c1_151, %c0_152, %c0_153] : memref<5x32x168xf32, #tpu.memory_space<vmem>>, vector<1x32x168xf32>
    %147 = vector.shape_cast %146 : vector<1x32x168xf32> to vector<32x168xf32>
    %cst_154 = arith.constant dense<0.000000e+00> : vector<28x168xf32>
    %148 = tpu.matmul %145, %147, %cst_154 {dimension_numbers = #tpu.dot_dimension_numbers<[1], [0], [0], [1], [0, 0, 1, 1], [], []>} : vector<28x32xf32>, vector<32x168xf32>, vector<28x168xf32> -> vector<28x168xf32>
    %149 = arith.addf %144, %148 : vector<28x168xf32>
    %c34 = arith.constant 34 : index
    %c0_155 = arith.constant 0 : index
    %150 = vector.load %arg1[%c34, %c0_155] : memref<64x32xf32, #tpu.memory_space<vmem>>, vector<28x32xf32>
    %c2_156 = arith.constant 2 : index
    %c0_157 = arith.constant 0 : index
    %c0_158 = arith.constant 0 : index
    %151 = vector.load %arg2[%c2_156, %c0_157, %c0_158] : memref<5x32x168xf32, #tpu.memory_space<vmem>>, vector<1x32x168xf32>
    %152 = vector.shape_cast %151 : vector<1x32x168xf32> to vector<32x168xf32>
    %cst_159 = arith.constant dense<0.000000e+00> : vector<28x168xf32>
    %153 = tpu.matmul %150, %152, %cst_159 {dimension_numbers = #tpu.dot_dimension_numbers<[1], [0], [0], [1], [0, 0, 1, 1], [], []>} : vector<28x32xf32>, vector<32x168xf32>, vector<28x168xf32> -> vector<28x168xf32>
    %154 = arith.addf %149, %153 : vector<28x168xf32>
    %c35 = arith.constant 35 : index
    %c0_160 = arith.constant 0 : index
    %155 = vector.load %arg1[%c35, %c0_160] : memref<64x32xf32, #tpu.memory_space<vmem>>, vector<28x32xf32>
    %c3_161 = arith.constant 3 : index
    %c0_162 = arith.constant 0 : index
    %c0_163 = arith.constant 0 : index
    %156 = vector.load %arg2[%c3_161, %c0_162, %c0_163] : memref<5x32x168xf32, #tpu.memory_space<vmem>>, vector<1x32x168xf32>
    %157 = vector.shape_cast %156 : vector<1x32x168xf32> to vector<32x168xf32>
    %cst_164 = arith.constant dense<0.000000e+00> : vector<28x168xf32>
    %158 = tpu.matmul %155, %157, %cst_164 {dimension_numbers = #tpu.dot_dimension_numbers<[1], [0], [0], [1], [0, 0, 1, 1], [], []>} : vector<28x32xf32>, vector<32x168xf32>, vector<28x168xf32> -> vector<28x168xf32>
    %159 = arith.addf %154, %158 : vector<28x168xf32>
    %c36 = arith.constant 36 : index
    %c0_165 = arith.constant 0 : index
    %160 = vector.load %arg1[%c36, %c0_165] : memref<64x32xf32, #tpu.memory_space<vmem>>, vector<28x32xf32>
    %c4_166 = arith.constant 4 : index
    %c0_167 = arith.constant 0 : index
    %c0_168 = arith.constant 0 : index
    %161 = vector.load %arg2[%c4_166, %c0_167, %c0_168] : memref<5x32x168xf32, #tpu.memory_space<vmem>>, vector<1x32x168xf32>
    %162 = vector.shape_cast %161 : vector<1x32x168xf32> to vector<32x168xf32>
    %cst_169 = arith.constant dense<0.000000e+00> : vector<28x168xf32>
    %163 = tpu.matmul %160, %162, %cst_169 {dimension_numbers = #tpu.dot_dimension_numbers<[1], [0], [0], [1], [0, 0, 1, 1], [], []>} : vector<28x32xf32>, vector<32x168xf32>, vector<28x168xf32> -> vector<28x168xf32>
    %164 = arith.addf %159, %163 : vector<28x168xf32>
    %c0_170 = arith.constant 0 : index
    %c0_171 = arith.constant 0 : index
    %165 = vector.load %arg3[%c0_170, %c0_171] : memref<1x168xf32, #tpu.memory_space<vmem>>, vector<1x168xf32>
    %166 = vector.broadcast %165 : vector<1x168xf32> to vector<28x168xf32>
    %167 = arith.addf %164, %166 : vector<28x168xf32>
    %cst_172 = arith.constant 0.000000e+00 : f32
    %168 = vector.broadcast %cst_172 : f32 to vector<28x168xf32>
    %169 = arith.maximumf %167, %168 : vector<28x168xf32>
    %c0_173 = arith.constant 0 : index
    %c0_174 = arith.constant 0 : index
    %c0_175 = arith.constant 0 : index
    %170 = vector.load %arg5[%c0_173, %c0_174, %c0_175] : memref<2x168x84xf32, #tpu.memory_space<vmem>>, vector<1x168x84xf32>
    %171 = vector.shape_cast %170 : vector<1x168x84xf32> to vector<168x84xf32>
    %cst_176 = arith.constant dense<0.000000e+00> : vector<28x84xf32>
    %172 = tpu.matmul %169, %171, %cst_176 {dimension_numbers = #tpu.dot_dimension_numbers<[1], [0], [0], [1], [0, 0, 1, 1], [], []>} : vector<28x168xf32>, vector<168x84xf32>, vector<28x84xf32> -> vector<28x84xf32>
    %c1_177 = arith.constant 1 : index
    %c0_178 = arith.constant 0 : index
    %c0_179 = arith.constant 0 : index
    %173 = vector.load %arg5[%c1_177, %c0_178, %c0_179] : memref<2x168x84xf32, #tpu.memory_space<vmem>>, vector<1x168x84xf32>
    %174 = vector.shape_cast %173 : vector<1x168x84xf32> to vector<168x84xf32>
    %cst_180 = arith.constant dense<0.000000e+00> : vector<28x84xf32>
    %175 = tpu.matmul %169, %174, %cst_180 {dimension_numbers = #tpu.dot_dimension_numbers<[1], [0], [0], [1], [0, 0, 1, 1], [], []>} : vector<28x168xf32>, vector<168x84xf32>, vector<28x84xf32> -> vector<28x84xf32>
    %176 = arith.maximumf %172, %175 : vector<28x84xf32>
    %c0_181 = arith.constant 0 : index
    %c0_182 = arith.constant 0 : index
    %c0_183 = arith.constant 0 : index
    %177 = vector.load %arg4[%c0_181, %c0_182, %c0_183] : memref<2x14x28xf32, #tpu.memory_space<vmem>>, vector<1x14x28xf32>
    %178 = vector.shape_cast %177 : vector<1x14x28xf32> to vector<14x28xf32>
    %cst_184 = arith.constant dense<0.000000e+00> : vector<14x84xf32>
    %179 = tpu.matmul %178, %176, %cst_184 {dimension_numbers = #tpu.dot_dimension_numbers<[1], [0], [0], [1], [0, 0, 1, 1], [], []>} : vector<14x28xf32>, vector<28x84xf32>, vector<14x84xf32> -> vector<14x84xf32>
    %c1_185 = arith.constant 1 : index
    %c0_186 = arith.constant 0 : index
    %c0_187 = arith.constant 0 : index
    %180 = vector.load %arg4[%c1_185, %c0_186, %c0_187] : memref<2x14x28xf32, #tpu.memory_space<vmem>>, vector<1x14x28xf32>
    %181 = vector.shape_cast %180 : vector<1x14x28xf32> to vector<14x28xf32>
    %cst_188 = arith.constant dense<0.000000e+00> : vector<14x84xf32>
    %182 = tpu.matmul %181, %176, %cst_188 {dimension_numbers = #tpu.dot_dimension_numbers<[1], [0], [0], [1], [0, 0, 1, 1], [], []>} : vector<14x28xf32>, vector<28x84xf32>, vector<14x84xf32> -> vector<14x84xf32>
    %183 = arith.maximumf %179, %182 : vector<14x84xf32>
    %c0_189 = arith.constant 0 : index
    %c0_190 = arith.constant 0 : index
    %184 = vector.load %arg19[%c0_189, %c0_190] : memref<14x84xf32, #tpu.memory_space<vmem>>, vector<14x84xf32>
    tpu.vector_store %arg19[%c0_189, %c0_190], %183 {strides = array<i32>} : memref<14x84xf32, #tpu.memory_space<vmem>>, vector<14x84xf32>,
    %c0_191 = arith.constant 0 : index
    %c0_192 = arith.constant 0 : index
    %185 = vector.load %arg19[%c0_191, %c0_192] : memref<14x84xf32, #tpu.memory_space<vmem>>, vector<10x84xf32>
    %c0_193 = arith.constant 0 : index
    %c0_194 = arith.constant 0 : index
    %c0_195 = arith.constant 0 : index
    %186 = vector.load %arg6[%c0_193, %c0_194, %c0_195] : memref<5x84x160xf32, #tpu.memory_space<vmem>>, vector<1x84x160xf32>
    %187 = vector.shape_cast %186 : vector<1x84x160xf32> to vector<84x160xf32>
    %cst_196 = arith.constant dense<0.000000e+00> : vector<10x160xf32>
    %188 = tpu.matmul %185, %187, %cst_196 {dimension_numbers = #tpu.dot_dimension_numbers<[1], [0], [0], [1], [0, 0, 1, 1], [], []>} : vector<10x84xf32>, vector<84x160xf32>, vector<10x160xf32> -> vector<10x160xf32>
    %c1_197 = arith.constant 1 : index
    %c0_198 = arith.constant 0 : index
    %189 = vector.load %arg19[%c1_197, %c0_198] : memref<14x84xf32, #tpu.memory_space<vmem>>, vector<10x84xf32>
    %c1_199 = arith.constant 1 : index
    %c0_200 = arith.constant 0 : index
    %c0_201 = arith.constant 0 : index
    %190 = vector.load %arg6[%c1_199, %c0_200, %c0_201] : memref<5x84x160xf32, #tpu.memory_space<vmem>>, vector<1x84x160xf32>
    %191 = vector.shape_cast %190 : vector<1x84x160xf32> to vector<84x160xf32>
    %cst_202 = arith.constant dense<0.000000e+00> : vector<10x160xf32>
    %192 = tpu.matmul %189, %191, %cst_202 {dimension_numbers = #tpu.dot_dimension_numbers<[1], [0], [0], [1], [0, 0, 1, 1], [], []>} : vector<10x84xf32>, vector<84x160xf32>, vector<10x160xf32> -> vector<10x160xf32>
    %193 = arith.addf %188, %192 : vector<10x160xf32>
    %c2_203 = arith.constant 2 : index
    %c0_204 = arith.constant 0 : index
    %194 = vector.load %arg19[%c2_203, %c0_204] : memref<14x84xf32, #tpu.memory_space<vmem>>, vector<10x84xf32>
    %c2_205 = arith.constant 2 : index
    %c0_206 = arith.constant 0 : index
    %c0_207 = arith.constant 0 : index
    %195 = vector.load %arg6[%c2_205, %c0_206, %c0_207] : memref<5x84x160xf32, #tpu.memory_space<vmem>>, vector<1x84x160xf32>
    %196 = vector.shape_cast %195 : vector<1x84x160xf32> to vector<84x160xf32>
    %cst_208 = arith.constant dense<0.000000e+00> : vector<10x160xf32>
    %197 = tpu.matmul %194, %196, %cst_208 {dimension_numbers = #tpu.dot_dimension_numbers<[1], [0], [0], [1], [0, 0, 1, 1], [], []>} : vector<10x84xf32>, vector<84x160xf32>, vector<10x160xf32> -> vector<10x160xf32>
    %198 = arith.addf %193, %197 : vector<10x160xf32>
    %c3_209 = arith.constant 3 : index
    %c0_210 = arith.constant 0 : index
    %199 = vector.load %arg19[%c3_209, %c0_210] : memref<14x84xf32, #tpu.memory_space<vmem>>, vector<10x84xf32>
    %c3_211 = arith.constant 3 : index
    %c0_212 = arith.constant 0 : index
    %c0_213 = arith.constant 0 : index
    %200 = vector.load %arg6[%c3_211, %c0_212, %c0_213] : memref<5x84x160xf32, #tpu.memory_space<vmem>>, vector<1x84x160xf32>
    %201 = vector.shape_cast %200 : vector<1x84x160xf32> to vector<84x160xf32>
    %cst_214 = arith.constant dense<0.000000e+00> : vector<10x160xf32>
    %202 = tpu.matmul %199, %201, %cst_214 {dimension_numbers = #tpu.dot_dimension_numbers<[1], [0], [0], [1], [0, 0, 1, 1], [], []>} : vector<10x84xf32>, vector<84x160xf32>, vector<10x160xf32> -> vector<10x160xf32>
    %203 = arith.addf %198, %202 : vector<10x160xf32>
    %c4_215 = arith.constant 4 : index
    %c0_216 = arith.constant 0 : index
    %204 = vector.load %arg19[%c4_215, %c0_216] : memref<14x84xf32, #tpu.memory_space<vmem>>, vector<10x84xf32>
    %c4_217 = arith.constant 4 : index
    %c0_218 = arith.constant 0 : index
    %c0_219 = arith.constant 0 : index
    %205 = vector.load %arg6[%c4_217, %c0_218, %c0_219] : memref<5x84x160xf32, #tpu.memory_space<vmem>>, vector<1x84x160xf32>
    %206 = vector.shape_cast %205 : vector<1x84x160xf32> to vector<84x160xf32>
    %cst_220 = arith.constant dense<0.000000e+00> : vector<10x160xf32>
    %207 = tpu.matmul %204, %206, %cst_220 {dimension_numbers = #tpu.dot_dimension_numbers<[1], [0], [0], [1], [0, 0, 1, 1], [], []>} : vector<10x84xf32>, vector<84x160xf32>, vector<10x160xf32> -> vector<10x160xf32>
    %208 = arith.addf %203, %207 : vector<10x160xf32>
    %c0_221 = arith.constant 0 : index
    %c0_222 = arith.constant 0 : index
    %209 = vector.load %arg7[%c0_221, %c0_222] : memref<1x160xf32, #tpu.memory_space<vmem>>, vector<1x160xf32>
    %210 = vector.broadcast %209 : vector<1x160xf32> to vector<10x160xf32>
    %211 = arith.addf %208, %210 : vector<10x160xf32>
    %cst_223 = arith.constant 0.000000e+00 : f32
    %212 = vector.broadcast %cst_223 : f32 to vector<10x160xf32>
    %213 = arith.maximumf %211, %212 : vector<10x160xf32>
    %c0_224 = arith.constant 0 : index
    %c0_225 = arith.constant 0 : index
    %c0_226 = arith.constant 0 : index
    %214 = vector.load %arg9[%c0_224, %c0_225, %c0_226] : memref<2x160x80xf32, #tpu.memory_space<vmem>>, vector<1x160x80xf32>
    %215 = vector.shape_cast %214 : vector<1x160x80xf32> to vector<160x80xf32>
    %cst_227 = arith.constant dense<0.000000e+00> : vector<10x80xf32>
    %216 = tpu.matmul %213, %215, %cst_227 {dimension_numbers = #tpu.dot_dimension_numbers<[1], [0], [0], [1], [0, 0, 1, 1], [], []>} : vector<10x160xf32>, vector<160x80xf32>, vector<10x80xf32> -> vector<10x80xf32>
    %c1_228 = arith.constant 1 : index
    %c0_229 = arith.constant 0 : index
    %c0_230 = arith.constant 0 : index
    %217 = vector.load %arg9[%c1_228, %c0_229, %c0_230] : memref<2x160x80xf32, #tpu.memory_space<vmem>>, vector<1x160x80xf32>
    %218 = vector.shape_cast %217 : vector<1x160x80xf32> to vector<160x80xf32>
    %cst_231 = arith.constant dense<0.000000e+00> : vector<10x80xf32>
    %219 = tpu.matmul %213, %218, %cst_231 {dimension_numbers = #tpu.dot_dimension_numbers<[1], [0], [0], [1], [0, 0, 1, 1], [], []>} : vector<10x160xf32>, vector<160x80xf32>, vector<10x80xf32> -> vector<10x80xf32>
    %220 = arith.maximumf %216, %219 : vector<10x80xf32>
    %c0_232 = arith.constant 0 : index
    %c0_233 = arith.constant 0 : index
    %c0_234 = arith.constant 0 : index
    %221 = vector.load %arg8[%c0_232, %c0_233, %c0_234] : memref<2x5x10xf32, #tpu.memory_space<vmem>>, vector<1x5x10xf32>
    %222 = vector.shape_cast %221 : vector<1x5x10xf32> to vector<5x10xf32>
    %cst_235 = arith.constant dense<0.000000e+00> : vector<5x80xf32>
    %223 = tpu.matmul %222, %220, %cst_235 {dimension_numbers = #tpu.dot_dimension_numbers<[1], [0], [0], [1], [0, 0, 1, 1], [], []>} : vector<5x10xf32>, vector<10x80xf32>, vector<5x80xf32> -> vector<5x80xf32>
    %c1_236 = arith.constant 1 : index
    %c0_237 = arith.constant 0 : index
    %c0_238 = arith.constant 0 : index
    %224 = vector.load %arg8[%c1_236, %c0_237, %c0_238] : memref<2x5x10xf32, #tpu.memory_space<vmem>>, vector<1x5x10xf32>
    %225 = vector.shape_cast %224 : vector<1x5x10xf32> to vector<5x10xf32>
    %cst_239 = arith.constant dense<0.000000e+00> : vector<5x80xf32>
    %226 = tpu.matmul %225, %220, %cst_239 {dimension_numbers = #tpu.dot_dimension_numbers<[1], [0], [0], [1], [0, 0, 1, 1], [], []>} : vector<5x10xf32>, vector<10x80xf32>, vector<5x80xf32> -> vector<5x80xf32>
    %227 = arith.maximumf %223, %226 : vector<5x80xf32>
    %c0_240 = arith.constant 0 : index
    %c0_241 = arith.constant 0 : index
    %228 = vector.load %arg21[%c0_240, %c0_241] : memref<5x80xf32, #tpu.memory_space<vmem>>, vector<5x80xf32>
    tpu.vector_store %arg21[%c0_240, %c0_241], %227 {strides = array<i32>} : memref<5x80xf32, #tpu.memory_space<vmem>>, vector<5x80xf32>,
    %c0_242 = arith.constant 0 : index
    %c0_243 = arith.constant 0 : index
    %229 = vector.load %arg11[%c0_242, %c0_243] : memref<1x120xf32, #tpu.memory_space<vmem>>, vector<1x120xf32>
    %c0_244 = arith.constant 0 : index
    %c0_245 = arith.constant 0 : index
    %230 = vector.load %arg21[%c0_244, %c0_245] : memref<5x80xf32, #tpu.memory_space<vmem>>, vector<1x80xf32>
    %c0_246 = arith.constant 0 : index
    %c0_247 = arith.constant 0 : index
    %c0_248 = arith.constant 0 : index
    %231 = vector.load %arg10[%c0_246, %c0_247, %c0_248] : memref<5x80x120xf32, #tpu.memory_space<vmem>>, vector<1x80x120xf32>
    %232 = vector.shape_cast %231 : vector<1x80x120xf32> to vector<80x120xf32>
    %cst_249 = arith.constant dense<0.000000e+00> : vector<1x120xf32>
    %233 = tpu.matmul %230, %232, %cst_249 {dimension_numbers = #tpu.dot_dimension_numbers<[1], [0], [0], [1], [0, 0, 1, 1], [], []>} : vector<1x80xf32>, vector<80x120xf32>, vector<1x120xf32> -> vector<1x120xf32>
    %234 = arith.addf %229, %233 : vector<1x120xf32>
    %c1_250 = arith.constant 1 : index
    %c0_251 = arith.constant 0 : index
    %235 = vector.load %arg21[%c1_250, %c0_251] : memref<5x80xf32, #tpu.memory_space<vmem>>, vector<1x80xf32>
    %c1_252 = arith.constant 1 : index
    %c0_253 = arith.constant 0 : index
    %c0_254 = arith.constant 0 : index
    %236 = vector.load %arg10[%c1_252, %c0_253, %c0_254] : memref<5x80x120xf32, #tpu.memory_space<vmem>>, vector<1x80x120xf32>
    %237 = vector.shape_cast %236 : vector<1x80x120xf32> to vector<80x120xf32>
    %cst_255 = arith.constant dense<0.000000e+00> : vector<1x120xf32>
    %238 = tpu.matmul %235, %237, %cst_255 {dimension_numbers = #tpu.dot_dimension_numbers<[1], [0], [0], [1], [0, 0, 1, 1], [], []>} : vector<1x80xf32>, vector<80x120xf32>, vector<1x120xf32> -> vector<1x120xf32>
    %239 = arith.addf %234, %238 : vector<1x120xf32>
    %c2_256 = arith.constant 2 : index
    %c0_257 = arith.constant 0 : index
    %240 = vector.load %arg21[%c2_256, %c0_257] : memref<5x80xf32, #tpu.memory_space<vmem>>, vector<1x80xf32>
    %c2_258 = arith.constant 2 : index
    %c0_259 = arith.constant 0 : index
    %c0_260 = arith.constant 0 : index
    %241 = vector.load %arg10[%c2_258, %c0_259, %c0_260] : memref<5x80x120xf32, #tpu.memory_space<vmem>>, vector<1x80x120xf32>
    %242 = vector.shape_cast %241 : vector<1x80x120xf32> to vector<80x120xf32>
    %cst_261 = arith.constant dense<0.000000e+00> : vector<1x120xf32>
    %243 = tpu.matmul %240, %242, %cst_261 {dimension_numbers = #tpu.dot_dimension_numbers<[1], [0], [0], [1], [0, 0, 1, 1], [], []>} : vector<1x80xf32>, vector<80x120xf32>, vector<1x120xf32> -> vector<1x120xf32>
    %244 = arith.addf %239, %243 : vector<1x120xf32>
    %c3_262 = arith.constant 3 : index
    %c0_263 = arith.constant 0 : index
    %245 = vector.load %arg21[%c3_262, %c0_263] : memref<5x80xf32, #tpu.memory_space<vmem>>, vector<1x80xf32>
    %c3_264 = arith.constant 3 : index
    %c0_265 = arith.constant 0 : index
    %c0_266 = arith.constant 0 : index
    %246 = vector.load %arg10[%c3_264, %c0_265, %c0_266] : memref<5x80x120xf32, #tpu.memory_space<vmem>>, vector<1x80x120xf32>
    %247 = vector.shape_cast %246 : vector<1x80x120xf32> to vector<80x120xf32>
    %cst_267 = arith.constant dense<0.000000e+00> : vector<1x120xf32>
    %248 = tpu.matmul %245, %247, %cst_267 {dimension_numbers = #tpu.dot_dimension_numbers<[1], [0], [0], [1], [0, 0, 1, 1], [], []>} : vector<1x80xf32>, vector<80x120xf32>, vector<1x120xf32> -> vector<1x120xf32>
    %249 = arith.addf %244, %248 : vector<1x120xf32>
    %c4_268 = arith.constant 4 : index
    %c0_269 = arith.constant 0 : index
    %250 = vector.load %arg21[%c4_268, %c0_269] : memref<5x80xf32, #tpu.memory_space<vmem>>, vector<1x80xf32>
    %c4_270 = arith.constant 4 : index
    %c0_271 = arith.constant 0 : index
    %c0_272 = arith.constant 0 : index
    %251 = vector.load %arg10[%c4_270, %c0_271, %c0_272] : memref<5x80x120xf32, #tpu.memory_space<vmem>>, vector<1x80x120xf32>
    %252 = vector.shape_cast %251 : vector<1x80x120xf32> to vector<80x120xf32>
    %cst_273 = arith.constant dense<0.000000e+00> : vector<1x120xf32>
    %253 = tpu.matmul %250, %252, %cst_273 {dimension_numbers = #tpu.dot_dimension_numbers<[1], [0], [0], [1], [0, 0, 1, 1], [], []>} : vector<1x80xf32>, vector<80x120xf32>, vector<1x120xf32> -> vector<1x120xf32>
    %254 = arith.addf %249, %253 : vector<1x120xf32>
    %cst_274 = arith.constant 0.000000e+00 : f32
    %255 = vector.broadcast %cst_274 : f32 to vector<1x120xf32>
    %256 = arith.maximumf %254, %255 : vector<1x120xf32>
    %257 = tpu.iota {dimensions = array<i32: 1>} : vector<1x120xi32>
    %cst_275 = arith.constant dense<0xFF800000> : vector<1xf32>
    %258 = vector.multi_reduction <maximumf>, %256, %cst_275 [1] : vector<1x120xf32> to vector<1xf32>
    %259 = vector.shape_cast %258 : vector<1xf32> to vector<1x1xf32>
    %260 = vector.broadcast %259 : vector<1x1xf32> to vector<1x120xf32>
    %261 = arith.cmpf oeq, %256, %260 : vector<1x120xf32>
    %c120_i32_276 = arith.constant 120 : i32
    %262 = vector.broadcast %c120_i32_276 : i32 to vector<1x120xi32>
    %263 = arith.select %261, %257, %262 : vector<1x120xi1>, vector<1x120xi32>
    %cst_277 = arith.constant dense<2147483647> : vector<1xi32>
    %264 = vector.multi_reduction <minsi>, %263, %cst_277 [1] : vector<1x120xi32> to vector<1xi32>
    %265 = vector.shape_cast %264 : vector<1xi32> to vector<1x1xi32>
    %266 = vector.broadcast %265 : vector<1x1xi32> to vector<1x120xi32>
    %267 = arith.cmpi eq, %257, %266 : vector<1x120xi32>
    %268 = arith.extui %267 : vector<1x120xi1> to vector<1x120xi32>
    %269 = arith.sitofp %268 : vector<1x120xi32> to vector<1x120xf32>
    %c0_278 = arith.constant 0 : index
    %c0_279 = arith.constant 0 : index
    %270 = vector.load %arg12[%c0_278, %c0_279] : memref<120x10xf32, #tpu.memory_space<vmem>>, vector<120x10xf32>
    %cst_280 = arith.constant dense<0.000000e+00> : vector<1x10xf32>
    %271 = tpu.matmul %269, %270, %cst_280 {dimension_numbers = #tpu.dot_dimension_numbers<[1], [0], [0], [1], [0, 0, 1, 1], [], []>} : vector<1x120xf32>, vector<120x10xf32>, vector<1x10xf32> -> vector<1x10xf32>
    %c0_281 = arith.constant 0 : index
    %c0_282 = arith.constant 0 : index
    %272 = vector.load %arg13[%c0_281, %c0_282] : memref<10x10xf32, #tpu.memory_space<vmem>>, vector<10x10xf32>
    %cst_283 = arith.constant dense<0.000000e+00> : vector<1x10xf32>
    %273 = tpu.matmul %271, %272, %cst_283 {dimension_numbers = #tpu.dot_dimension_numbers<[1], [0], [0], [1], [0, 0, 1, 1], [], []>} : vector<1x10xf32>, vector<10x10xf32>, vector<1x10xf32> -> vector<1x10xf32>
    %c0_284 = arith.constant 0 : index
    %c0_285 = arith.constant 0 : index
    %274 = vector.load %arg14[%c0_284, %c0_285] : memref<1x10xf32, #tpu.memory_space<vmem>>, vector<1x10xf32>
    %275 = arith.addf %273, %274 : vector<1x10xf32>
    %cst_286 = arith.constant 0.000000e+00 : f32
    %276 = vector.broadcast %cst_286 : f32 to vector<1x10xf32>
    %277 = arith.maximumf %275, %276 : vector<1x10xf32>
    %c0_287 = arith.constant 0 : index
    %c0_288 = arith.constant 0 : index
    %278 = vector.load %arg15[%c0_287, %c0_288] : memref<10x10xf32, #tpu.memory_space<vmem>>, vector<10x10xf32>
    %cst_289 = arith.constant dense<0.000000e+00> : vector<1x10xf32>
    %279 = tpu.matmul %277, %278, %cst_289 {dimension_numbers = #tpu.dot_dimension_numbers<[1], [0], [0], [1], [0, 0, 1, 1], [], []>} : vector<1x10xf32>, vector<10x10xf32>, vector<1x10xf32> -> vector<1x10xf32>
    %c0_290 = arith.constant 0 : index
    %c0_291 = arith.constant 0 : index
    %280 = vector.load %arg16[%c0_290, %c0_291] : memref<1x10xf32, #tpu.memory_space<vmem>>, vector<1x10xf32>
    %281 = arith.addf %279, %280 : vector<1x10xf32>
    %282 = tpu.concatenate %140, %281 in 0 : vector<1x10xf32>, vector<1x10xf32> -> vector<2x10xf32>
    %c0_292 = arith.constant 0 : index
    %c0_293 = arith.constant 0 : index
    %c0_294 = arith.constant 0 : index
    %283 = vector.load %arg17[%c0_292, %c0_293, %c0_294] : memref<1x2x10xf32, #tpu.memory_space<vmem>>, vector<1x2x10xf32>
    %284 = vector.shape_cast %283 : vector<1x2x10xf32> to vector<2x10xf32>
    %285 = vector.shape_cast %282 : vector<2x10xf32> to vector<1x2x10xf32>
    tpu.vector_store %arg17[%c0_292, %c0_293, %c0_294], %285 {strides = array<i32>} : memref<1x2x10xf32, #tpu.memory_space<vmem>>, vector<1x2x10xf32>,
    return
  }
  func.func @transform_0(%arg0: i32) -> (i32, i32) {
    %c0_i32 = arith.constant 0 : i32
    %c0_i32_0 = arith.constant 0 : i32
    return %arg0, %c0_i32 : i32, i32
  }
  func.func @transform_1(%arg0: i32) -> (i32, i32, i32) {
    %c0_i32 = arith.constant 0 : i32
    %c0_i32_0 = arith.constant 0 : i32
    %c0_i32_1 = arith.constant 0 : i32
    %c0_i32_2 = arith.constant 0 : i32
    return %c0_i32, %c0_i32_0, %c0_i32_1 : i32, i32, i32
  }
  func.func @transform_2(%arg0: i32) -> (i32, i32) {
    %c0_i32 = arith.constant 0 : i32
    %c0_i32_0 = arith.constant 0 : i32
    %c0_i32_1 = arith.constant 0 : i32
    return %c0_i32, %c0_i32_0 : i32, i32
  }
  func.func @transform_3(%arg0: i32) -> (i32, i32, i32) {
    %c0_i32 = arith.constant 0 : i32
    %c0_i32_0 = arith.constant 0 : i32
    %c0_i32_1 = arith.constant 0 : i32
    %c0_i32_2 = arith.constant 0 : i32
    return %c0_i32, %c0_i32_0, %c0_i32_1 : i32, i32, i32
  }
  func.func @transform_4(%arg0: i32) -> (i32, i32, i32) {
    %c0_i32 = arith.constant 0 : i32
    %c0_i32_0 = arith.constant 0 : i32
    %c0_i32_1 = arith.constant 0 : i32
    %c0_i32_2 = arith.constant 0 : i32
    return %c0_i32, %c0_i32_0, %c0_i32_1 : i32, i32, i32
  }
  func.func @transform_5(%arg0: i32) -> (i32, i32, i32) {
    %c0_i32 = arith.constant 0 : i32
    %c0_i32_0 = arith.constant 0 : i32
    %c0_i32_1 = arith.constant 0 : i32
    %c0_i32_2 = arith.constant 0 : i32
    return %c0_i32, %c0_i32_0, %c0_i32_1 : i32, i32, i32
  }
  func.func @transform_6(%arg0: i32) -> (i32, i32) {
    %c0_i32 = arith.constant 0 : i32
    %c0_i32_0 = arith.constant 0 : i32
    %c0_i32_1 = arith.constant 0 : i32
    return %c0_i32, %c0_i32_0 : i32, i32
  }
  func.func @transform_7(%arg0: i32) -> (i32, i32, i32) {
    %c0_i32 = arith.constant 0 : i32
    %c0_i32_0 = arith.constant 0 : i32
    %c0_i32_1 = arith.constant 0 : i32
    %c0_i32_2 = arith.constant 0 : i32
    return %c0_i32, %c0_i32_0, %c0_i32_1 : i32, i32, i32
  }
  func.func @transform_8(%arg0: i32) -> (i32, i32, i32) {
    %c0_i32 = arith.constant 0 : i32
    %c0_i32_0 = arith.constant 0 : i32
    %c0_i32_1 = arith.constant 0 : i32
    %c0_i32_2 = arith.constant 0 : i32
    return %c0_i32, %c0_i32_0, %c0_i32_1 : i32, i32, i32
  }
  func.func @transform_9(%arg0: i32) -> (i32, i32, i32) {
    %c0_i32 = arith.constant 0 : i32
    %c0_i32_0 = arith.constant 0 : i32
    %c0_i32_1 = arith.constant 0 : i32
    %c0_i32_2 = arith.constant 0 : i32
    return %c0_i32, %c0_i32_0, %c0_i32_1 : i32, i32, i32
  }
  func.func @transform_10(%arg0: i32) -> (i32, i32) {
    %c0_i32 = arith.constant 0 : i32
    %c0_i32_0 = arith.constant 0 : i32
    %c0_i32_1 = arith.constant 0 : i32
    return %c0_i32, %c0_i32_0 : i32, i32
  }
  func.func @transform_11(%arg0: i32) -> (i32, i32) {
    %c0_i32 = arith.constant 0 : i32
    %c0_i32_0 = arith.constant 0 : i32
    %c0_i32_1 = arith.constant 0 : i32
    return %c0_i32, %c0_i32_0 : i32, i32
  }
  func.func @transform_12(%arg0: i32) -> (i32, i32) {
    %c0_i32 = arith.constant 0 : i32
    %c0_i32_0 = arith.constant 0 : i32
    %c0_i32_1 = arith.constant 0 : i32
    return %c0_i32, %c0_i32_0 : i32, i32
  }
  func.func @transform_13(%arg0: i32) -> (i32, i32) {
    %c0_i32 = arith.constant 0 : i32
    %c0_i32_0 = arith.constant 0 : i32
    %c0_i32_1 = arith.constant 0 : i32
    return %c0_i32, %c0_i32_0 : i32, i32
  }
  func.func @transform_14(%arg0: i32) -> (i32, i32) {
    %c0_i32 = arith.constant 0 : i32
    %c0_i32_0 = arith.constant 0 : i32
    %c0_i32_1 = arith.constant 0 : i32
    return %c0_i32, %c0_i32_0 : i32, i32
  }
  func.func @transform_15(%arg0: i32) -> (i32, i32) {
    %c0_i32 = arith.constant 0 : i32
    %c0_i32_0 = arith.constant 0 : i32
    %c0_i32_1 = arith.constant 0 : i32
    return %c0_i32, %c0_i32_0 : i32, i32
  }
  func.func @transform_16(%arg0: i32) -> (i32, i32, i32) {
    %c0_i32 = arith.constant 0 : i32
    %c0_i32_0 = arith.constant 0 : i32
    %c0_i32_1 = arith.constant 0 : i32
    return %arg0, %c0_i32, %c0_i32_0 : i32, i32, i32
  }
}

</mosaic_0001>

<bundles_post_ra>
// kernel: dam_emb_forward.1
= control target key start
LH: loop header
LB: loop body
LE: loop exit
PB: predicated region body
PF: predicated region fallthrough
CT: control target
= control target key end

     0   :  { %s6413_s0 = inlined_call_operand.vmem [shape: f32[64,32], index: 0, kind: input, shape index: {}]   ;;  %s6414_s1 = inlined_call_operand.vmem [shape: f32[5,32,168], index: 1, kind: input, shape index: {}]   ;;  %s6415_s2 = inlined_call_operand.vmem [shape: f32[1,168], index: 2, kind: input, shape index: {}]   ;;  %s6416_s3 = inlined_call_operand.vmem [shape: f32[2,14,28], index: 3, kind: input, shape index: {}]   ;;  %s6417_s4 = inlined_call_operand.vmem [shape: f32[2,168,84], index: 4, kind: input, shape index: {}]   ;;  %s6418_s5 = inlined_call_operand.vmem [shape: f32[5,84,160], index: 5, kind: input, shape index: {}]   ;;  %s6419_s6 = inlined_call_operand.vmem [shape: f32[1,160], index: 6, kind: input, shape index: {}]   ;;  %s6420_s7 = inlined_call_operand.vmem [shape: f32[2,5,10], index: 7, kind: input, shape index: {}]   ;;  %s6421_s8 = inlined_call_operand.vmem [shape: f32[2,160,80], index: 8, kind: input, shape index: {}]   ;;  %s6422_s9 = inlined_call_operand.vmem [shape: f32[5,80,120], index: 9, kind: input, shape index: {}]   ;;  %s6423_s10 = inlined_call_operand.vmem [shape: f32[1,120], index: 10, kind: input, shape index: {}]   ;;  %s6424_s11 = inlined_call_operand.vmem [shape: f32[120,10], index: 11, kind: input, shape index: {}]   ;;  %s6425_s12 = inlined_call_operand.vmem [shape: f32[10,10], index: 12, kind: input, shape index: {}]   ;;  %s6426_s13 = inlined_call_operand.vmem [shape: f32[1,10], index: 13, kind: input, shape index: {}]   ;;  %s6427_s14 = inlined_call_operand.vmem [shape: f32[10,10], index: 14, kind: input, shape index: {}]   ;;  %s6428_s15 = inlined_call_operand.vmem [shape: f32[1,10], index: 15, kind: input, shape index: {}]   ;;  %s6429_s16 = inlined_call_operand.hbm [shape: f32[1,2,10], index: 16, kind: output, shape index: {}]  }
   0x1   :  { %6431 = sst [smem:[#allocation9_spill]] %s6413_s0 }
   0x2   :  { %v3363_v0 = vld [vmem:[%s6414_s1 + $0x70] sm:$0xff]  ;;  %v3364_v1 = vld [vmem:[%s6414_s1 + $0x78] sm:$0xff]  ;;  %v3361_v3 = vld [vmem:[%s6414_s1 + $0x60] sm:$0xff]  ;;  %s6432_s17 = sld [smem:[#allocation9_spill]]  ;;  %vm79_vm0 = vcmask 261120  }
   0x3   :  { %v64_v2 = vld [vmem:[%s6414_s1 + $0x30] sm:$0xff]  ;;  %104 = vmatpush.msra.mxu0 %v3363_v0  ;;  %3971 = vmatpush.msra.mxu3 %v3363_v0  ;;  %v3362_v4 = vld [vmem:[%s6414_s1 + $0x68] sm:$0xff]  ;;  %v62_v5 = vld [vmem:[%s6414_s1 + $0x20] sm:$0xff] }
   0x4   :  { %133 = vmatpush.msra.mxu1 %v3364_v1  ;;  %174 = vmatpush.msra.mxu2 %v64_v2  ;;  %v3359_v6 = vld [vmem:[%s6414_s1 + $0x50] sm:$0xff]  ;;  %v3360_v7 = vld [vmem:[%s6414_s1 + $0x58] sm:$0xff]  ;;  %v3357_v9 = vld [vmem:[%s6414_s1 + $0x40] sm:$0xff] }
   0x5   :  { %105 = vmatpush.msra.mxu0 %v3361_v3  ;;  %3972 = vmatpush.msra.mxu3 %v3361_v3  ;;  %v60_v8 = vld [vmem:[%s6414_s1 + $0x10] sm:$0xff]  ;;  %v3358_v10 = vld [vmem:[%s6414_s1 + $0x48] sm:$0xff]  ;;  %v58_v11 = vld [vmem:[%s6414_s1] sm:$0xff] }
   0x6   :  { %134 = vmatpush.msra.mxu1 %v3362_v4  ;;  %175 = vmatpush.msra.mxu2 %v62_v5  ;;  %v65_v15 = vld [vmem:[%s6414_s1 + $0x38] sm:$0xff]  ;;  %v3387_v16 = vld [vmem:[%s6414_s1 + $0xb0] sm:$0xff]  ;;  %v63_v18 = vld [vmem:[%s6414_s1 + $0x28] sm:$0xff] }
   0x7   :  { %106 = vmatpush.msra.mxu0 %v3359_v6  ;;  %3973 = vmatpush.msra.mxu3 %v3359_v6  ;;  %v3388_v17 = vld [vmem:[%s6414_s1 + $0xb8] sm:$0xff]  ;;  %v3385_v19 = vld [vmem:[%s6414_s1 + $0xa0] sm:$0xff]  ;;  %v3403_v20 = vld [vmem:[%s6414_s1 + $0xf0] sm:$0xff] }
   0x8   :  { %135 = vmatpush.msra.mxu1 %v3360_v7  ;;  %176 = vmatpush.msra.mxu2 %v60_v8  ;;  %v66_v12 = vld [vmem:[%s6432_s17 + $0x1] sm:$0xff]  ;;  %v4132_v13 = vld [vmem:[%s6432_s17 + $0x19] sm:$0xf]  ;;  %v3383_v24 = vld [vmem:[%s6414_s1 + $0x90] sm:$0xff] }
   0x9   :  { %107 = vmatpush.msra.mxu0 %v3357_v9  ;;  %3974 = vmatpush.msra.mxu3 %v3357_v9  ;;  %v54_v14 = vld [vmem:[%s6432_s17] sm:$0xff]  ;;  %v3386_v21 = vld [vmem:[%s6414_s1 + $0xa8] sm:$0xff]  ;;  %v61_v23 = vld [vmem:[%s6414_s1 + $0x18] sm:$0xff] }
   0xa   :  { %136 = vmatpush.msra.mxu1 %v3358_v10  ;;  %177 = vmatpush.msra.mxu2 %v58_v11  ;;  %v3401_v22 = vld [vmem:[%s6414_s1 + $0xe0] sm:$0xff]  ;;  %v3384_v25 = vld [vmem:[%s6414_s1 + $0x98] sm:$0xff]  ;;  %v3399_v26 = vld [vmem:[%s6414_s1 + $0xd0] sm:$0xff] }
   0xb   :  { %3365 = vmatmul.msk.f32.vlgmr.msra.gmra.mxu0 %vm79_vm0, %v66_v12  ;;  %3368 = vmatmul.msk.f32.vlgmr.msra.gmra.mxu3 %vm79_vm0, %v4132_v13  ;;  %v59_v27 = vld [vmem:[%s6414_s1 + $0x8] sm:$0xff] }
   0xc   :  { %3369 = vmatmul.msk.f32.vlgmr.msra.gmra.mxu1 %vm79_vm0, %v66_v12  ;;  %3373 = vmatmul.msk.f32.vlgmr.msra.gmra.mxu2 %vm79_vm0, %v54_v14  ;;  %v67_v28 = vld [vmem:[%s6432_s17 + $0x9] sm:$0xff] }
   0xd   :  { %203 = vmatpush.msrb.mxu3 %v65_v15  ;;  %257 = vmatpush.msrb.mxu0 %v3387_v16 }
   0xe   :  { %286 = vmatpush.msrb.mxu1 %v3388_v17  ;;  %348 = vmatpush.msrb.mxu2 %v3403_v20 }
   0xf   :  { %204 = vmatpush.msrb.mxu3 %v63_v18  ;;  %258 = vmatpush.msrb.mxu0 %v3385_v19 }
  0x10   :  { %287 = vmatpush.msrb.mxu1 %v3386_v21  ;;  %349 = vmatpush.msrb.mxu2 %v3401_v22 }
  0x11   :  { %21 = vsyncpa [#allocation7], 0  ;;  %205 = vmatpush.msrb.mxu3 %v61_v23  ;;  %v55_v29 = vld [vmem:[%s6432_s17 + $0x8] sm:$0xff]  ;;  %259 = vmatpush.msrb.mxu0 %v3383_v24  ;;  %v3381_v30 = vld [vmem:[%s6414_s1 + $0x80] sm:$0xff]  ;;  %vm536_vm1 = vcmask 326656   ;;  %vm700_vm2 = vcmask 1043456  }
  0x12   :  { %288 = vmatpush.msrb.mxu1 %v3384_v25  ;;  %350 = vmatpush.msrb.mxu2 %v3399_v26  ;;  %v3382_v31 = vld [vmem:[%s6414_s1 + $0x88] sm:$0xff]  ;;  %v3397_v32 = vld [vmem:[%s6414_s1 + $0xc0] sm:$0xff]  ;;  %v3404_v33 = vld [vmem:[%s6414_s1 + $0xf8] sm:$0xff]  ;;  %vm693_vm3 = vcmask 228352   ;;  %vm761_vm4 = vcmask 687104   ;;  %vm763_vm5 = vcmask 685056  }
  0x13   :  { %206 = vmatpush.msrb.mxu3 %v59_v27  ;;  %3366 = vmatmul.msk.f32.gmra.mxu0 %vm79_vm0, %v67_v28  ;;  %v3402_v34 = vld [vmem:[%s6414_s1 + $0xe8] sm:$0xff]  ;;  %v68_v35 = vld [vmem:[%s6432_s17 + $0x11] sm:$0xff]  ;;  %v3417_v40 = vld [vmem:[%s6414_s1 + $0x120] sm:$0xff]  ;;  %vm1351_vm6 = vcmask 1041408   ;;  %vm1347_vm7 = vcmask 80896   ;;  %vm1401_vm8 = vcmask 651264  }
  0x14   :  { %3370 = vmatmul.msk.f32.gmra.mxu1 %vm79_vm0, %v67_v28  ;;  %3374 = vmatmul.msk.f32.gmra.mxu2 %vm79_vm0, %v55_v29  ;;  %v3400_v36 = vld [vmem:[%s6414_s1 + $0xd8] sm:$0xff]  ;;  %v56_v37 = vld [vmem:[%s6432_s17 + $0x10] sm:$0xff]  ;;  %v3398_v38 = vld [vmem:[%s6414_s1 + $0xc8] sm:$0xff]  ;;  %vm1415_vm9 = vcmask 654336   ;;  %vm1587_vm10 = vcmask 974848   ;;  %vm1626_vm13 = vcmask 982016  }
  0x15   :  { %3377 = vmatmul.msk.f32.vlgmr.msrb.gmra.mxu3 %vm79_vm0, %v54_v14  ;;  %260 = vmatpush.msrb.mxu0 %v3381_v30  ;;  %v3419_v39 = vld [vmem:[%s6414_s1 + $0x130] sm:$0xff]  ;;  %v220_v42 = vld [vmem:[%s6432_s17 + $0x2] sm:$0xff]  ;;  %v57_v43 = vld [vmem:[%s6432_s17 + $0x18] sm:$0xf] }
  0x16   :  { %289 = vmatpush.msrb.mxu1 %v3382_v31  ;;  %351 = vmatpush.msrb.mxu2 %v3397_v32  ;;  %v3415_v41 = vld [vmem:[%s6414_s1 + $0x110] sm:$0xff]  ;;  %v3413_v44 = vld [vmem:[%s6414_s1 + $0x100] sm:$0xff]  ;;  %v3420_v45 = vld [vmem:[%s6414_s1 + $0x138] sm:$0xff] }
  0x17   :  { %377 = vmatpush.msra.mxu3 %v3404_v33  ;;  %439 = vmatpush.msra.mxu0 %v3419_v39  ;;  %v3418_v46 = vld [vmem:[%s6414_s1 + $0x128] sm:$0xff]  ;;  %v3416_v47 = vld [vmem:[%s6414_s1 + $0x118] sm:$0xff]  ;;  %v3448_v63 = vld [vmem:[%s6417_s4 + $0x120] sm:$0xff] }
  0x18   :  { %468 = vmatpush.msra.mxu1 %v3420_v45  ;;  %v221_v48 = vld [vmem:[%s6432_s17 + $0xa] sm:$0xff]  ;;  %v222_v51 = vld [vmem:[%s6432_s17 + $0x12] sm:$0xff]  ;;  %v223_v53 = vld [vmem:[%s6432_s17 + $0x1a] sm:$0xf] }
  0x19   :  { %378 = vmatpush.msra.mxu3 %v3402_v34  ;;  %440 = vmatpush.msra.mxu0 %v3417_v40  ;;  %v311_v49 = vld [vmem:[%s6432_s17 + $0x3] sm:$0xff]  ;;  %v312_v52 = vld [vmem:[%s6432_s17 + $0xb] sm:$0xff]  ;;  %v313_v54 = vld [vmem:[%s6432_s17 + $0x13] sm:$0xff] }
  0x1a   :  { %469 = vmatpush.msra.mxu1 %v3418_v46  ;;  %v3414_v50 = vld [vmem:[%s6414_s1 + $0x108] sm:$0xff]  ;;  %v314_v56 = vld [vmem:[%s6432_s17 + $0x1b] sm:$0xf]  ;;  %v529_v0 = vld [vmem:[%s6417_s4 + $0x70] sm:$0xff] }
  0x1b   :  { %3367 = vmatmul.msk.f32.gmra.mxu0 %vm79_vm0, %v68_v35  ;;  %379 = vmatpush.msra.mxu3 %v3400_v36  ;;  %v402_v55 = vld [vmem:[%s6432_s17 + $0x4] sm:$0xff]  ;;  %v403_v57 = vld [vmem:[%s6432_s17 + $0xc] sm:$0xff]  ;;  %v404_v58 = vld [vmem:[%s6432_s17 + $0x14] sm:$0xff] }
  0x1c   :  { %3371 = vmatmul.msk.f32.gmra.mxu1 %vm79_vm0, %v68_v35  ;;  %3375 = vmatmul.msk.f32.gmra.mxu2 %vm79_vm0, %v56_v37  ;;  %v405_v59 = vld [vmem:[%s6432_s17 + $0x1c] sm:$0xf]  ;;  %v528_v2 = vld [vmem:[%s6417_s4 + $0x68] sm:$0xff]  ;;  %v3446_v3 = vld [vmem:[%s6417_s4 + $0x110] sm:$0xff] }
  0x1d   :  { %3378 = vmatmul.msk.f32.gmra.mxu3 %vm79_vm0, %v55_v29  ;;  %441 = vmatpush.msra.mxu0 %v3415_v41  ;;  %v530_v62 = vld [vmem:[%s6417_s4 + $0x78] sm:$0xff]  ;;  %v527_v6 = vld [vmem:[%s6417_s4 + $0x60] sm:$0xff]  ;;  %v3445_v7 = vld [vmem:[%s6417_s4 + $0x108] sm:$0xff] }
  0x1e   :  { %380 = vmatpush.msra.mxu3 %v3398_v38  ;;  %470 = vmatpush.msra.mxu1 %v3416_v47  ;;  %v3447_v1 = vld [vmem:[%s6417_s4 + $0x118] sm:$0xff]  ;;  %v3444_v11 = vld [vmem:[%s6417_s4 + $0x100] sm:$0xff]  ;;  %v525_v12 = vld [vmem:[%s6417_s4 + $0x50] sm:$0xff] }
  0x1f   :  { %442 = vmatpush.msra.mxu0 %v3413_v44  ;;  %549 = vmatpush.msra.mxu2 %v530_v62  ;;  %v526_v10 = vld [vmem:[%s6417_s4 + $0x58] sm:$0xff]  ;;  %v524_v14 = vld [vmem:[%s6417_s4 + $0x48] sm:$0xff]  ;;  %v3442_v15 = vld [vmem:[%s6417_s4 + $0xf0] sm:$0xff] }
  0x20   :  { %471 = vmatpush.msra.mxu1 %v3414_v50  ;;  %v523_v17 = vld [vmem:[%s6417_s4 + $0x40] sm:$0xff]  ;;  %v3441_v18 = vld [vmem:[%s6417_s4 + $0xe8] sm:$0xff]  ;;  %v522_v22 = vld [vmem:[%s6417_s4 + $0x38] sm:$0xff] }
  0x21   :  { %550 = vmatpush.msra.mxu2 %v529_v0  ;;  %v3440_v23 = vld [vmem:[%s6417_s4 + $0xe0] sm:$0xff]  ;;  %v521_v24 = vld [vmem:[%s6417_s4 + $0x30] sm:$0xff]  ;;  %v3439_v25 = vld [vmem:[%s6417_s4 + $0xd8] sm:$0xff] }
  0x22   :  { %v520_v26 = vld [vmem:[%s6417_s4 + $0x28] sm:$0xff]  ;;  %v3438_v27 = vld [vmem:[%s6417_s4 + $0xd0] sm:$0xff]  ;;  %v519_v28 = vld [vmem:[%s6417_s4 + $0x20] sm:$0xff] }
  0x23   :  { %3389 = vmatmul.msk.f32.vlgmr.msrb.gmra.mxu0 %vm79_vm0, %v220_v42  ;;  %551 = vmatpush.msra.mxu2 %v528_v2  ;;  %v3437_v29 = vld [vmem:[%s6417_s4 + $0xc8] sm:$0xff]  ;;  %v518_v33 = vld [vmem:[%s6417_s4 + $0x18] sm:$0xff]  ;;  %v3436_v34 = vld [vmem:[%s6417_s4 + $0xc0] sm:$0xff] }
  0x24   :  { %3372 = vmatmul.msk.f32.gmra.mxu1 %vm79_vm0, %v4132_v13  ;;  %3376 = vmatmul.msk.f32.gmra.mxu2 %vm79_vm0, %v57_v43  ;;  %v3443_v13 = vld [vmem:[%s6417_s4 + $0xf8] sm:$0xff]  ;;  %v517_v36 = vld [vmem:[%s6417_s4 + $0x10] sm:$0xff]  ;;  %v516_v38 = vld [vmem:[%s6417_s4 + $0x8] sm:$0xff] }
  0x25   :  { %3379 = vmatmul.msk.f32.gmra.mxu3 %vm79_vm0, %v56_v37  ;;  %629 = vmatpush.msrb.mxu0 %v3448_v63  ;;  %v3435_v37 = vld [vmem:[%s6417_s4 + $0xb8] sm:$0xff]  ;;  %v3434_v39 = vld [vmem:[%s6417_s4 + $0xb0] sm:$0xff]  ;;  %v515_v40 = vld [vmem:[%s6417_s4] sm:$0xff] }
  0x26   :  { %552 = vmatpush.msra.mxu2 %v527_v6  ;;  %v535_v41 = vld [vmem:[%s6417_s4 + $0xa0] sm:$0xff]  ;;  %v3453_v44 = vld [vmem:[%s6417_s4 + $0x148] sm:$0xff]  ;;  %v534_v46 = vld [vmem:[%s6417_s4 + $0x98] sm:$0xff] }
  0x27   :  { %630 = vmatpush.msrb.mxu0 %v3447_v1  ;;  %589 = vmatpush.msrb.mxu3 %v535_v41  ;;  %v3452_v47 = vld [vmem:[%s6417_s4 + $0x140] sm:$0xff]  ;;  %v3451_v50 = vld [vmem:[%s6417_s4 + $0x138] sm:$0xff] }
  0x28   :  { %553 = vmatpush.msra.mxu2 %v526_v10  ;;  %v493_v1 = vld [vmem:[%s6415_s2] sm:$0x3] }
  0x29   :  { %631 = vmatpush.msrb.mxu0 %v3446_v3  ;;  %590 = vmatpush.msrb.mxu3 %v534_v46 }
  0x2a   :  { %554 = vmatpush.msra.mxu2 %v525_v12 }
  0x2b   :  { %3390 = vmatmul.msk.f32.gmra.mxu0 %vm79_vm0, %v221_v48 }
  0x2c   :  { %3393 = vmatmul.msk.f32.vlgmr.msrb.gmra.mxu1 %vm79_vm0, %v220_v42  ;;  %3405 = vmatmul.msk.f32.vlgmr.msrb.gmra.mxu2 %vm79_vm0, %v311_v49  ;;  %v3433_v42 = vld [vmem:[%s6417_s4 + $0xa8] sm:$0xff] }
  0x2d   :  { %3380 = vmatmul.msk.f32.gmra.mxu3 %vm79_vm0, %v57_v43  ;;  %632 = vmatpush.msrb.mxu0 %v3445_v7  ;;  %v495_v7 = vperm.slane %v493_v1, 0 }
  0x2e   :  { %555 = vmatpush.msra.mxu2 %v524_v14  ;;  %669 = vmatpush.msrb.mxu1 %v3453_v44 }
  0x2f   :  { %633 = vmatpush.msrb.mxu0 %v3444_v11 }
  0x30   :  { %556 = vmatpush.msra.mxu2 %v523_v17  ;;  %670 = vmatpush.msrb.mxu1 %v3452_v47 }
  0x31   :  { %634 = vmatpush.msrb.mxu0 %v3443_v13 }
  0x32   :  { %557 = vmatpush.msra.mxu2 %v522_v22  ;;  %671 = vmatpush.msrb.mxu1 %v3451_v50 }
  0x33   :  { %3391 = vmatmul.msk.f32.gmra.mxu0 %vm79_vm0, %v222_v51 }
  0x34   :  { %3394 = vmatmul.msk.f32.gmra.mxu1 %vm79_vm0, %v221_v48  ;;  %3406 = vmatmul.msk.f32.gmra.mxu2 %vm79_vm0, %v312_v52 }
  0x35   :  { %3409 = vmatmul.msk.f32.vlgmr.msra.gmra.mxu3 %vm79_vm0, %v311_v49  ;;  %635 = vmatpush.msrb.mxu0 %v3442_v15  ;;  %v533_v49 = vld [vmem:[%s6417_s4 + $0x90] sm:$0xff] }
  0x36   :  { %558 = vmatpush.msra.mxu2 %v521_v24  ;;  %591 = vmatpush.msrb.mxu3 %v533_v49 }
  0x37   :  { %636 = vmatpush.msrb.mxu0 %v3441_v18 }
  0x38   :  { %559 = vmatpush.msra.mxu2 %v520_v26 }
  0x39   :  { %637 = vmatpush.msrb.mxu0 %v3440_v23 }
  0x3a   :  { %560 = vmatpush.msra.mxu2 %v519_v28 }
  0x3b   :  { %3392 = vmatmul.msk.f32.gmra.mxu0 %vm79_vm0, %v223_v53 }
  0x3c   :  { %3395 = vmatmul.msk.f32.gmra.mxu1 %vm79_vm0, %v222_v51  ;;  %3407 = vmatmul.msk.f32.gmra.mxu2 %vm79_vm0, %v313_v54 }
  0x3d   :  { %3410 = vmatmul.msk.f32.gmra.mxu3 %vm79_vm0, %v312_v52  ;;  %638 = vmatpush.msrb.mxu0 %v3439_v25  ;;  %v532_v52 = vld [vmem:[%s6417_s4 + $0x88] sm:$0xff]  ;;  %v496_v25 = vperm.slane %v493_v1, 1 }
  0x3e   :  { %561 = vmatpush.msra.mxu2 %v518_v33  ;;  %592 = vmatpush.msrb.mxu3 %v532_v52 }
  0x3f   :  { %639 = vmatpush.msrb.mxu0 %v3438_v27 }
  0x40   :  { %562 = vmatpush.msra.mxu2 %v517_v36 }
  0x41   :  { %640 = vmatpush.msrb.mxu0 %v3437_v29 }
  0x42   :  { %563 = vmatpush.msra.mxu2 %v516_v38 }
  0x43   :  { %3421 = vmatmul.msk.f32.vlgmr.msra.gmra.mxu0 %vm79_vm0, %v402_v55 }
  0x44   :  { %3396 = vmatmul.msk.f32.gmra.mxu1 %vm79_vm0, %v223_v53  ;;  %3408 = vmatmul.msk.f32.gmra.mxu2 %vm79_vm0, %v314_v56  ;;  %v3450_v53 = vld [vmem:[%s6417_s4 + $0x130] sm:$0xff] }
  0x45   :  { %3411 = vmatmul.msk.f32.gmra.mxu3 %vm79_vm0, %v313_v54  ;;  %641 = vmatpush.msrb.mxu0 %v3436_v34  ;;  %v531_v54 = vld [vmem:[%s6417_s4 + $0x80] sm:$0xff] }
  0x46   :  { %564 = vmatpush.msra.mxu2 %v515_v40  ;;  %672 = vmatpush.msrb.mxu1 %v3450_v53 }
  0x47   :  { %642 = vmatpush.msrb.mxu0 %v3435_v37  ;;  %593 = vmatpush.msrb.mxu3 %v531_v54 }
  0x49   :  { %643 = vmatpush.msrb.mxu0 %v3434_v39 }
  0x4b   :  { %3422 = vmatmul.msk.f32.gmra.mxu0 %vm79_vm0, %v403_v57 }
  0x4c   :  { %3425 = vmatmul.msk.f32.vlgmr.msra.gmra.mxu1 %vm79_vm0, %v402_v55  ;;  %644 = vmatpush.msrb.mxu0 %v3433_v42  ;;  %v3449_v55 = vld [vmem:[%s6417_s4 + $0x128] sm:$0xff] }
  0x4d   :  { %3412 = vmatmul.msk.f32.gmra.mxu3 %vm79_vm0, %v314_v56  ;;  %673 = vmatpush.msrb.mxu1 %v3449_v55 }
  0x53   :  { %3423 = vmatmul.msk.f32.gmra.mxu0 %vm79_vm0, %v404_v58 }
  0x54   :  { %3426 = vmatmul.msk.f32.gmra.mxu1 %vm79_vm0, %v403_v57 }
  0x5b   :  { %3424 = vmatmul.msk.f32.gmra.mxu0 %vm79_vm0, %v405_v59 }
  0x5c   :  { %3427 = vmatmul.msk.f32.gmra.mxu1 %vm79_vm0, %v404_v58 }
  0x64   :  { %3428 = vmatmul.msk.f32.gmra.mxu1 %vm79_vm0, %v405_v59 }
  0x88   :  { %v4314_v60 = vpop.f32.mrf.mxu0 }
  0x89   :  { %v4316_v61 = vpop.f32.mrf.mxu1 }
  0x8e   :  { %v4336_v4 = vpop.f32.mrf.mxu3 }
  0x8f   :  { %v4338_v5 = vpop.f32.mrf.mxu2 }
  0x90   :  { %v4346_v8 = vpop.f32.mrf.mxu0  ;;  %v180_v0 = vadd.f32 %v4338_v5, %v4314_v60 }
  0x91   :  { %v4348_v9 = vpop.f32.mrf.mxu1 }
  0x97   :  { %v4368_v16 = vpop.f32.mrf.mxu2 }
  0x98   :  { %v4376_v19 = vpop.f32.mrf.mxu3  ;;  %v4378_v20 = vpop.f32.mrf.mxu0  ;;  %v183_v14 = vadd.f32 %v4368_v16, %v4346_v8 }
  0x99   :  { %v4380_v21 = vpop.f32.mrf.mxu1  ;;  %v209_v60 = vadd.f32 %v4376_v19, %v4316_v61 }
  0x9f   :  { %v4416_v35 = vpop.f32.mrf.mxu2 }
  0xa0   :  { %v262_v30 = vpop.f32.mrf.mxu0  ;;  %v4406_v31 = vpop.f32.mrf.mxu3  ;;  %v186_v8 = vadd.f32 %v4416_v35, %v4378_v20 }
  0xa1   :  { %v4408_v32 = vpop.f32.mrf.mxu1  ;;  %v303_v2 = vadd.f32 %v262_v30, %v180_v0  ;;  %v212_v61 = vadd.f32 %v4406_v31, %v4348_v9 }
  0xa7   :  { %v4456_v51 = vpop.f32.mrf.mxu2 }
  0xa8   :  { %v265_v43 = vpop.f32.mrf.mxu0  ;;  %v4448_v48 = vpop.f32.mrf.mxu3  ;;  %v189_v9 = vadd.f32 %v4456_v51, %v4336_v4 }
  0xa9   :  { %v291_v45 = vpop.f32.mrf.mxu1  ;;  %v305_v5 = vadd.f32 %v265_v43, %v183_v14  ;;  %v215_v43 = vadd.f32 %v4448_v48, %v4380_v21 }
  0xaa   :  { %v304_v18 = vadd.f32 %v291_v45, %v209_v60  ;;  %v787_v60 = vld [vmem:[%s6418_s5 + $0xa0] sm:$0xf] }
  0xab   :  { %3494 = vmatpush.msk.msra.mxu0 %vm700_vm2, %v787_v60  ;;  %v3469_v60 = vld [vmem:[%s6418_s5 + $0xc8] sm:$0xff] }
  0xaf   :  { %v353_v59 = vpop.f32.mrf.mxu2 }
  0xb0   :  { %v268_v56 = vpop.f32.mrf.mxu0  ;;  %v4470_v58 = vpop.f32.mrf.mxu3  ;;  %v394_v3 = vadd.f32 %v353_v59, %v303_v2 }
  0xb1   :  { %v294_v57 = vpop.f32.mrf.mxu1  ;;  %v307_v33 = vadd.f32 %v268_v56, %v186_v8  ;;  %v218_v21 = vadd.f32 %v4470_v58, %v4408_v32  ;;  %v777_v8 = vld [vmem:[%s6418_s5 + $0x50] sm:$0xff] }
  0xb2   :  { %v306_v36 = vadd.f32 %v294_v57, %v212_v61 }
  0xb7   :  { %v356_v10 = vpop.f32.mrf.mxu2 }
  0xb8   :  { %v271_v62 = vpop.f32.mrf.mxu0  ;;  %v382_v6 = vpop.f32.mrf.mxu3  ;;  %v396_v22 = vadd.f32 %v356_v10, %v305_v5  ;;  %v788_v5 = vld [vmem:[%s6418_s5 + $0xa8] sm:$0xf] }
  0xb9   :  { %v297_v63 = vpop.f32.mrf.mxu1  ;;  %v395_v23 = vadd.f32 %v382_v6, %v304_v18  ;;  %v309_v46 = vadd.f32 %v271_v62, %v189_v9  ;;  %3497 = vmatpush.msk.msra.mxu1 %vm700_vm2, %v788_v5  ;;  %v785_v18 = vld [vmem:[%s6418_s5 + $0x90] sm:$0xff] }
  0xba   :  { %v308_v49 = vadd.f32 %v297_v63, %v215_v43  ;;  %890 = vmatpush.msra.mxu0 %v785_v18  ;;  %v3548_v5 = vld [vmem:[%s6418_s5 + $0x2b0] sm:$0xf] }
  0xbb   :  { %v3466_v18 = vld [vmem:[%s6418_s5 + $0xb0] sm:$0xff] }
  0xbf   :  { %v359_v29 = vpop.f32.mrf.mxu2 }
  0xc0   :  { %v444_v11 = vpop.f32.mrf.mxu0  ;;  %v385_v26 = vpop.f32.mrf.mxu3  ;;  %v398_v38 = vadd.f32 %v359_v29, %v307_v33  ;;  %v779_v29 = vld [vmem:[%s6418_s5 + $0x60] sm:$0xff]  ;;  %v776_v33 = vld [vmem:[%s6418_s5 + $0x48] sm:$0xff] }
  0xc1   :  { %v4477_v12 = vpop.f32.mrf.mxu1  ;;  %v485_v13 = vadd.f32 %v444_v11, %v394_v3  ;;  %v397_v39 = vadd.f32 %v385_v26, %v306_v36 }
  0xc2   :  { %v310_v62 = vadd.f32 %v4477_v12, %v218_v21  ;;  %v3481_v21 = vld [vmem:[%s6418_s5 + $0x128] sm:$0xff] }
  0xc3   :  { %v499_v15 = vadd.f32 %v495_v7, %v485_v13 }
  0xc5   :  { %v507_v17 = vmax.f32 %v499_v15, 0.0 }
  0xc7   :  { %565 = vmatmul.f32.vlgmr.msra.gmra.mxu2 %v507_v17  ;;  %645 = vmatmul.f32.vlgmr.msrb.gmra.mxu0 %v507_v17  ;;  %v362_v44 = vpop.f32.mrf.mxu2 }
  0xc8   :  { %v447_v24 = vpop.f32.mrf.mxu0  ;;  %v388_v31 = vpop.f32.mrf.mxu3  ;;  %v400_v52 = vadd.f32 %v362_v44, %v309_v46 }
  0xc9   :  { %v487_v27 = vadd.f32 %v447_v24, %v396_v22  ;;  %v473_v28 = vpop.f32.mrf.mxu1  ;;  %v399_v53 = vadd.f32 %v388_v31, %v308_v49  ;;  %v786_v22 = vld [vmem:[%s6418_s5 + $0x98] sm:$0xff]  ;;  %v783_v24 = vld [vmem:[%s6418_s5 + $0x80] sm:$0xff] }
  0xca   :  { %v486_v30 = vadd.f32 %v473_v28, %v395_v23  ;;  %913 = vmatpush.msra.mxu1 %v786_v22  ;;  %v782_v28 = vld [vmem:[%s6418_s5 + $0x78] sm:$0xff]  ;;  %891 = vmatpush.msra.mxu0 %v783_v24  ;;  %v691_v49 = vld [vmem:[%s6416_s3] sm:$0xff]  ;;  %v3547_v24 = vld [vmem:[%s6418_s5 + $0x2a8] sm:$0xff] }
  0xcb   :  { %v501_v16 = vadd.f32 %v495_v7, %v487_v27  ;;  %v781_v27 = vld [vmem:[%s6418_s5 + $0x70] sm:$0xff]  ;;  %v3467_v22 = vld [vmem:[%s6418_s5 + $0xb8] sm:$0xff] }
  0xcc   :  { %v500_v19 = vadd.f32 %v496_v25, %v486_v30  ;;  %v780_v30 = vld [vmem:[%s6418_s5 + $0x68] sm:$0xff]  ;;  %892 = vmatpush.msra.mxu0 %v781_v27  ;;  %v3544_v27 = vld [vmem:[%s6418_s5 + $0x290] sm:$0xff] }
  0xcd   :  { %v509_v34 = vmax.f32 %v501_v16, 0.0  ;;  %v778_v16 = vld [vmem:[%s6418_s5 + $0x58] sm:$0xff] }
  0xce   :  { %v508_v37 = vmax.f32 %v500_v19, 0.0  ;;  %893 = vmatpush.msra.mxu0 %v779_v29  ;;  %v775_v19 = vld [vmem:[%s6418_s5 + $0x40] sm:$0xff]  ;;  %v3518_v29 = vld [vmem:[%s6418_s5 + $0x1f0] sm:$0xff] }
  0xcf   :  { %568 = vmatmul.f32.gmra.mxu2 %v509_v34  ;;  %648 = vmatmul.f32.gmra.mxu0 %v509_v34 }
  0xd0   :  { %3429 = vmatmul.msk.f32.vlgmr.msrb.gmra.mxu3 %vm536_vm1, %v508_v37  ;;  %3454 = vmatmul.msk.f32.vlgmr.msrb.gmra.mxu1 %vm536_vm1, %v508_v37  ;;  %v450_v40 = vpop.f32.mrf.mxu0  ;;  %v391_v57 = vpop.f32.mrf.mxu3 }
  0xd1   :  { %v489_v20 = vadd.f32 %v450_v40, %v398_v38  ;;  %v476_v35 = vpop.f32.mrf.mxu1  ;;  %v401_v0 = vadd.f32 %v391_v57, %v310_v62  ;;  %894 = vmatpush.msra.mxu0 %v777_v8  ;;  %v773_v38 = vld [vmem:[%s6418_s5 + $0x30] sm:$0xff]  ;;  %v3462_v57 = vld [vmem:[%s6416_s3 + $0x18] sm:$0x3f]  ;;  %v3542_v8 = vld [vmem:[%s6418_s5 + $0x280] sm:$0xff] }
  0xd2   :  { %v488_v41 = vadd.f32 %v476_v35, %v397_v39  ;;  %v774_v39 = vld [vmem:[%s6418_s5 + $0x38] sm:$0xff] }
  0xd3   :  { %v503_v42 = vadd.f32 %v495_v7, %v489_v20  ;;  %895 = vmatpush.msra.mxu0 %v775_v19  ;;  %v3479_v62 = vld [vmem:[%s6418_s5 + $0x118] sm:$0xff]  ;;  %v3517_v19 = vld [vmem:[%s6418_s5 + $0x1e8] sm:$0xff] }
  0xd4   :  { %v502_v45 = vadd.f32 %v496_v25, %v488_v41 }
  0xd5   :  { %v511_v47 = vmax.f32 %v503_v42, 0.0  ;;  %896 = vmatpush.msra.mxu0 %v773_v38  ;;  %v3538_v38 = vld [vmem:[%s6418_s5 + $0x260] sm:$0xff] }
  0xd6   :  { %v510_v50 = vmax.f32 %v502_v45, 0.0 }
  0xd7   :  { %571 = vmatmul.f32.gmra.mxu2 %v511_v47  ;;  %651 = vmatmul.f32.gmra.mxu0 %v511_v47 }
  0xd8   :  { %3430 = vmatmul.msk.f32.gmra.mxu3 %vm536_vm1, %v510_v50  ;;  %3455 = vmatmul.msk.f32.gmra.mxu1 %vm536_vm1, %v510_v50  ;;  %v453_v4 = vpop.f32.mrf.mxu0  ;;  %v3461_v50 = vld [vmem:[%s6416_s3 + $0x10] sm:$0xff] }
  0xd9   :  { %v491_v51 = vadd.f32 %v453_v4, %v400_v52  ;;  %v479_v54 = vpop.f32.mrf.mxu1  ;;  %v3486_v52 = vld [vmem:[%s6418_s5 + $0x150] sm:$0xf]  ;;  %v3484_v4 = vld [vmem:[%s6418_s5 + $0x140] sm:$0xff] }
  0xda   :  { %v490_v55 = vadd.f32 %v479_v54, %v399_v53  ;;  %v3487_v53 = vld [vmem:[%s6418_s5 + $0x158] sm:$0xf]  ;;  %v3482_v54 = vld [vmem:[%s6418_s5 + $0x130] sm:$0xff] }
  0xdb   :  { %v505_v56 = vadd.f32 %v495_v7, %v491_v51  ;;  %v3485_v51 = vld [vmem:[%s6418_s5 + $0x148] sm:$0xff] }
  0xdc   :  { %v504_v48 = vadd.f32 %v496_v25, %v490_v55  ;;  %v3483_v55 = vld [vmem:[%s6418_s5 + $0x138] sm:$0xff] }
  0xdd   :  { %v513_v59 = vmax.f32 %v505_v56, 0.0  ;;  %v3480_v56 = vld [vmem:[%s6418_s5 + $0x120] sm:$0xff] }
  0xde   :  { %v512_v63 = vmax.f32 %v504_v48, 0.0  ;;  %v692_v48 = vld [vmem:[%s6416_s3 + $0x8] sm:$0x3f] }
  0xdf   :  { %574 = vmatmul.f32.gmra.mxu2 %v513_v59  ;;  %654 = vmatmul.f32.gmra.mxu0 %v513_v59  ;;  %v3478_v59 = vld [vmem:[%s6418_s5 + $0x110] sm:$0xff] }
  0xe0   :  { %3431 = vmatmul.msk.f32.gmra.mxu3 %vm536_vm1, %v512_v63  ;;  %3456 = vmatmul.msk.f32.gmra.mxu1 %vm536_vm1, %v512_v63  ;;  %v3476_v63 = vld [vmem:[%s6418_s5 + $0x100] sm:$0xff] }
  0xe1   :  { %v482_v1 = vpop.f32.mrf.mxu1 }
  0xe2   :  { %v492_v2 = vadd.f32 %v482_v1, %v401_v0  ;;  %v3477_v0 = vld [vmem:[%s6418_s5 + $0x108] sm:$0xff]  ;;  %v3474_v1 = vld [vmem:[%s6418_s5 + $0xf0] sm:$0xff] }
  0xe4   :  { %v506_v3 = vadd.f32 %v496_v25, %v492_v2  ;;  %v784_v25 = vld [vmem:[%s6418_s5 + $0x88] sm:$0xff]  ;;  %v3475_v2 = vld [vmem:[%s6418_s5 + $0xf8] sm:$0xff] }
  0xe5   :  { %914 = vmatpush.msra.mxu1 %v784_v25  ;;  %v3520_v25 = vld [vmem:[%s6418_s5 + $0x200] sm:$0xf] }
  0xe6   :  { %v514_v6 = vmax.f32 %v506_v3, 0.0  ;;  %v771_v3 = vld [vmem:[%s6418_s5 + $0x20] sm:$0xff] }
  0xe7   :  { %915 = vmatpush.msra.mxu1 %v782_v28  ;;  %897 = vmatpush.msra.mxu0 %v771_v3  ;;  %v3545_v28 = vld [vmem:[%s6418_s5 + $0x298] sm:$0xff] }
  0xe8   :  { %3432 = vmatmul.msk.f32.gmra.mxu3 %vm536_vm1, %v514_v6  ;;  %3457 = vmatmul.msk.f32.gmra.mxu1 %vm536_vm1, %v514_v6  ;;  %v772_v6 = vld [vmem:[%s6418_s5 + $0x28] sm:$0xff] }
  0xe9   :  { %916 = vmatpush.msra.mxu1 %v780_v30  ;;  %v3519_v30 = vld [vmem:[%s6418_s5 + $0x1f8] sm:$0xff] }
  0xeb   :  { %917 = vmatpush.msra.mxu1 %v778_v16  ;;  %v3543_v16 = vld [vmem:[%s6418_s5 + $0x288] sm:$0xff] }
  0xed   :  { %918 = vmatpush.msra.mxu1 %v776_v33  ;;  %v3540_v33 = vld [vmem:[%s6418_s5 + $0x270] sm:$0xff] }
  0xef   :  { %919 = vmatpush.msra.mxu1 %v774_v39  ;;  %v3539_v39 = vld [vmem:[%s6418_s5 + $0x268] sm:$0xff] }
  0xf1   :  { %920 = vmatpush.msra.mxu1 %v772_v6  ;;  %v3576_v6 = vld [vmem:[%s6418_s5 + $0x360] sm:$0xf] }
 0x144   :  { %v646_v32 = vpop.f32.mrf.mxu0 }
 0x14a   :  { %v566_v58 = vpop.f32.mrf.mxu2 }
 0x14c   :  { %v649_v12 = vpop.f32.mrf.mxu0 }
 0x14d   :  { %v675_v7 = vpop.f32.mrf.mxu1 }
 0x14e   :  { %v676_v45 = vadd.f32 %v675_v7, %v646_v32  ;;  %v3472_v32 = vld [vmem:[%s6418_s5 + $0xe0] sm:$0xff]  ;;  %v769_v7 = vld [vmem:[%s6418_s5 + $0x10] sm:$0xff] }
 0x14f   :  { %898 = vmatpush.msra.mxu0 %v769_v7  ;;  %v3577_v7 = vld [vmem:[%s6418_s5 + $0x368] sm:$0xf] }
 0x152   :  { %v569_v13 = vpop.f32.mrf.mxu2 }
 0x153   :  { %v595_v10 = vpop.f32.mrf.mxu3 }
 0x154   :  { %v652_v17 = vpop.f32.mrf.mxu0  ;;  %v596_v42 = vadd.f32 %v595_v10, %v566_v58  ;;  %v3473_v58 = vld [vmem:[%s6418_s5 + $0xe8] sm:$0xff]  ;;  %v770_v10 = vld [vmem:[%s6418_s5 + $0x18] sm:$0xff] }
 0x155   :  { %v678_v11 = vpop.f32.mrf.mxu1  ;;  %921 = vmatpush.msra.mxu1 %v770_v10  ;;  %v3574_v10 = vld [vmem:[%s6418_s5 + $0x350] sm:$0xff] }
 0x156   :  { %v679_v43 = vadd.f32 %v678_v11, %v649_v12  ;;  %v687_v47 = vmax.f32 %v596_v42, %v676_v45  ;;  %v3470_v11 = vld [vmem:[%s6418_s5 + $0xd0] sm:$0xff]  ;;  %v3471_v12 = vld [vmem:[%s6418_s5 + $0xd8] sm:$0xff]  ;;  %v3534_v42 = vld [vmem:[%s6418_s5 + $0x240] sm:$0xff] }
 0x157   :  { %v3509_v45 = vld [vmem:[%s6418_s5 + $0x1a8] sm:$0xff] }
 0x15a   :  { %v572_v23 = vpop.f32.mrf.mxu2 }
 0x15b   :  { %v598_v14 = vpop.f32.mrf.mxu3 }
 0x15c   :  { %v655_v34 = vpop.f32.mrf.mxu0  ;;  %v599_v41 = vadd.f32 %v598_v14, %v569_v13  ;;  %v767_v13 = vld [vmem:[%s6418_s5] sm:$0xff]  ;;  %v768_v14 = vld [vmem:[%s6418_s5 + $0x8] sm:$0xff] }
 0x15d   :  { %v681_v15 = vpop.f32.mrf.mxu1  ;;  %899 = vmatpush.msra.mxu0 %v767_v13  ;;  %922 = vmatpush.msra.mxu1 %v768_v14  ;;  %v3573_v13 = vld [vmem:[%s6418_s5 + $0x348] sm:$0xff] }
 0x15e   :  { %v682_v9 = vadd.f32 %v681_v15, %v652_v17  ;;  %v688_v46 = vmax.f32 %v599_v41, %v679_v43  ;;  %v3468_v15 = vld [vmem:[%s6418_s5 + $0xc0] sm:$0xff]  ;;  %v3549_v17 = vld [vmem:[%s6418_s5 + $0x2b8] sm:$0xf]  ;;  %v3535_v43 = vld [vmem:[%s6418_s5 + $0x248] sm:$0xff] }
 0x15f   :  { %3550 = vmatpush.msk.msrb.mxu0 %vm700_vm2, %v3548_v5  ;;  %3553 = vmatpush.msk.msrb.mxu1 %vm700_vm2, %v3549_v17  ;;  %v3537_v41 = vld [vmem:[%s6418_s5 + $0x258] sm:$0xff]  ;;  %v3568_v17 = vld [vmem:[%s6418_s5 + $0x320] sm:$0xff] }
 0x161   :  { %1083 = vmatpush.msrb.mxu1 %v3547_v24 }
 0x162   :  { %v575_v36 = vpop.f32.mrf.mxu2 }
 0x163   :  { %v601_v26 = vpop.f32.mrf.mxu3  ;;  %1084 = vmatpush.msrb.mxu1 %v3545_v28  ;;  %v3562_v28 = vld [vmem:[%s6418_s5 + $0x2f0] sm:$0xff] }
 0x164   :  { %v602_v40 = vadd.f32 %v601_v26, %v572_v23  ;;  %v3546_v23 = vld [vmem:[%s6418_s5 + $0x2a0] sm:$0xff]  ;;  %v3521_v26 = vld [vmem:[%s6418_s5 + $0x208] sm:$0xf] }
 0x165   :  { %v684_v61 = vpop.f32.mrf.mxu1  ;;  %1060 = vmatpush.msrb.mxu0 %v3546_v23  ;;  %1085 = vmatpush.msrb.mxu1 %v3543_v16  ;;  %v3567_v23 = vld [vmem:[%s6418_s5 + $0x318] sm:$0xff]  ;;  %v3558_v16 = vld [vmem:[%s6418_s5 + $0x2d0] sm:$0xff] }
 0x166   :  { %v685_v20 = vadd.f32 %v684_v61, %v655_v34  ;;  %v689_v44 = vmax.f32 %v602_v40, %v682_v9  ;;  %v3516_v61 = vld [vmem:[%s6418_s5 + $0x1e0] sm:$0xff]  ;;  %v3541_v34 = vld [vmem:[%s6418_s5 + $0x278] sm:$0xff]  ;;  %v3510_v9 = vld [vmem:[%s6418_s5 + $0x1b0] sm:$0xff] }
 0x167   :  { %1061 = vmatpush.msrb.mxu0 %v3544_v27  ;;  %1086 = vmatpush.msrb.mxu1 %v3541_v34  ;;  %v3512_v40 = vld [vmem:[%s6418_s5 + $0x1c0] sm:$0xff]  ;;  %v3557_v34 = vld [vmem:[%s6418_s5 + $0x2c8] sm:$0xff] }
 0x169   :  { %1062 = vmatpush.msrb.mxu0 %v3542_v8  ;;  %1087 = vmatpush.msrb.mxu1 %v3539_v39  ;;  %v3561_v8 = vld [vmem:[%s6418_s5 + $0x2e8] sm:$0xff]  ;;  %v3601_v39 = vld [vmem:[%s6421_s8 + $0x118] sm:$0xff] }
 0x16b   :  { %v604_v37 = vpop.f32.mrf.mxu3  ;;  %1063 = vmatpush.msrb.mxu0 %v3540_v33  ;;  %1088 = vmatpush.msrb.mxu1 %v3537_v41  ;;  %v3556_v33 = vld [vmem:[%s6418_s5 + $0x2c0] sm:$0xff]  ;;  %v3599_v41 = vld [vmem:[%s6421_s8 + $0x108] sm:$0xff] }
 0x16c   :  { %v605_v35 = vadd.f32 %v604_v37, %v575_v36  ;;  %v3514_v36 = vld [vmem:[%s6418_s5 + $0x1d0] sm:$0xff]  ;;  %v3515_v37 = vld [vmem:[%s6418_s5 + $0x1d8] sm:$0xff] }
 0x16d   :  { %1064 = vmatpush.msrb.mxu0 %v3538_v38  ;;  %1089 = vmatpush.msrb.mxu1 %v3535_v43  ;;  %v1220_v38 = vld [vmem:[%s6421_s8 + $0x78] sm:$0xff] }
 0x16e   :  { %v690_v31 = vmax.f32 %v605_v35, %v685_v20  ;;  %v3513_v20 = vld [vmem:[%s6418_s5 + $0x1c8] sm:$0xff]  ;;  %v3536_v35 = vld [vmem:[%s6418_s5 + $0x250] sm:$0xff]  ;;  %v3597_v43 = vld [vmem:[%s6421_s8 + $0xf8] sm:$0xff] }
 0x16f   :  { %1065 = vmatpush.msrb.mxu0 %v3536_v35  ;;  %v1218_v35 = vld [vmem:[%s6421_s8 + $0x68] sm:$0xff] }
 0x170   :  { %3458 = vmatpush.msk.msrb.mxu2 %vm700_vm2, %v690_v31  ;;  %3463 = vmatpush.msk.msra.mxu3 %vm700_vm2, %v690_v31  ;;  %v3511_v31 = vld [vmem:[%s6418_s5 + $0x1b8] sm:$0xff] }
 0x171   :  { %1066 = vmatpush.msrb.mxu0 %v3534_v42  ;;  %v1216_v42 = vld [vmem:[%s6421_s8 + $0x58] sm:$0xff] }
 0x172   :  { %717 = vmatpush.msrb.mxu2 %v689_v44  ;;  %749 = vmatpush.msra.mxu3 %v689_v44  ;;  %v3508_v44 = vld [vmem:[%s6418_s5 + $0x1a0] sm:$0xff] }
 0x174   :  { %718 = vmatpush.msrb.mxu2 %v688_v46  ;;  %750 = vmatpush.msra.mxu3 %v688_v46  ;;  %v3532_v46 = vld [vmem:[%s6418_s5 + $0x230] sm:$0xff] }
 0x175   :  { %1067 = vmatpush.msrb.mxu0 %v3532_v46  ;;  %v1214_v46 = vld [vmem:[%s6421_s8 + $0x48] sm:$0xff] }
 0x176   :  { %719 = vmatpush.msrb.mxu2 %v687_v47  ;;  %751 = vmatpush.msra.mxu3 %v687_v47  ;;  %v3533_v47 = vld [vmem:[%s6418_s5 + $0x238] sm:$0xff] }
 0x177   :  { %3459 = vmatmul.msk.f32.vlgmr.msrb.gmra.mxu2 %vm693_vm3, %v691_v49  ;;  %3464 = vmatmul.msk.f32.vlgmr.msra.gmra.mxu3 %vm693_vm3, %v3461_v50  ;;  %v3506_v49 = vld [vmem:[%s6418_s5 + $0x190] sm:$0xff]  ;;  %v3507_v50 = vld [vmem:[%s6418_s5 + $0x198] sm:$0xff] }
 0x178   :  { %3488 = vmatpush.msk.msra.mxu2 %vm700_vm2, %v3486_v52  ;;  %3491 = vmatpush.msk.msrb.mxu3 %vm700_vm2, %v3487_v53  ;;  %v3530_v52 = vld [vmem:[%s6418_s5 + $0x220] sm:$0xff]  ;;  %v3531_v53 = vld [vmem:[%s6418_s5 + $0x228] sm:$0xff] }
 0x179   :  { %1090 = vmatpush.msrb.mxu1 %v3533_v47  ;;  %1068 = vmatpush.msrb.mxu0 %v3530_v52  ;;  %v3595_v47 = vld [vmem:[%s6421_s8 + $0xe8] sm:$0xff]  ;;  %v1212_v52 = vld [vmem:[%s6421_s8 + $0x38] sm:$0xff] }
 0x17a   :  { %832 = vmatpush.msra.mxu2 %v3484_v4  ;;  %855 = vmatpush.msrb.mxu3 %v3485_v51  ;;  %v3504_v4 = vld [vmem:[%s6418_s5 + $0x180] sm:$0xff]  ;;  %v3505_v51 = vld [vmem:[%s6418_s5 + $0x188] sm:$0xff] }
 0x17b   :  { %1091 = vmatpush.msrb.mxu1 %v3531_v53  ;;  %v3593_v53 = vld [vmem:[%s6421_s8 + $0xd8] sm:$0xff] }
 0x17c   :  { %833 = vmatpush.msra.mxu2 %v3482_v54  ;;  %856 = vmatpush.msrb.mxu3 %v3483_v55  ;;  %v3528_v54 = vld [vmem:[%s6418_s5 + $0x210] sm:$0xff]  ;;  %v3529_v55 = vld [vmem:[%s6418_s5 + $0x218] sm:$0xff] }
 0x17d   :  { %1069 = vmatpush.msrb.mxu0 %v3528_v54  ;;  %1092 = vmatpush.msrb.mxu1 %v3529_v55  ;;  %v1210_v54 = vld [vmem:[%s6421_s8 + $0x28] sm:$0xff] }
 0x17e   :  { %834 = vmatpush.msra.mxu2 %v3480_v56  ;;  %857 = vmatpush.msrb.mxu3 %v3481_v21  ;;  %v3502_v56 = vld [vmem:[%s6418_s5 + $0x170] sm:$0xff]  ;;  %v3503_v21 = vld [vmem:[%s6418_s5 + $0x178] sm:$0xff]  ;;  %v3591_v55 = vld [vmem:[%s6421_s8 + $0xc8] sm:$0xff] }
 0x17f   :  { %3460 = vmatmul.msk.f32.gmra.mxu2 %vm693_vm3, %v692_v48  ;;  %3465 = vmatmul.msk.f32.gmra.mxu3 %vm693_vm3, %v3462_v57  ;;  %v3500_v48 = vld [vmem:[%s6418_s5 + $0x160] sm:$0xff]  ;;  %v3501_v57 = vld [vmem:[%s6418_s5 + $0x168] sm:$0xff] }
 0x180   :  { %835 = vmatpush.msra.mxu2 %v3478_v59  ;;  %858 = vmatpush.msrb.mxu3 %v3479_v62 }
 0x182   :  { %836 = vmatpush.msra.mxu2 %v3476_v63  ;;  %859 = vmatpush.msrb.mxu3 %v3477_v0 }
 0x184   :  { %837 = vmatpush.msra.mxu2 %v3474_v1  ;;  %860 = vmatpush.msrb.mxu3 %v3475_v2 }
 0x186   :  { %838 = vmatpush.msra.mxu2 %v3472_v32  ;;  %861 = vmatpush.msrb.mxu3 %v3473_v58 }
 0x188   :  { %839 = vmatpush.msra.mxu2 %v3470_v11  ;;  %862 = vmatpush.msrb.mxu3 %v3471_v12  ;;  %v3575_v11 = vld [vmem:[%s6418_s5 + $0x358] sm:$0xff]  ;;  %v3572_v12 = vld [vmem:[%s6418_s5 + $0x340] sm:$0xff] }
 0x18a   :  { %840 = vmatpush.msra.mxu2 %v3468_v15  ;;  %863 = vmatpush.msrb.mxu3 %v3469_v60  ;;  %v3570_v15 = vld [vmem:[%s6418_s5 + $0x330] sm:$0xff]  ;;  %v3571_v60 = vld [vmem:[%s6418_s5 + $0x338] sm:$0xff] }
 0x18c   :  { %841 = vmatpush.msra.mxu2 %v3466_v18  ;;  %864 = vmatpush.msrb.mxu3 %v3467_v22  ;;  %v3569_v18 = vld [vmem:[%s6418_s5 + $0x328] sm:$0xff]  ;;  %v3566_v22 = vld [vmem:[%s6418_s5 + $0x310] sm:$0xff] }
 0x18e   :  { %3522 = vmatpush.msk.msrb.mxu2 %vm700_vm2, %v3520_v25  ;;  %3525 = vmatpush.msk.msra.mxu3 %vm700_vm2, %v3521_v26  ;;  %v3564_v25 = vld [vmem:[%s6418_s5 + $0x300] sm:$0xff]  ;;  %v3565_v26 = vld [vmem:[%s6418_s5 + $0x308] sm:$0xff] }
 0x190   :  { %973 = vmatpush.msrb.mxu2 %v3518_v29  ;;  %996 = vmatpush.msra.mxu3 %v3519_v30  ;;  %v3563_v29 = vld [vmem:[%s6418_s5 + $0x2f8] sm:$0xff]  ;;  %v3560_v30 = vld [vmem:[%s6418_s5 + $0x2e0] sm:$0xff] }
 0x192   :  { %974 = vmatpush.msrb.mxu2 %v3516_v61  ;;  %997 = vmatpush.msra.mxu3 %v3517_v19  ;;  %v3559_v61 = vld [vmem:[%s6418_s5 + $0x2d8] sm:$0xff] }
 0x194   :  { %975 = vmatpush.msrb.mxu2 %v3514_v36  ;;  %998 = vmatpush.msra.mxu3 %v3515_v37 }
 0x196   :  { %976 = vmatpush.msrb.mxu2 %v3512_v40  ;;  %999 = vmatpush.msra.mxu3 %v3513_v20  ;;  %v1219_v40 = vld [vmem:[%s6421_s8 + $0x70] sm:$0xff] }
 0x197   :  { %v3600_v20 = vld [vmem:[%s6421_s8 + $0x110] sm:$0xff] }
 0x198   :  { %977 = vmatpush.msrb.mxu2 %v3510_v9  ;;  %1000 = vmatpush.msra.mxu3 %v3511_v31  ;;  %v1217_v9 = vld [vmem:[%s6421_s8 + $0x60] sm:$0xff] }
 0x199   :  { %v3598_v31 = vld [vmem:[%s6421_s8 + $0x100] sm:$0xff] }
 0x19a   :  { %978 = vmatpush.msrb.mxu2 %v3508_v44  ;;  %1001 = vmatpush.msra.mxu3 %v3509_v45  ;;  %v1215_v44 = vld [vmem:[%s6421_s8 + $0x50] sm:$0xff] }
 0x19b   :  { %v3596_v45 = vld [vmem:[%s6421_s8 + $0xf0] sm:$0xff] }
 0x19c   :  { %979 = vmatpush.msrb.mxu2 %v3506_v49  ;;  %1002 = vmatpush.msra.mxu3 %v3507_v50  ;;  %v1213_v49 = vld [vmem:[%s6421_s8 + $0x40] sm:$0xff] }
 0x19d   :  { %v3594_v50 = vld [vmem:[%s6421_s8 + $0xe0] sm:$0xff] }
 0x19e   :  { %980 = vmatpush.msrb.mxu2 %v3504_v4  ;;  %1003 = vmatpush.msra.mxu3 %v3505_v51  ;;  %v1211_v4 = vld [vmem:[%s6421_s8 + $0x30] sm:$0xff] }
 0x19f   :  { %v3592_v51 = vld [vmem:[%s6421_s8 + $0xd0] sm:$0xff] }
 0x1a0   :  { %981 = vmatpush.msrb.mxu2 %v3502_v56  ;;  %1004 = vmatpush.msra.mxu3 %v3503_v21  ;;  %v1209_v56 = vld [vmem:[%s6421_s8 + $0x20] sm:$0xff] }
 0x1a1   :  { %v3590_v21 = vld [vmem:[%s6421_s8 + $0xc0] sm:$0xff] }
 0x1a2   :  { %982 = vmatpush.msrb.mxu2 %v3500_v48  ;;  %1005 = vmatpush.msra.mxu3 %v3501_v57 }
 0x1fa   :  { %v721_v59 = vpop.f32.mrf.mxu2  ;;  %v753_v62 = vpop.f32.mrf.mxu3 }
 0x1fb   :  { %v759_v63 = vmax.f32 %v721_v59, %v753_v62  ;;  %v1208_v59 = vld [vmem:[%s6421_s8 + $0x18] sm:$0xff] }
 0x1fc   :  { %v1224_v62 = vld [vmem:[%s6421_s8 + $0x98] sm:$0xff] }
 0x1fd   :  { %762 = vst.msk [vmem:[#allocation2] sm:$0xff] %vm761_vm4, %v759_v63  ;;  %v3589_v63 = vld [vmem:[%s6421_s8 + $0xb8] sm:$0xff] }
 0x202   :  { %v724_v0 = vpop.f32.mrf.mxu2  ;;  %v756_v1 = vpop.f32.mrf.mxu3 }
 0x203   :  { %v760_v2 = vmax.f32 %v724_v0, %v756_v1  ;;  %v3605_v0 = vld [vmem:[%s6421_s8 + $0x138] sm:$0xff]  ;;  %v1207_v1 = vld [vmem:[%s6421_s8 + $0x10] sm:$0xff] }
 0x204   :  { %v765_v3 = vld [vmem:[#allocation2] sm:$0xff] }
 0x205   :  { %764 = vst.msk [vmem:[#allocation2 + $0x8] sm:$0x3f] %vm763_vm5, %v760_v2  ;;  %3495 = vmatmul.msk.f32.vlgmr.msra.gmra.mxu0 %vm761_vm4, %v765_v3  ;;  %3498 = vmatmul.msk.f32.vlgmr.msra.gmra.mxu1 %vm761_vm4, %v765_v3  ;;  %v1223_v2 = vld [vmem:[%s6421_s8 + $0x90] sm:$0xff] }
 0x206   :  { %1231 = vmatpush.msra.mxu0 %v1220_v38  ;;  %1266 = vmatpush.msra.mxu1 %v1224_v62  ;;  %v3588_v3 = vld [vmem:[%s6421_s8 + $0xb0] sm:$0xff] }
 0x208   :  { %1232 = vmatpush.msra.mxu0 %v1219_v40  ;;  %1267 = vmatpush.msra.mxu1 %v1223_v2 }
 0x20a   :  { %1233 = vmatpush.msra.mxu0 %v1218_v35 }
 0x20c   :  { %v789_v32 = vld [vmem:[#allocation2 + $0x1] sm:$0xff]  ;;  %v790_v14 = vld [vmem:[#allocation2 + $0x9] sm:$0x3]  ;;  %v1018_v27 = vld [vmem:[#allocation2 + $0xb] sm:$0x3]  ;;  %1234 = vmatpush.msra.mxu0 %v1217_v9 }
 0x20d   :  { %v766_v58 = vld [vmem:[#allocation2 + $0x8] sm:$0x3]  ;;  %3489 = vmatmul.msk.f32.vlgmr.msra.gmra.mxu2 %vm761_vm4, %v789_v32  ;;  %3492 = vmatmul.msk.f32.vlgmr.msrb.gmra.mxu3 %vm761_vm4, %v789_v32  ;;  %v931_v19 = vld [vmem:[#allocation2 + $0xa] sm:$0x3]  ;;  %v1105_v37 = vld [vmem:[#allocation2 + $0xc] sm:$0x3] }
 0x20e   :  { %3496 = vmatmul.msk.f32.gmra.mxu0 %vm761_vm4, %v766_v58  ;;  %3499 = vmatmul.msk.f32.gmra.mxu1 %vm761_vm4, %v766_v58  ;;  %v1017_v5 = vld [vmem:[#allocation2 + $0x3] sm:$0xff] }
 0x20f   :  { %3578 = vmatpush.msk.msra.mxu2 %vm700_vm2, %v3576_v6  ;;  %3581 = vmatpush.msk.msrb.mxu3 %vm700_vm2, %v3577_v7  ;;  %v930_v24 = vld [vmem:[#allocation2 + $0x2] sm:$0xff]  ;;  %v3604_v6 = vld [vmem:[%s6421_s8 + $0x130] sm:$0xff] }
 0x210   :  { %v1104_v36 = vld [vmem:[#allocation2 + $0x4] sm:$0xff]  ;;  %1235 = vmatpush.msra.mxu0 %v1216_v42 }
 0x211   :  { %1147 = vmatpush.msra.mxu2 %v3574_v10  ;;  %1170 = vmatpush.msrb.mxu3 %v3575_v11  ;;  %v1206_v32 = vld [vmem:[%s6421_s8 + $0x8] sm:$0xff]  ;;  %v1205_v11 = vld [vmem:[%s6421_s8] sm:$0xff] }
 0x212   :  { %1236 = vmatpush.msra.mxu0 %v1215_v44  ;;  %v1222_v58 = vld [vmem:[%s6421_s8 + $0x88] sm:$0xff] }
 0x213   :  { %1148 = vmatpush.msra.mxu2 %v3572_v12  ;;  %1171 = vmatpush.msrb.mxu3 %v3573_v13  ;;  %v3587_v7 = vld [vmem:[%s6421_s8 + $0xa8] sm:$0xff]  ;;  %v1221_v12 = vld [vmem:[%s6421_s8 + $0x80] sm:$0xff] }
 0x214   :  { %1237 = vmatpush.msra.mxu0 %v1214_v46  ;;  %1268 = vmatpush.msra.mxu1 %v1222_v58  ;;  %v3603_v10 = vld [vmem:[%s6421_s8 + $0x128] sm:$0xff] }
 0x215   :  { %3490 = vmatmul.msk.f32.gmra.mxu2 %vm761_vm4, %v790_v14  ;;  %3493 = vmatmul.msk.f32.gmra.mxu3 %vm761_vm4, %v790_v14 }
 0x216   :  { %3551 = vmatmul.msk.f32.vlgmr.msrb.gmra.mxu0 %vm761_vm4, %v1017_v5  ;;  %3554 = vmatmul.msk.f32.vlgmr.msrb.gmra.mxu1 %vm761_vm4, %v1017_v5 }
 0x217   :  { %1149 = vmatpush.msra.mxu2 %v3570_v15  ;;  %1172 = vmatpush.msrb.mxu3 %v3571_v60  ;;  %v3586_v15 = vld [vmem:[%s6421_s8 + $0xa0] sm:$0xff] }
 0x218   :  { %1238 = vmatpush.msra.mxu0 %v1213_v49  ;;  %v3602_v60 = vld [vmem:[%s6421_s8 + $0x120] sm:$0xff]  ;;  %1269 = vmatpush.msra.mxu1 %v1221_v12 }
 0x219   :  { %1150 = vmatpush.msra.mxu2 %v3568_v17  ;;  %1173 = vmatpush.msrb.mxu3 %v3569_v18 }
 0x21a   :  { %1239 = vmatpush.msra.mxu0 %v1212_v52 }
 0x21b   :  { %1151 = vmatpush.msra.mxu2 %v3566_v22  ;;  %1174 = vmatpush.msrb.mxu3 %v3567_v23 }
 0x21c   :  { %1240 = vmatpush.msra.mxu0 %v1211_v4 }
 0x21d   :  { %3523 = vmatmul.msk.f32.vlgmr.msrb.gmra.mxu2 %vm761_vm4, %v930_v24  ;;  %3526 = vmatmul.msk.f32.vlgmr.msra.gmra.mxu3 %vm761_vm4, %v930_v24 }
 0x21e   :  { %3552 = vmatmul.msk.f32.gmra.mxu0 %vm761_vm4, %v1018_v27  ;;  %3555 = vmatmul.msk.f32.gmra.mxu1 %vm761_vm4, %v1018_v27 }
 0x21f   :  { %1152 = vmatpush.msra.mxu2 %v3564_v25  ;;  %1175 = vmatpush.msrb.mxu3 %v3565_v26 }
 0x220   :  { %1241 = vmatpush.msra.mxu0 %v1210_v54 }
 0x221   :  { %1153 = vmatpush.msra.mxu2 %v3562_v28  ;;  %1176 = vmatpush.msrb.mxu3 %v3563_v29 }
 0x222   :  { %1242 = vmatpush.msra.mxu0 %v1209_v56 }
 0x223   :  { %1154 = vmatpush.msra.mxu2 %v3560_v30  ;;  %1177 = vmatpush.msrb.mxu3 %v3561_v8 }
 0x224   :  { %1243 = vmatpush.msra.mxu0 %v1208_v59 }
 0x225   :  { %3524 = vmatmul.msk.f32.gmra.mxu2 %vm761_vm4, %v931_v19  ;;  %3527 = vmatmul.msk.f32.gmra.mxu3 %vm761_vm4, %v931_v19 }
 0x226   :  { %1155 = vmatpush.msra.mxu2 %v3558_v16  ;;  %1178 = vmatpush.msrb.mxu3 %v3559_v61  ;;  %v1191_v61 = vld [vmem:[%s6419_s6] sm:$0x3] }
 0x227   :  { %1244 = vmatpush.msra.mxu0 %v1207_v1 }
 0x228   :  { %1156 = vmatpush.msra.mxu2 %v3556_v33  ;;  %1179 = vmatpush.msrb.mxu3 %v3557_v34  ;;  %v1193_v33 = vperm.slane %v1191_v61, 0 }
 0x229   :  { %1245 = vmatpush.msra.mxu0 %v1206_v32 }
 0x22a   :  { %1298 = vmatpush.msrb.mxu2 %v3601_v39  ;;  %1333 = vmatpush.msra.mxu3 %v3605_v0  ;;  %v1410_v0 = vld [vmem:[%s6422_s9 + $0x28] sm:$0xff] }
 0x22b   :  { %1246 = vmatpush.msra.mxu0 %v1205_v11 }
 0x22c   :  { %1299 = vmatpush.msrb.mxu2 %v3600_v20  ;;  %1334 = vmatpush.msra.mxu3 %v3604_v6 }
 0x22d   :  { %3579 = vmatmul.msk.f32.vlgmr.msra.gmra.mxu2 %vm761_vm4, %v1104_v36  ;;  %3582 = vmatmul.msk.f32.vlgmr.msrb.gmra.mxu3 %vm761_vm4, %v1104_v36  ;;  %v1194_v36 = vperm.slane %v1191_v61, 1  ;;  %v3631_v61 = vld [vmem:[%s6422_s9 + $0xd0] sm:$0xff] }
 0x22e   :  { %1300 = vmatpush.msrb.mxu2 %v3599_v41  ;;  %1335 = vmatpush.msra.mxu3 %v3603_v10 }
 0x230   :  { %1301 = vmatpush.msrb.mxu2 %v3598_v31  ;;  %1336 = vmatpush.msra.mxu3 %v3602_v60  ;;  %v1346_v60 = vld [vmem:[%s6420_s7] sm:$0x1f] }
 0x232   :  { %1302 = vmatpush.msrb.mxu2 %v3597_v43 }
 0x234   :  { %1303 = vmatpush.msrb.mxu2 %v3596_v45 }
 0x235   :  { %3580 = vmatmul.msk.f32.gmra.mxu2 %vm761_vm4, %v1105_v37  ;;  %3583 = vmatmul.msk.f32.gmra.mxu3 %vm761_vm4, %v1105_v37 }
 0x236   :  { %1304 = vmatpush.msrb.mxu2 %v3595_v47 }
 0x238   :  { %1305 = vmatpush.msrb.mxu2 %v3594_v50 }
 0x23a   :  { %1306 = vmatpush.msrb.mxu2 %v3593_v53 }
 0x23c   :  { %1307 = vmatpush.msrb.mxu2 %v3592_v51 }
 0x23e   :  { %1308 = vmatpush.msrb.mxu2 %v3591_v55 }
 0x240   :  { %1309 = vmatpush.msrb.mxu2 %v3590_v21  ;;  %v1414_v21 = vld [vmem:[%s6422_s9 + $0x48] sm:$0xff] }
 0x241   :  { %1425 = vmatpush.msrb.mxu3 %v1414_v21  ;;  %v3648_v21 = vld [vmem:[%s6422_s9 + $0x148] sm:$0xff] }
 0x242   :  { %1310 = vmatpush.msrb.mxu2 %v3589_v63  ;;  %v1411_v63 = vld [vmem:[%s6422_s9 + $0x30] sm:$0xff] }
 0x244   :  { %1311 = vmatpush.msrb.mxu2 %v3588_v3  ;;  %v1409_v3 = vld [vmem:[%s6422_s9 + $0x20] sm:$0xff] }
 0x246   :  { %1312 = vmatpush.msrb.mxu2 %v3587_v7 }
 0x248   :  { %1313 = vmatpush.msrb.mxu2 %v3586_v15 }
 0x282   :  { %v901_v13 = vpop.f32.mrf.mxu0  ;;  %v924_v14 = vpop.f32.mrf.mxu1 }
 0x28b   :  { %v904_v23 = vpop.f32.mrf.mxu0  ;;  %v927_v24 = vpop.f32.mrf.mxu1 }
 0x290   :  { %v843_v48 = vpop.f32.mrf.mxu2  ;;  %v866_v57 = vpop.f32.mrf.mxu3 }
 0x291   :  { %v902_v27 = vadd.f32 %v901_v13, %v843_v48  ;;  %v925_v28 = vadd.f32 %v924_v14, %v866_v57  ;;  %v1413_v48 = vld [vmem:[%s6422_s9 + $0x40] sm:$0xff]  ;;  %v1412_v57 = vld [vmem:[%s6422_s9 + $0x38] sm:$0xff] }
 0x292   :  { %1426 = vmatpush.msrb.mxu3 %v1413_v48  ;;  %v3647_v48 = vld [vmem:[%s6422_s9 + $0x140] sm:$0xff] }
 0x293   :  { %v1071_v8 = vpop.f32.mrf.mxu0  ;;  %v1094_v16 = vpop.f32.mrf.mxu1 }
 0x294   :  { %1427 = vmatpush.msrb.mxu3 %v1412_v57 }
 0x296   :  { %1428 = vmatpush.msrb.mxu3 %v1411_v63 }
 0x298   :  { %v846_v5 = vpop.f32.mrf.mxu2  ;;  %v869_v17 = vpop.f32.mrf.mxu3  ;;  %1429 = vmatpush.msrb.mxu3 %v1410_v0 }
 0x299   :  { %v905_v39 = vadd.f32 %v904_v23, %v846_v5  ;;  %v928_v40 = vadd.f32 %v927_v24, %v869_v17  ;;  %v3610_v5 = vld [vmem:[%s6420_s7 + $0x8] sm:$0x1f]  ;;  %v3623_v17 = vld [vmem:[%s6422_s9 + $0x98] sm:$0xff]  ;;  %v3622_v24 = vld [vmem:[%s6422_s9 + $0x90] sm:$0xff] }
 0x29a   :  { %1430 = vmatpush.msrb.mxu3 %v1409_v3  ;;  %1461 = vmatpush.msrb.mxu0 %v3623_v17  ;;  %v1408_v23 = vld [vmem:[%s6422_s9 + $0x18] sm:$0xff] }
 0x29b   :  { %v1074_v45 = vpop.f32.mrf.mxu0  ;;  %v1097_v46 = vpop.f32.mrf.mxu1 }
 0x29c   :  { %1431 = vmatpush.msrb.mxu3 %v1408_v23  ;;  %1462 = vmatpush.msrb.mxu0 %v3622_v24 }
 0x2a0   :  { %v984_v18 = vpop.f32.mrf.mxu2  ;;  %v1007_v22 = vpop.f32.mrf.mxu3 }
 0x2a1   :  { %v1013_v29 = vadd.f32 %v984_v18, %v902_v27  ;;  %v1014_v30 = vadd.f32 %v1007_v22, %v925_v28  ;;  %v3634_v18 = vld [vmem:[%s6422_s9 + $0xe8] sm:$0xff]  ;;  %v3645_v22 = vld [vmem:[%s6422_s9 + $0x138] sm:$0xff]  ;;  %v1407_v27 = vld [vmem:[%s6422_s9 + $0x10] sm:$0xff] }
 0x2a2   :  { %1533 = vmatpush.msra.mxu2 %v3645_v22  ;;  %v3621_v28 = vld [vmem:[%s6422_s9 + $0x88] sm:$0xff]  ;;  %1432 = vmatpush.msrb.mxu3 %v1407_v27 }
 0x2a3   :  { %v1100_v19 = vadd.f32 %v1071_v8, %v1013_v29  ;;  %v1101_v34 = vadd.f32 %v1094_v16, %v1014_v30  ;;  %v3632_v29 = vld [vmem:[%s6422_s9 + $0xd8] sm:$0xff]  ;;  %v3643_v30 = vld [vmem:[%s6422_s9 + $0x128] sm:$0xff]  ;;  %v3620_v16 = vld [vmem:[%s6422_s9 + $0x80] sm:$0xff]  ;;  %1463 = vmatpush.msrb.mxu0 %v3621_v28 }
 0x2a4   :  { %v1406_v8 = vld [vmem:[%s6422_s9 + $0x8] sm:$0xff]  ;;  %v1625_v28 = vld [vmem:[%s6424_s11 + $0x70] sm:$0xff] }
 0x2a5   :  { %1433 = vmatpush.msrb.mxu3 %v1406_v8  ;;  %1464 = vmatpush.msrb.mxu0 %v3620_v16  ;;  %v1622_v8 = vld [vmem:[%s6424_s11 + $0x58] sm:$0xff]  ;;  %v1621_v16 = vld [vmem:[%s6424_s11 + $0x50] sm:$0xff] }
 0x2a8   :  { %v987_v25 = vpop.f32.mrf.mxu2  ;;  %v1010_v26 = vpop.f32.mrf.mxu3 }
 0x2a9   :  { %v1015_v41 = vadd.f32 %v987_v25, %v905_v39  ;;  %v1016_v9 = vadd.f32 %v1010_v26, %v928_v40  ;;  %v3633_v25 = vld [vmem:[%s6422_s9 + $0xe0] sm:$0xff]  ;;  %v3644_v26 = vld [vmem:[%s6422_s9 + $0x130] sm:$0xff] }
 0x2aa   :  { %1534 = vmatpush.msra.mxu2 %v3644_v26  ;;  %v3618_v39 = vld [vmem:[%s6422_s9 + $0x70] sm:$0xff]  ;;  %v3629_v40 = vld [vmem:[%s6422_s9 + $0xc0] sm:$0xff] }
 0x2ab   :  { %v1102_v47 = vadd.f32 %v1074_v45, %v1015_v41  ;;  %v1103_v49 = vadd.f32 %v1097_v46, %v1016_v9  ;;  %v3617_v41 = vld [vmem:[%s6422_s9 + $0x68] sm:$0xff]  ;;  %v3628_v9 = vld [vmem:[%s6422_s9 + $0xb8] sm:$0xff]  ;;  %v3638_v45 = vld [vmem:[%s6422_s9 + $0x100] sm:$0xff] }
 0x2ac   :  { %1535 = vmatpush.msra.mxu2 %v3643_v30  ;;  %v3653_v46 = vld [vmem:[%s6422_s9 + $0x170] sm:$0xff]  ;;  %v1623_v30 = vld [vmem:[%s6424_s11 + $0x60] sm:$0xff] }
 0x2b0   :  { %v1158_v37 = vpop.f32.mrf.mxu2  ;;  %v1181_v38 = vpop.f32.mrf.mxu3 }
 0x2b1   :  { %v1187_v20 = vadd.f32 %v1158_v37, %v1100_v19  ;;  %v1188_v35 = vadd.f32 %v1181_v38, %v1101_v34  ;;  %v3642_v19 = vld [vmem:[%s6422_s9 + $0x120] sm:$0xff]  ;;  %v3619_v34 = vld [vmem:[%s6422_s9 + $0x78] sm:$0xff]  ;;  %v3656_v38 = vld [vmem:[%s6422_s9 + $0x188] sm:$0xff] }
 0x2b2   :  { %1536 = vmatpush.msra.mxu2 %v3642_v19  ;;  %v3641_v37 = vld [vmem:[%s6422_s9 + $0x118] sm:$0xff]  ;;  %1465 = vmatpush.msrb.mxu0 %v3619_v34  ;;  %v1619_v19 = vld [vmem:[%s6424_s11 + $0x40] sm:$0xff]  ;;  %v1617_v34 = vld [vmem:[%s6424_s11 + $0x30] sm:$0xff] }
 0x2b3   :  { %v1197_v31 = vadd.f32 %v1193_v33, %v1187_v20  ;;  %v1198_v42 = vadd.f32 %v1194_v36, %v1188_v35  ;;  %v3640_v20 = vld [vmem:[%s6422_s9 + $0x110] sm:$0xff]  ;;  %v3655_v35 = vld [vmem:[%s6422_s9 + $0x180] sm:$0xff] }
 0x2b4   :  { %1537 = vmatpush.msra.mxu2 %v3641_v37  ;;  %1466 = vmatpush.msrb.mxu0 %v3618_v39  ;;  %v1615_v37 = vld [vmem:[%s6424_s11 + $0x20] sm:$0xff] }
 0x2b5   :  { %v1201_v43 = vmax.f32 %v1197_v31, 0.0  ;;  %v1202_v44 = vmax.f32 %v1198_v42, 0.0  ;;  %v3639_v31 = vld [vmem:[%s6422_s9 + $0x108] sm:$0xff]  ;;  %v3654_v42 = vld [vmem:[%s6422_s9 + $0x178] sm:$0xff] }
 0x2b6   :  { %1538 = vmatpush.msra.mxu2 %v3640_v20  ;;  %1467 = vmatpush.msrb.mxu0 %v3617_v41  ;;  %v1613_v41 = vld [vmem:[%s6424_s11 + $0x10] sm:$0xff] }
 0x2b7   :  { %1247 = vmatmul.f32.vlgmr.msra.gmra.mxu0 %v1201_v43  ;;  %3584 = vmatmul.msk.f32.vlgmr.msra.gmra.mxu1 %vm79_vm0, %v1202_v44 }
 0x2b8   :  { %1314 = vmatmul.f32.vlgmr.msrb.gmra.mxu2 %v1201_v43  ;;  %3606 = vmatmul.msk.f32.vlgmr.msra.gmra.mxu3 %vm79_vm0, %v1202_v44  ;;  %v1161_v50 = vpop.f32.mrf.mxu2  ;;  %v1184_v52 = vpop.f32.mrf.mxu3  ;;  %v3616_v43 = vld [vmem:[%s6422_s9 + $0x60] sm:$0xff]  ;;  %v3627_v44 = vld [vmem:[%s6422_s9 + $0xb0] sm:$0xff] }
 0x2b9   :  { %v1189_v53 = vadd.f32 %v1161_v50, %v1102_v47  ;;  %v1190_v4 = vadd.f32 %v1184_v52, %v1103_v49  ;;  %1539 = vmatpush.msra.mxu2 %v3639_v31  ;;  %v3615_v47 = vld [vmem:[%s6422_s9 + $0x58] sm:$0xff]  ;;  %v3626_v49 = vld [vmem:[%s6422_s9 + $0xa8] sm:$0xff]  ;;  %1468 = vmatpush.msrb.mxu0 %v3616_v43  ;;  %v1611_v31 = vld [vmem:[%s6424_s11] sm:$0xff] }
 0x2ba   :  { %v3637_v50 = vld [vmem:[%s6422_s9 + $0xf8] sm:$0xff]  ;;  %v3652_v52 = vld [vmem:[%s6422_s9 + $0x168] sm:$0xff] }
 0x2bb   :  { %v1200_v51 = vadd.f32 %v1194_v36, %v1190_v4  ;;  %v1199_v54 = vadd.f32 %v1193_v33, %v1189_v53  ;;  %v1405_v33 = vld [vmem:[%s6422_s9] sm:$0xff]  ;;  %v3630_v36 = vld [vmem:[%s6422_s9 + $0xc8] sm:$0xff]  ;;  %1540 = vmatpush.msra.mxu2 %v3638_v45  ;;  %v3614_v53 = vld [vmem:[%s6422_s9 + $0x50] sm:$0xff]  ;;  %1469 = vmatpush.msrb.mxu0 %v3615_v47 }
 0x2bc   :  { %1434 = vmatpush.msrb.mxu3 %v1405_v33  ;;  %v3625_v4 = vld [vmem:[%s6422_s9 + $0xa0] sm:$0xff]  ;;  %v1618_v33 = vld [vmem:[%s6424_s11 + $0x38] sm:$0xff] }
 0x2bd   :  { %v1203_v55 = vmax.f32 %v1199_v54, 0.0  ;;  %v1204_v56 = vmax.f32 %v1200_v51, 0.0  ;;  %v3636_v51 = vld [vmem:[%s6422_s9 + $0xf0] sm:$0xff]  ;;  %v3651_v54 = vld [vmem:[%s6422_s9 + $0x160] sm:$0xff]  ;;  %1541 = vmatpush.msra.mxu2 %v3637_v50  ;;  %1470 = vmatpush.msrb.mxu0 %v3614_v53  ;;  %v3671_v53 = vld [vmem:[%s6414_s1 + $0x78] sm:$0xff] }
 0x2be   :  { %1569 = vmatpush.msra.mxu3 %v3656_v38  ;;  %v1614_v38 = vld [vmem:[%s6424_s11 + $0x18] sm:$0xff] }
 0x2bf   :  { %1250 = vmatmul.f32.gmra.mxu0 %v1203_v55  ;;  %3585 = vmatmul.msk.f32.gmra.mxu1 %vm79_vm0, %v1204_v56 }
 0x2c0   :  { %1317 = vmatmul.f32.gmra.mxu2 %v1203_v55  ;;  %3607 = vmatmul.msk.f32.gmra.mxu3 %vm79_vm0, %v1204_v56  ;;  %v3650_v55 = vld [vmem:[%s6422_s9 + $0x158] sm:$0xff]  ;;  %v3649_v56 = vld [vmem:[%s6422_s9 + $0x150] sm:$0xff] }
 0x2c1   :  { %1570 = vmatpush.msra.mxu3 %v3655_v35  ;;  %1542 = vmatpush.msra.mxu2 %v3636_v51  ;;  %v3667_v51 = vld [vmem:[%s6414_s1 + $0x58] sm:$0xff] }
 0x2c2   :  { %1631 = vmatpush.msra.mxu0 %v1625_v28  ;;  %v1874_v28 = vld [vmem:[%s6432_s17 + $0x2a] sm:$0xff] }
 0x2c3   :  { %1571 = vmatpush.msra.mxu3 %v3654_v42  ;;  %v1651_v42 = vld [vmem:[%s6425_s12 + $0x8] sm:$0x3] }
 0x2c5   :  { %1572 = vmatpush.msra.mxu3 %v3653_v46 }
 0x2c7   :  { %1573 = vmatpush.msra.mxu3 %v3652_v52  ;;  %v1650_v52 = vld [vmem:[%s6425_s12] sm:$0xff] }
 0x2c9   :  { %1574 = vmatpush.msra.mxu3 %v3651_v54  ;;  %v1720_v54 = vld [vmem:[%s6414_s1 + $0x38] sm:$0xff] }
 0x2cb   :  { %1575 = vmatpush.msra.mxu3 %v3650_v55  ;;  %v3665_v55 = vld [vmem:[%s6414_s1 + $0x48] sm:$0xff] }
 0x2cd   :  { %1576 = vmatpush.msra.mxu3 %v3649_v56  ;;  %v1718_v56 = vld [vmem:[%s6414_s1 + $0x28] sm:$0xff] }
 0x2cf   :  { %1577 = vmatpush.msra.mxu3 %v3648_v21  ;;  %v1721_v21 = vld [vmem:[%s6432_s17 + $0x21] sm:$0xff] }
 0x2d1   :  { %1578 = vmatpush.msra.mxu3 %v3647_v48  ;;  %v3695_v48 = vld [vmem:[%s6414_s1 + $0xb8] sm:$0xff] }
 0x334   :  { %v1248_v59 = vpop.f32.mrf.mxu0  ;;  %v1271_v62 = vpop.f32.mrf.mxu1 }
 0x335   :  { %v1272_v13 = vadd.f32 %v1271_v62, %v1248_v59 }
 0x33b   :  { %v1315_v1 = vpop.f32.mrf.mxu2  ;;  %v1338_v2 = vpop.f32.mrf.mxu3 }
 0x33c   :  { %v1251_v6 = vpop.f32.mrf.mxu0  ;;  %v1274_v32 = vpop.f32.mrf.mxu1  ;;  %v1339_v10 = vadd.f32 %v1338_v2, %v1315_v1 }
 0x33d   :  { %v1275_v11 = vadd.f32 %v1274_v32, %v1251_v6  ;;  %v1403_v6 = vld [vmem:[%s6423_s10] sm:$0x1] }
 0x33e   :  { %v1344_v15 = vmax.f32 %v1272_v13, %v1339_v10 }
 0x343   :  { %v1318_v58 = vpop.f32.mrf.mxu2  ;;  %v1341_v7 = vpop.f32.mrf.mxu3 }
 0x344   :  { %v1342_v12 = vadd.f32 %v1341_v7, %v1318_v58 }
 0x346   :  { %v1345_v14 = vmax.f32 %v1275_v11, %v1342_v12 }
 0x348   :  { %3608 = vmatpush.msk.msrb.mxu1 %vm1351_vm6, %v1345_v14 }
 0x34a   :  { %1370 = vmatpush.msrb.mxu1 %v1344_v15 }
 0x34b   :  { %3609 = vmatmul.msk.f32.vlgmr.msrb.gmra.mxu1 %vm1347_vm7, %v1346_v60 }
 0x34c   :  { %3611 = vmatpush.msk.msra.mxu1 %vm1351_vm6, %v1345_v14 }
 0x34e   :  { %1395 = vmatpush.msra.mxu1 %v1344_v15 }
 0x350   :  { %1497 = vmatpush.msrb.mxu1 %v3634_v18  ;;  %v1585_v18 = vlaneseq }
 0x352   :  { %1498 = vmatpush.msrb.mxu1 %v3633_v25  ;;  %v5179_v22 = vand.u32 127, %v1585_v18  ;;  %v3709_v18 = vld [vmem:[%s6414_s1 + $0xe8] sm:$0xff] }
 0x353   :  { %3612 = vmatmul.msk.f32.vlgmr.msra.gmra.mxu1 %vm1347_vm7, %v3610_v5 }
 0x354   :  { %1499 = vmatpush.msrb.mxu1 %v3632_v29  ;;  %v1624_v29 = vld [vmem:[%s6424_s11 + $0x68] sm:$0xff] }
 0x355   :  { %1632 = vmatpush.msra.mxu0 %v1624_v29  ;;  %v1875_v29 = vld [vmem:[%s6432_s17 + $0x32] sm:$0xff] }
 0x356   :  { %1500 = vmatpush.msrb.mxu1 %v3631_v61  ;;  %v1620_v61 = vld [vmem:[%s6424_s11 + $0x48] sm:$0xff] }
 0x357   :  { %1633 = vmatpush.msra.mxu0 %v1623_v30  ;;  %v1876_v30 = vld [vmem:[%s6432_s17 + $0x3a] sm:$0xf] }
 0x358   :  { %1501 = vmatpush.msrb.mxu1 %v3630_v36  ;;  %v1616_v36 = vld [vmem:[%s6424_s11 + $0x28] sm:$0xff] }
 0x359   :  { %1634 = vmatpush.msra.mxu0 %v1622_v8  ;;  %v2053_v8 = vld [vmem:[%s6432_s17 + $0x24] sm:$0xff] }
 0x35a   :  { %1502 = vmatpush.msrb.mxu1 %v3629_v40 }
 0x35b   :  { %1635 = vmatpush.msra.mxu0 %v1621_v16  ;;  %v2054_v16 = vld [vmem:[%s6432_s17 + $0x2c] sm:$0xff] }
 0x35c   :  { %1503 = vmatpush.msrb.mxu1 %v3628_v9  ;;  %v1612_v9 = vld [vmem:[%s6424_s11 + $0x8] sm:$0xff] }
 0x35d   :  { %1636 = vmatpush.msra.mxu0 %v1620_v61  ;;  %v5393_v61 = vld [vmem:[%s6432_s17 + $0x2b] sm:$0xff] }
 0x35e   :  { %1504 = vmatpush.msrb.mxu1 %v3627_v44 }
 0x35f   :  { %1637 = vmatpush.msra.mxu0 %v1619_v19  ;;  %v1681_v19 = vld [vmem:[%s6427_s14 + $0x8] sm:$0x3] }
 0x360   :  { %1505 = vmatpush.msrb.mxu1 %v3626_v49  ;;  %v4003_v49 = vmov 0.0   ;;  %3662 = vmatpush.msk.msrb.mxu2 %vm1351_vm6, %v1681_v19 }
 0x361   :  { %1638 = vmatpush.msra.mxu0 %v1618_v33  ;;  %v1680_v33 = vld [vmem:[%s6427_s14] sm:$0xff] }
 0x362   :  { %1506 = vmatpush.msrb.mxu1 %v3625_v4  ;;  %v3669_v4 = vld [vmem:[%s6414_s1 + $0x68] sm:$0xff]  ;;  %1704 = vmatpush.msrb.mxu2 %v1680_v33 }
 0x363   :  { %1639 = vmatpush.msra.mxu0 %v1617_v34  ;;  %v2055_v34 = vld [vmem:[%s6432_s17 + $0x34] sm:$0xff] }
 0x364   :  { %3660 = vmatpush.msk.msra.mxu1 %vm1351_vm6, %v1651_v42  ;;  %v3688_v42 = vld [vmem:[%s6414_s1 + $0x80] sm:$0xff] }
 0x365   :  { %1640 = vmatpush.msra.mxu0 %v1616_v36  ;;  %v1719_v36 = vld [vmem:[%s6414_s1 + $0x30] sm:$0xff] }
 0x366   :  { %1674 = vmatpush.msra.mxu1 %v1650_v52  ;;  %v3706_v52 = vld [vmem:[%s6414_s1 + $0xd0] sm:$0xff] }
 0x367   :  { %1641 = vmatpush.msra.mxu0 %v1615_v37  ;;  %v1717_v37 = vld [vmem:[%s6414_s1 + $0x20] sm:$0xff] }
 0x369   :  { %1642 = vmatpush.msra.mxu0 %v1614_v38  ;;  %v5417_v38 = vld [vmem:[%s6432_s17 + $0x33] sm:$0xff] }
 0x36b   :  { %1643 = vmatpush.msra.mxu0 %v1613_v41  ;;  %v3692_v41 = vld [vmem:[%s6414_s1 + $0xa0] sm:$0xff] }
 0x36d   :  { %1644 = vmatpush.msra.mxu0 %v1612_v9  ;;  %v5440_v9 = vld [vmem:[%s6432_s17 + $0x3b] sm:$0xf] }
 0x36f   :  { %1645 = vmatpush.msra.mxu0 %v1611_v31  ;;  %v3690_v31 = vld [vmem:[%s6414_s1 + $0x90] sm:$0xff] }
 0x3c8   :  { %v1372_v57 = vpop.f32.mrf.mxu1 }
 0x3d0   :  { %v1397_v59 = vpop.f32.mrf.mxu1 }
 0x3d1   :  { %v1400_v62 = vmax.f32 %v1372_v57, %v1397_v59  ;;  %v3693_v57 = vld [vmem:[%s6414_s1 + $0xa8] sm:$0xff]  ;;  %v1716_v59 = vld [vmem:[%s6414_s1 + $0x18] sm:$0xff] }
 0x3d3   :  { %1402 = vst.msk [vmem:[#allocation4] sm:$0x1f] %vm1401_vm8, %v1400_v62  ;;  %v1714_v62 = vld [vmem:[%s6414_s1 + $0x8] sm:$0xff] }
 0x3da   :  { %v1404_v63 = vld [vmem:[#allocation4] sm:$0x1]  ;;  %v1440_v0 = vld [vmem:[#allocation4 + $0x1] sm:$0x1]  ;;  %v1476_v1 = vld [vmem:[#allocation4 + $0x2] sm:$0x1] }
 0x3db   :  { %3613 = vmatmul.msk.f32.vlgmr.msrb.gmra.mxu3 %vm1415_vm9, %v1404_v63  ;;  %3624 = vmatmul.msk.f32.vlgmr.msrb.gmra.mxu0 %vm1415_vm9, %v1440_v0  ;;  %v1512_v2 = vld [vmem:[#allocation4 + $0x3] sm:$0x1]  ;;  %v1548_v3 = vld [vmem:[#allocation4 + $0x4] sm:$0x1]  ;;  %v3691_v0 = vld [vmem:[%s6414_s1 + $0x98] sm:$0xff] }
 0x3dc   :  { %3635 = vmatmul.msk.f32.vlgmr.msrb.gmra.mxu1 %vm1415_vm9, %v1476_v1  ;;  %3646 = vmatmul.msk.f32.vlgmr.msra.gmra.mxu2 %vm1415_vm9, %v1512_v2  ;;  %v5275_v63 = vld [vmem:[%s6432_s17 + $0x20] sm:$0xff]  ;;  %v3689_v1 = vld [vmem:[%s6414_s1 + $0x88] sm:$0xff] }
 0x3dd   :  { %1786 = vmatpush.msrb.mxu3 %v3671_v53  ;;  %1856 = vmatpush.msrb.mxu0 %v1720_v54  ;;  %v1722_v2 = vld [vmem:[%s6432_s17 + $0x29] sm:$0xff]  ;;  %v3704_v53 = vld [vmem:[%s6414_s1 + $0xc0] sm:$0xff] }
 0x3de   :  { %1827 = vmatpush.msra.mxu2 %v1719_v36  ;;  %v3722_v54 = vld [vmem:[%s6414_s1 + $0x110] sm:$0xff] }
 0x3df   :  { %1787 = vmatpush.msrb.mxu3 %v3669_v4  ;;  %1857 = vmatpush.msrb.mxu0 %v1718_v56  ;;  %v3726_v4 = vld [vmem:[%s6414_s1 + $0x130] sm:$0xff] }
 0x3e0   :  { %1828 = vmatpush.msra.mxu2 %v1717_v37 }
 0x3e1   :  { %1788 = vmatpush.msrb.mxu3 %v3667_v51  ;;  %1858 = vmatpush.msrb.mxu0 %v1716_v59  ;;  %v3724_v51 = vld [vmem:[%s6414_s1 + $0x120] sm:$0xff] }
 0x3e3   :  { %3657 = vmatmul.msk.f32.vlgmr.msra.gmra.mxu3 %vm1415_vm9, %v1548_v3  ;;  %1859 = vmatpush.msrb.mxu0 %v1714_v62  ;;  %v5292_v3 = vld [vmem:[%s6432_s17 + $0x28] sm:$0xff]  ;;  %v2185_v62 = vld [vmem:[%s6417_s4 + $0xa0] sm:$0xff] }
 0x3e4   :  { %1789 = vmatpush.msrb.mxu3 %v3665_v55  ;;  %v3720_v55 = vld [vmem:[%s6414_s1 + $0x100] sm:$0xff] }
 0x3e6   :  { %1938 = vmatpush.msra.mxu3 %v3695_v48 }
 0x3e8   :  { %1939 = vmatpush.msra.mxu3 %v3693_v57 }
 0x3ea   :  { %1940 = vmatpush.msra.mxu3 %v3691_v0 }
 0x3eb   :  { %3676 = vmatmul.msk.f32.vlgmr.msrb.gmra.mxu3 %vm79_vm0, %v1721_v21 }
 0x3ec   :  { %1941 = vmatpush.msra.mxu3 %v3689_v1 }
 0x3f3   :  { %3677 = vmatmul.msk.f32.gmra.mxu3 %vm79_vm0, %v1722_v2 }
 0x458   :  { %v1472_v7 = vpop.f32.mrf.mxu0 }
 0x459   :  { %v1508_v11 = vpop.f32.mrf.mxu1 }
 0x45e   :  { %v1436_v32 = vpop.f32.mrf.mxu3 }
 0x45f   :  { %v1439_v58 = vadd.f32 %v1436_v32, %v1403_v6  ;;  %v1544_v13 = vpop.f32.mrf.mxu2  ;;  %v1723_v6 = vld [vmem:[%s6432_s17 + $0x31] sm:$0xff] }
 0x460   :  { %3678 = vmatmul.msk.f32.gmra.mxu3 %vm79_vm0, %v1723_v6  ;;  %v5303_v32 = vld [vmem:[%s6432_s17 + $0x30] sm:$0xff] }
 0x461   :  { %v1475_v10 = vadd.f32 %v1472_v7, %v1439_v58  ;;  %v1724_v58 = vld [vmem:[%s6432_s17 + $0x39] sm:$0xf] }
 0x463   :  { %v1511_v12 = vadd.f32 %v1508_v11, %v1475_v10  ;;  %v3670_v10 = vld [vmem:[%s6414_s1 + $0x70] sm:$0xff]  ;;  %v3727_v11 = vld [vmem:[%s6414_s1 + $0x138] sm:$0xff] }
 0x464   :  { %1757 = vmatpush.msrb.mxu1 %v3670_v10  ;;  %2118 = vmatpush.msrb.mxu3 %v3727_v11  ;;  %v3757_v11 = vld [vmem:[%s6417_s4 + $0x130] sm:$0xff] }
 0x465   :  { %v1547_v14 = vadd.f32 %v1544_v13, %v1511_v12  ;;  %v3668_v12 = vld [vmem:[%s6414_s1 + $0x60] sm:$0xff]  ;;  %v3725_v13 = vld [vmem:[%s6414_s1 + $0x128] sm:$0xff] }
 0x466   :  { %v1580_v15 = vpop.f32.mrf.mxu3  ;;  %1758 = vmatpush.msrb.mxu1 %v3668_v12  ;;  %2119 = vmatpush.msrb.mxu3 %v3725_v13  ;;  %v2181_v12 = vld [vmem:[%s6417_s4 + $0x80] sm:$0xff]  ;;  %v3756_v13 = vld [vmem:[%s6417_s4 + $0x128] sm:$0xff] }
 0x467   :  { %v1583_v60 = vadd.f32 %v1580_v15, %v1547_v14  ;;  %v5327_v14 = vld [vmem:[%s6432_s17 + $0x38] sm:$0xf]  ;;  %v3666_v15 = vld [vmem:[%s6414_s1 + $0x50] sm:$0xff] }
 0x468   :  { %3679 = vmatmul.msk.f32.gmra.mxu3 %vm79_vm0, %v1724_v58  ;;  %1759 = vmatpush.msrb.mxu1 %v3666_v15 }
 0x469   :  { %v1584_v5 = vmax.f32 %v1583_v60, 0.0  ;;  %v3711_v60 = vld [vmem:[%s6414_s1 + $0xf8] sm:$0xff] }
 0x46b   :  { %v1588_v17 = vsel %vm1587_vm10, %v1584_v5, -inf }
 0x46c   :  { %1589 = vmax.xlane.f32.xlu0 %v1588_v17  ;;  %v3664_v17 = vld [vmem:[%s6414_s1 + $0x40] sm:$0xff] }
 0x46d   :  { %1760 = vmatpush.msrb.mxu1 %v3664_v17 }
 0x46e   :  { %v1791_v56 = vpop.f32.mrf.mxu3 }
 0x4df   :  { %v1590_v23 = vpop.xlane.xlu0 %1589 }
 0x4e0   :  { %vm1591_vm11 = vcmp.eq.f32.partialorder %v1584_v5, %v1590_v23  ;;  %v3723_v5 = vld [vmem:[%s6414_s1 + $0x118] sm:$0xff]  ;;  %v1873_v23 = vld [vmem:[%s6432_s17 + $0x22] sm:$0xff] }
 0x4e1   :  { %v1592_v24 = vsel %vm1591_vm11, %v5179_v22, 120  ;;  %2120 = vmatpush.msrb.mxu3 %v3723_v5 }
 0x4e2   :  { %v1593_v25 = vsel %vm1587_vm10, %v1592_v24, 2147483647  ;;  %v3721_v24 = vld [vmem:[%s6414_s1 + $0x108] sm:$0xff]  ;;  %3700 = vmatmul.msk.f32.vlgmr.msra.gmra.mxu3 %vm79_vm0, %v1873_v23 }
 0x4e3   :  { %v1595_v26 = vshra.s32 %v1593_v25, 16  ;;  %v1594_v39 = vand.u32 65535, %v1593_v25  ;;  %v3707_v25 = vld [vmem:[%s6414_s1 + $0xd8] sm:$0xff]  ;;  %2121 = vmatpush.msrb.mxu3 %v3721_v24 }
 0x4e5   :  { %v1597_v27 = vcvt.s32.f32 %v1595_v26  ;;  %v1596_v20 = vcvt.s32.f32 %v1594_v39  ;;  %v3705_v26 = vld [vmem:[%s6414_s1 + $0xc8] sm:$0xff]  ;;  %v1715_v39 = vld [vmem:[%s6414_s1 + $0x10] sm:$0xff] }
 0x4e6   :  { %1829 = vmatpush.msra.mxu2 %v1715_v39 }
 0x4e7   :  { %1598 = vmin.xlane.f32.xlu0 %v1597_v27 }
 0x4ea   :  { %3701 = vmatmul.msk.f32.gmra.mxu3 %vm79_vm0, %v1874_v28 }
 0x4f2   :  { %3702 = vmatmul.msk.f32.gmra.mxu3 %vm79_vm0, %v1875_v29 }
 0x4fa   :  { %3703 = vmatmul.msk.f32.gmra.mxu3 %vm79_vm0, %v1876_v30 }
 0x502   :  { %3732 = vmatmul.msk.f32.vlgmr.msrb.gmra.mxu3 %vm79_vm0, %v2053_v8 }
 0x50a   :  { %3733 = vmatmul.msk.f32.gmra.mxu3 %vm79_vm0, %v2054_v16 }
 0x512   :  { %3734 = vmatmul.msk.f32.gmra.mxu3 %vm79_vm0, %v2055_v34 }
 0x55a   :  { %v1599_v40 = vpop.xlane.xlu0 %1598 }
 0x55b   :  { %vm1600_vm12 = vcmp.eq.f32.partialorder %v1597_v27, %v1599_v40  ;;  %v1605_v43 = vcvt.f32.s32 %v1599_v40  ;;  %v5363_v27 = vld [vmem:[%s6432_s17 + $0x23] sm:$0xff] }
 0x55c   :  { %v1601_v35 = vsel %vm1600_vm12, %v1596_v20, inf  ;;  %v1713_v40 = vld [vmem:[%s6414_s1] sm:$0xff]  ;;  %v2056_v20 = vld [vmem:[%s6432_s17 + $0x3c] sm:$0xf] }
 0x55d   :  { %1602 = vmin.xlane.f32.xlu1 %v1601_v35  ;;  %v1606_v45 = vshll.u32 %v1605_v43, 16  ;;  %1830 = vmatpush.msra.mxu2 %v1713_v40  ;;  %v3694_v35 = vld [vmem:[%s6414_s1 + $0xb0] sm:$0xff]  ;;  %v1652_v43 = vld [vmem:[%s6426_s13] sm:$0x1] }
 0x55e   :  { %3735 = vmatmul.msk.f32.gmra.mxu3 %vm79_vm0, %v2056_v20 }
 0x5d0   :  { %v1603_v44 = vpop.xlane.xlu1 %1602 }
 0x5d1   :  { %v1604_v46 = vcvt.f32.s32 %v1603_v44 }
 0x5d3   :  { %v1607_v47 = vadd.s32 %v1606_v45, %v1604_v46 }
 0x5d5   :  { %vm1608_vm14 = vcmp.eq.s32.totalorder %v5179_v22, %v1607_v47  ;;  %v3710_v47 = vld [vmem:[%s6414_s1 + $0xf0] sm:$0xff] }
 0x5d6   :  { %v3658_v50 = vsel %vm1608_vm14, 1.0, %v4003_v49 }
 0x5d7   :  { %3659 = vmatmul.msk.f32.vlgmr.msra.gmra.mxu0 %vm1626_vm13, %v3658_v50  ;;  %v3708_v50 = vld [vmem:[%s6414_s1 + $0xe0] sm:$0xff] }
 0x5d8   :  { %2028 = vmatpush.msra.mxu0 %v3711_v60 }
 0x5da   :  { %2029 = vmatpush.msra.mxu0 %v3709_v18 }
 0x5dc   :  { %2030 = vmatpush.msra.mxu0 %v3707_v25 }
 0x5de   :  { %2031 = vmatpush.msra.mxu0 %v3705_v26 }
 0x5df   :  { %3684 = vmatmul.msk.f32.vlgmr.msrb.gmra.mxu0 %vm79_vm0, %v5275_v63 }
 0x5e0   :  { %2238 = vmatpush.msrb.mxu0 %v2185_v62  ;;  %v3752_v62 = vld [vmem:[%s6417_s4 + $0x108] sm:$0xff] }
 0x5e7   :  { %3685 = vmatmul.msk.f32.gmra.mxu0 %vm79_vm0, %v5292_v3 }
 0x5ef   :  { %3686 = vmatmul.msk.f32.gmra.mxu0 %vm79_vm0, %v5303_v32 }
 0x5f7   :  { %3687 = vmatmul.msk.f32.gmra.mxu0 %vm79_vm0, %v5327_v14 }
 0x5ff   :  { %3716 = vmatmul.msk.f32.vlgmr.msra.gmra.mxu0 %vm79_vm0, %v5363_v27 }
 0x607   :  { %3717 = vmatmul.msk.f32.gmra.mxu0 %vm79_vm0, %v5393_v61 }
 0x60f   :  { %3718 = vmatmul.msk.f32.gmra.mxu0 %vm79_vm0, %v5417_v38 }
 0x617   :  { %3719 = vmatmul.msk.f32.gmra.mxu0 %vm79_vm0, %v5440_v9 }
 0x654   :  { %v1647_v7 = vpop.f32.mrf.mxu0 }
 0x655   :  { %3661 = vmatmul.msk.f32.vlgmr.msra.gmra.mxu1 %vm1347_vm7, %v1647_v7  ;;  %v2182_v7 = vld [vmem:[%s6417_s4 + $0x88] sm:$0xff] }
 0x656   :  { %1909 = vmatpush.msra.mxu1 %v3694_v35 }
 0x658   :  { %1910 = vmatpush.msra.mxu1 %v3692_v41 }
 0x65a   :  { %1911 = vmatpush.msra.mxu1 %v3690_v31 }
 0x65c   :  { %1912 = vmatpush.msra.mxu1 %v3688_v42  ;;  %v1861_v57 = vpop.f32.mrf.mxu0 }
 0x65d   :  { %3672 = vmatmul.msk.f32.vlgmr.msrb.gmra.mxu1 %vm79_vm0, %v1721_v21  ;;  %v1794_v21 = vpop.f32.mrf.mxu3  ;;  %v1862_v60 = vadd.f32 %v1861_v57, %v1791_v56  ;;  %v2179_v56 = vld [vmem:[%s6417_s4 + $0x70] sm:$0xff] }
 0x65e   :  { %2089 = vmatpush.msrb.mxu1 %v3726_v4  ;;  %v3753_v57 = vld [vmem:[%s6417_s4 + $0x110] sm:$0xff] }
 0x660   :  { %2090 = vmatpush.msrb.mxu1 %v3724_v51 }
 0x662   :  { %2091 = vmatpush.msrb.mxu1 %v3722_v54  ;;  %v2180_v54 = vld [vmem:[%s6417_s4 + $0x78] sm:$0xff] }
 0x664   :  { %2092 = vmatpush.msrb.mxu1 %v3720_v55  ;;  %v1864_v0 = vpop.f32.mrf.mxu0  ;;  %v3755_v55 = vld [vmem:[%s6417_s4 + $0x120] sm:$0xff] }
 0x665   :  { %3673 = vmatmul.msk.f32.gmra.mxu1 %vm79_vm0, %v1722_v2  ;;  %v1797_v48 = vpop.f32.mrf.mxu3  ;;  %v2184_v2 = vld [vmem:[%s6417_s4 + $0x98] sm:$0xff] }
 0x666   :  { %2239 = vmatpush.msrb.mxu0 %v2184_v2  ;;  %v2175_v2 = vld [vmem:[%s6417_s4 + $0x50] sm:$0xff] }
 0x66d   :  { %3674 = vmatmul.msk.f32.gmra.mxu1 %vm79_vm0, %v1723_v6  ;;  %v1800_v59 = vpop.f32.mrf.mxu3  ;;  %v2183_v6 = vld [vmem:[%s6417_s4 + $0x90] sm:$0xff] }
 0x66e   :  { %2240 = vmatpush.msrb.mxu0 %v2183_v6  ;;  %v2174_v6 = vld [vmem:[%s6417_s4 + $0x48] sm:$0xff] }
 0x670   :  { %2241 = vmatpush.msrb.mxu0 %v2182_v7  ;;  %v2173_v7 = vld [vmem:[%s6417_s4 + $0x40] sm:$0xff] }
 0x672   :  { %2242 = vmatpush.msrb.mxu0 %v2181_v12  ;;  %v3747_v12 = vld [vmem:[%s6417_s4 + $0xe0] sm:$0xff] }
 0x675   :  { %3675 = vmatmul.msk.f32.gmra.mxu1 %vm79_vm0, %v1724_v58  ;;  %v1943_v1 = vpop.f32.mrf.mxu3  ;;  %v3758_v58 = vld [vmem:[%s6417_s4 + $0x138] sm:$0xff] }
 0x676   :  { %v1956_v17 = vadd.f32 %v1943_v1, %v1862_v60  ;;  %v3751_v1 = vld [vmem:[%s6417_s4 + $0x100] sm:$0xff]  ;;  %v2170_v60 = vld [vmem:[%s6417_s4 + $0x28] sm:$0xff] }
 0x67d   :  { %3696 = vmatmul.msk.f32.vlgmr.msra.gmra.mxu1 %vm79_vm0, %v1873_v23  ;;  %v1946_v10 = vpop.f32.mrf.mxu3  ;;  %v5535_v23 = vld [vmem:[%s6415_s2] sm:$0x3] }
 0x67e   :  { %v2146_v25 = vperm.slane %v5535_v23, 1  ;;  %2277 = vmatpush.msra.mxu1 %v3755_v55 }
 0x685   :  { %3697 = vmatmul.msk.f32.gmra.mxu1 %vm79_vm0, %v1874_v28  ;;  %v1865_v28 = vadd.f32 %v1864_v0, %v1794_v21  ;;  %v3754_v21 = vld [vmem:[%s6417_s4 + $0x118] sm:$0xff] }
 0x686   :  { %2278 = vmatpush.msra.mxu1 %v3754_v21  ;;  %v2176_v0 = vld [vmem:[%s6417_s4 + $0x58] sm:$0xff] }
 0x688   :  { %2279 = vmatpush.msra.mxu1 %v3753_v57 }
 0x68a   :  { %2280 = vmatpush.msra.mxu1 %v3752_v62 }
 0x68c   :  { %2281 = vmatpush.msra.mxu1 %v3751_v1 }
 0x68d   :  { %3698 = vmatmul.msk.f32.gmra.mxu1 %vm79_vm0, %v1875_v29 }
 0x695   :  { %3699 = vmatmul.msk.f32.gmra.mxu1 %vm79_vm0, %v1876_v30 }
 0x69d   :  { %3728 = vmatmul.msk.f32.vlgmr.msrb.gmra.mxu1 %vm79_vm0, %v2053_v8 }
 0x6a5   :  { %3729 = vmatmul.msk.f32.gmra.mxu1 %vm79_vm0, %v2054_v16  ;;  %v1958_v16 = vadd.f32 %v1946_v10, %v1865_v28  ;;  %v3748_v10 = vld [vmem:[%s6417_s4 + $0xe8] sm:$0xff]  ;;  %v3742_v28 = vld [vmem:[%s6417_s4 + $0xb8] sm:$0xff] }
 0x6ad   :  { %3730 = vmatmul.msk.f32.gmra.mxu1 %vm79_vm0, %v2055_v34 }
 0x6b5   :  { %3731 = vmatmul.msk.f32.gmra.mxu1 %vm79_vm0, %v2056_v20 }
 0x6d2   :  { %v1676_v44 = vpop.f32.mrf.mxu1 }
 0x6d3   :  { %v1677_v45 = vadd.f32 %v1676_v44, %v1652_v43 }
 0x6d5   :  { %v1679_v46 = vmax.f32 %v1677_v45, 0.0 }
 0x6d7   :  { %3663 = vmatmul.msk.f32.vlgmr.msrb.gmra.mxu2 %vm1347_vm7, %v1679_v46 }
 0x6d8   :  { %1999 = vmatpush.msrb.mxu2 %v3710_v47 }
 0x6da   :  { %2000 = vmatpush.msrb.mxu2 %v3708_v50  ;;  %v5538_v30 = vpop.f32.mrf.mxu1 }
 0x6dc   :  { %2001 = vmatpush.msrb.mxu2 %v3706_v52 }
 0x6de   :  { %2002 = vmatpush.msrb.mxu2 %v3704_v53 }
 0x6df   :  { %3680 = vmatmul.msk.f32.vlgmr.msra.gmra.mxu2 %vm79_vm0, %v5275_v63  ;;  %v3760_v63 = vld [vmem:[%s6417_s4 + $0x148] sm:$0xff] }
 0x6e0   :  { %2317 = vmatpush.msra.mxu3 %v3760_v63  ;;  %2198 = vmatpush.msra.mxu2 %v2180_v54 }
 0x6e2   :  { %2199 = vmatpush.msra.mxu2 %v2179_v56 }
 0x6e7   :  { %3681 = vmatmul.msk.f32.gmra.mxu2 %vm79_vm0, %v5292_v3  ;;  %v3759_v3 = vld [vmem:[%s6417_s4 + $0x140] sm:$0xff] }
 0x6e8   :  { %2318 = vmatpush.msra.mxu3 %v3759_v3  ;;  %v3750_v3 = vld [vmem:[%s6417_s4 + $0xf8] sm:$0xff] }
 0x6e9   :  { %2282 = vmatpush.msra.mxu1 %v3750_v3 }
 0x6ea   :  { %2319 = vmatpush.msra.mxu3 %v3758_v58 }
 0x6ec   :  { %2320 = vmatpush.msra.mxu3 %v3757_v11  ;;  %v2172_v11 = vld [vmem:[%s6417_s4 + $0x38] sm:$0xff] }
 0x6ee   :  { %2321 = vmatpush.msra.mxu3 %v3756_v13  ;;  %v2171_v13 = vld [vmem:[%s6417_s4 + $0x30] sm:$0xff] }
 0x6ef   :  { %3682 = vmatmul.msk.f32.gmra.mxu2 %vm79_vm0, %v5303_v32  ;;  %v1867_v32 = vpop.f32.mrf.mxu0 }
 0x6f0   :  { %v1868_v33 = vadd.f32 %v1867_v32, %v1797_v48  ;;  %v2178_v48 = vld [vmem:[%s6417_s4 + $0x68] sm:$0xff]  ;;  %v3749_v32 = vld [vmem:[%s6417_s4 + $0xf0] sm:$0xff] }
 0x6f1   :  { %2200 = vmatpush.msra.mxu2 %v2178_v48  ;;  %2283 = vmatpush.msra.mxu1 %v3749_v32 }
 0x6f3   :  { %2284 = vmatpush.msra.mxu1 %v3748_v10 }
 0x6f5   :  { %2285 = vmatpush.msra.mxu1 %v3747_v12 }
 0x6f7   :  { %3683 = vmatmul.msk.f32.gmra.mxu2 %vm79_vm0, %v5327_v14  ;;  %v1949_v14 = vpop.f32.mrf.mxu3  ;;  %v1870_v15 = vpop.f32.mrf.mxu0 }
 0x6f8   :  { %v1960_v37 = vadd.f32 %v1949_v14, %v1868_v33  ;;  %v1871_v35 = vadd.f32 %v1870_v15, %v1800_v59  ;;  %v2177_v59 = vld [vmem:[%s6417_s4 + $0x60] sm:$0xff]  ;;  %v3746_v14 = vld [vmem:[%s6417_s4 + $0xd8] sm:$0xff]  ;;  %v3740_v33 = vld [vmem:[%s6417_s4 + $0xa8] sm:$0xff] }
 0x6f9   :  { %2201 = vmatpush.msra.mxu2 %v2177_v59  ;;  %2286 = vmatpush.msra.mxu1 %v3746_v14 }
 0x6fb   :  { %2202 = vmatpush.msra.mxu2 %v2176_v0 }
 0x6fd   :  { %2203 = vmatpush.msra.mxu2 %v2175_v2 }
 0x6ff   :  { %3712 = vmatmul.msk.f32.vlgmr.msrb.gmra.mxu2 %vm79_vm0, %v5363_v27  ;;  %v1952_v5 = vpop.f32.mrf.mxu3  ;;  %v2033_v18 = vpop.f32.mrf.mxu0 }
 0x700   :  { %v2046_v24 = vadd.f32 %v2033_v18, %v1956_v17  ;;  %v1962_v42 = vadd.f32 %v1952_v5, %v1871_v35  ;;  %2204 = vmatpush.msra.mxu2 %v2174_v6  ;;  %v3745_v5 = vld [vmem:[%s6417_s4 + $0xd0] sm:$0xff]  ;;  %v2169_v18 = vld [vmem:[%s6417_s4 + $0x20] sm:$0xff] }
 0x701   :  { %2287 = vmatpush.msra.mxu1 %v3745_v5  ;;  %v2428_v5 = vld [vmem:[%s6418_s5 + $0x90] sm:$0xff] }
 0x702   :  { %2205 = vmatpush.msra.mxu2 %v2173_v7 }
 0x704   :  { %2206 = vmatpush.msra.mxu2 %v2172_v11 }
 0x706   :  { %2207 = vmatpush.msra.mxu2 %v2171_v13 }
 0x707   :  { %3713 = vmatmul.msk.f32.gmra.mxu2 %vm79_vm0, %v5393_v61  ;;  %v2123_v26 = vpop.f32.mrf.mxu3  ;;  %v2036_v61 = vpop.f32.mrf.mxu0 }
 0x708   :  { %v2136_v27 = vadd.f32 %v2123_v26, %v2046_v24  ;;  %v2048_v34 = vadd.f32 %v2036_v61, %v1958_v16  ;;  %2208 = vmatpush.msra.mxu2 %v2170_v60  ;;  %v3744_v24 = vld [vmem:[%s6417_s4 + $0xc8] sm:$0xff]  ;;  %v3743_v26 = vld [vmem:[%s6417_s4 + $0xc0] sm:$0xff]  ;;  %v3741_v16 = vld [vmem:[%s6417_s4 + $0xb0] sm:$0xff] }
 0x709   :  { %2288 = vmatpush.msra.mxu1 %v3744_v24  ;;  %v2426_v24 = vld [vmem:[%s6418_s5 + $0x80] sm:$0xff] }
 0x70a   :  { %v2150_v29 = vadd.f32 %v2146_v25, %v2136_v27  ;;  %2209 = vmatpush.msra.mxu2 %v2169_v18  ;;  %v2167_v27 = vld [vmem:[%s6417_s4 + $0x10] sm:$0xff]  ;;  %v3794_v18 = vld [vmem:[%s6418_s5 + $0x158] sm:$0xf] }
 0x70b   :  { %2289 = vmatpush.msra.mxu1 %v3743_v26 }
 0x70c   :  { %v2158_v8 = vmax.f32 %v2150_v29, 0.0 }
 0x70d   :  { %2290 = vmatpush.msra.mxu1 %v3742_v28  ;;  %v3790_v28 = vld [vmem:[%s6418_s5 + $0x138] sm:$0xff] }
 0x70e   :  { %3736 = vmatmul.msk.f32.vlgmr.msrb.gmra.mxu0 %vm536_vm1, %v2158_v8  ;;  %3761 = vmatmul.msk.f32.vlgmr.msra.gmra.mxu3 %vm536_vm1, %v2158_v8  ;;  %v2166_v8 = vld [vmem:[%s6417_s4 + $0x8] sm:$0xff] }
 0x70f   :  { %3714 = vmatmul.msk.f32.gmra.mxu2 %vm79_vm0, %v5417_v38  ;;  %v2126_v19 = vpop.f32.mrf.mxu3  ;;  %v5542_v38 = vpop.f32.mrf.mxu1  ;;  %2291 = vmatpush.msra.mxu1 %v3741_v16  ;;  %v2420_v16 = vld [vmem:[%s6418_s5 + $0x50] sm:$0xff] }
 0x710   :  { %v2138_v36 = vadd.f32 %v2126_v19, %v2048_v34  ;;  %v2039_v20 = vpop.f32.mrf.mxu0  ;;  %v2165_v19 = vld [vmem:[%s6417_s4] sm:$0xff] }
 0x711   :  { %v2050_v41 = vadd.f32 %v2039_v20, %v1960_v37  ;;  %2292 = vmatpush.msra.mxu1 %v3740_v33  ;;  %v2418_v33 = vld [vmem:[%s6418_s5 + $0x40] sm:$0xff] }
 0x712   :  { %v2152_v39 = vadd.f32 %v2146_v25, %v2138_v36 }
 0x713   :  { %3798 = vmatpush.msk.msrb.mxu1 %vm700_vm2, %v3794_v18  ;;  %v3855_v18 = vld [vmem:[%s6418_s5 + $0x2b0] sm:$0xf] }
 0x714   :  { %v2160_v40 = vmax.f32 %v2152_v39, 0.0 }
 0x716   :  { %3737 = vmatmul.msk.f32.gmra.mxu0 %vm536_vm1, %v2160_v40  ;;  %3762 = vmatmul.msk.f32.gmra.mxu3 %vm536_vm1, %v2160_v40 }
 0x717   :  { %3715 = vmatmul.msk.f32.gmra.mxu2 %vm79_vm0, %v5440_v9  ;;  %v2129_v9 = vpop.f32.mrf.mxu3  ;;  %v5546_v44 = vpop.f32.mrf.mxu1 }
 0x718   :  { %v2140_v31 = vadd.f32 %v2129_v9, %v2050_v41  ;;  %v2042_v46 = vpop.f32.mrf.mxu0  ;;  %v2145_v9 = vperm.slane %v5535_v23, 0 }
 0x719   :  { %v2052_v47 = vadd.f32 %v2042_v46, %v1962_v42 }
 0x71a   :  { %v2154_v43 = vadd.f32 %v2146_v25, %v2140_v31 }
 0x71c   :  { %v2162_v45 = vmax.f32 %v2154_v43, 0.0 }
 0x71e   :  { %3738 = vmatmul.msk.f32.gmra.mxu0 %vm536_vm1, %v2162_v45  ;;  %3763 = vmatmul.msk.f32.gmra.mxu3 %vm536_vm1, %v2162_v45 }
 0x71f   :  { %v2132_v50 = vpop.f32.mrf.mxu3  ;;  %v5550_v51 = vpop.f32.mrf.mxu1 }
 0x720   :  { %v2142_v52 = vadd.f32 %v2132_v50, %v2052_v47 }
 0x722   :  { %v2156_v53 = vadd.f32 %v2146_v25, %v2142_v52  ;;  %v2168_v25 = vld [vmem:[%s6417_s4 + $0x18] sm:$0xff] }
 0x723   :  { %2210 = vmatpush.msra.mxu2 %v2168_v25  ;;  %v3792_v25 = vld [vmem:[%s6418_s5 + $0x148] sm:$0xff] }
 0x724   :  { %v2164_v4 = vmax.f32 %v2156_v53, 0.0  ;;  %2497 = vmatpush.msrb.mxu1 %v3792_v25  ;;  %v3773_v25 = vld [vmem:[%s6418_s5 + $0xb0] sm:$0xff] }
 0x725   :  { %2211 = vmatpush.msra.mxu2 %v2167_v27  ;;  %v2424_v27 = vld [vmem:[%s6418_s5 + $0x70] sm:$0xff] }
 0x726   :  { %3739 = vmatmul.msk.f32.gmra.mxu0 %vm536_vm1, %v2164_v4  ;;  %3764 = vmatmul.msk.f32.gmra.mxu3 %vm536_vm1, %v2164_v4 }
 0x727   :  { %v1914_v63 = vpop.f32.mrf.mxu1  ;;  %2212 = vmatpush.msra.mxu2 %v2166_v8  ;;  %v3788_v8 = vld [vmem:[%s6418_s5 + $0x128] sm:$0xff]  ;;  %2498 = vmatpush.msrb.mxu1 %v3790_v28 }
 0x728   :  { %v3854_v28 = vld [vmem:[%s6418_s5 + $0x2a8] sm:$0xff] }
 0x729   :  { %2213 = vmatpush.msra.mxu2 %v2165_v19  ;;  %2499 = vmatpush.msrb.mxu1 %v3788_v8  ;;  %v3828_v8 = vld [vmem:[%s6418_s5 + $0x208] sm:$0xf] }
 0x72f   :  { %v1917_v15 = vpop.f32.mrf.mxu1 }
 0x737   :  { %v1920_v29 = vpop.f32.mrf.mxu1 }
 0x73f   :  { %v1923_v36 = vpop.f32.mrf.mxu1 }
 0x747   :  { %v2094_v39 = vpop.f32.mrf.mxu1 }
 0x74f   :  { %v2097_v43 = vpop.f32.mrf.mxu1 }
 0x757   :  { %v2100_v54 = vpop.f32.mrf.mxu1 }
 0x75a   :  { %v5596_v58 = vpop.f32.mrf.mxu2 }
 0x75f   :  { %v2103_v0 = vpop.f32.mrf.mxu1 }
 0x762   :  { %v1832_v17 = vpop.f32.mrf.mxu2 }
 0x763   :  { %v1833_v40 = vadd.f32 %v1832_v17, %v5538_v30 }
 0x765   :  { %v1955_v20 = vadd.f32 %v1914_v63, %v1833_v40  ;;  %v2416_v40 = vld [vmem:[%s6418_s5 + $0x30] sm:$0xff] }
 0x76a   :  { %v1835_v61 = vpop.f32.mrf.mxu2 }
 0x76b   :  { %v1836_v31 = vadd.f32 %v1835_v61, %v5542_v38  ;;  %v3786_v61 = vld [vmem:[%s6418_s5 + $0x118] sm:$0xff] }
 0x76c   :  { %2500 = vmatpush.msrb.mxu1 %v3786_v61  ;;  %v3852_v61 = vld [vmem:[%s6418_s5 + $0x298] sm:$0xff] }
 0x76d   :  { %v1957_v46 = vadd.f32 %v1917_v15, %v1836_v31  ;;  %v2430_v15 = vld [vmem:[%s6418_s5 + $0xa0] sm:$0xf] }
 0x76e   :  { %3801 = vmatpush.msk.msrb.mxu3 %vm700_vm2, %v2430_v15  ;;  %v2410_v15 = vld [vmem:[%s6418_s5] sm:$0xff] }
 0x770   :  { %2532 = vmatpush.msrb.mxu3 %v2428_v5  ;;  %v3775_v5 = vld [vmem:[%s6418_s5 + $0xc0] sm:$0xff] }
 0x772   :  { %v1838_v34 = vpop.f32.mrf.mxu2  ;;  %2533 = vmatpush.msrb.mxu3 %v2426_v24  ;;  %v3856_v24 = vld [vmem:[%s6418_s5 + $0x2b8] sm:$0xf] }
 0x773   :  { %v1839_v53 = vadd.f32 %v1838_v34, %v5546_v44  ;;  %v3784_v34 = vld [vmem:[%s6418_s5 + $0x108] sm:$0xff] }
 0x774   :  { %2534 = vmatpush.msrb.mxu3 %v2424_v27  ;;  %2501 = vmatpush.msrb.mxu1 %v3784_v34  ;;  %v3853_v27 = vld [vmem:[%s6418_s5 + $0x2a0] sm:$0xff] }
 0x775   :  { %v1959_v55 = vadd.f32 %v1920_v29, %v1839_v53  ;;  %v2422_v29 = vld [vmem:[%s6418_s5 + $0x60] sm:$0xff] }
 0x776   :  { %2535 = vmatpush.msrb.mxu3 %v2422_v29  ;;  %v2339_v53 = vld [vmem:[%s6416_s3] sm:$0xff] }
 0x777   :  { %v3827_v29 = vld [vmem:[%s6418_s5 + $0x200] sm:$0xf] }
 0x778   :  { %2536 = vmatpush.msrb.mxu3 %v2420_v16  ;;  %v3851_v16 = vld [vmem:[%s6418_s5 + $0x290] sm:$0xff]  ;;  %v3849_v34 = vld [vmem:[%s6418_s5 + $0x280] sm:$0xff] }
 0x77a   :  { %v1841_v37 = vpop.f32.mrf.mxu2  ;;  %2537 = vmatpush.msrb.mxu3 %v2418_v33  ;;  %v3826_v33 = vld [vmem:[%s6418_s5 + $0x1f8] sm:$0xff] }
 0x77b   :  { %v1842_v38 = vadd.f32 %v1841_v37, %v5550_v51 }
 0x77c   :  { %2538 = vmatpush.msrb.mxu3 %v2416_v40  ;;  %v3847_v40 = vld [vmem:[%s6418_s5 + $0x270] sm:$0xff] }
 0x77d   :  { %v1961_v59 = vadd.f32 %v1923_v36, %v1842_v38  ;;  %v2425_v38 = vld [vmem:[%s6418_s5 + $0x78] sm:$0xff] }
 0x782   :  { %v2004_v35 = vpop.f32.mrf.mxu2 }
 0x783   :  { %v2045_v41 = vadd.f32 %v2004_v35, %v1955_v20 }
 0x785   :  { %v2135_v42 = vadd.f32 %v2094_v39, %v2045_v41 }
 0x787   :  { %v2149_v45 = vadd.f32 %v2145_v9, %v2135_v42 }
 0x789   :  { %v2157_v47 = vmax.f32 %v2149_v45, 0.0 }
 0x78a   :  { %v2007_v50 = vpop.f32.mrf.mxu2 }
 0x78b   :  { %v2047_v52 = vadd.f32 %v2007_v50, %v1957_v46  ;;  %2214 = vmatmul.f32.vlgmr.msra.gmra.mxu2 %v2157_v47  ;;  %2293 = vmatmul.f32.vlgmr.msra.gmra.mxu1 %v2157_v47  ;;  %v2244_v6 = vpop.f32.mrf.mxu0 }
 0x78d   :  { %v2137_v4 = vadd.f32 %v2097_v43, %v2047_v52 }
 0x78f   :  { %v2151_v30 = vadd.f32 %v2145_v9, %v2137_v4  ;;  %v3768_v4 = vld [vmem:[%s6416_s3 + $0x10] sm:$0xff] }
 0x791   :  { %v2159_v56 = vmax.f32 %v2151_v30, 0.0  ;;  %v2323_v32 = vpop.f32.mrf.mxu3  ;;  %v2431_v30 = vld [vmem:[%s6418_s5 + $0xa8] sm:$0xf] }
 0x792   :  { %v2010_v21 = vpop.f32.mrf.mxu2 }
 0x793   :  { %v2049_v23 = vadd.f32 %v2010_v21, %v1959_v55  ;;  %2217 = vmatmul.f32.gmra.mxu2 %v2159_v56  ;;  %2296 = vmatmul.f32.gmra.mxu1 %v2159_v56  ;;  %v2247_v51 = vpop.f32.mrf.mxu0  ;;  %v2429_v55 = vld [vmem:[%s6418_s5 + $0x98] sm:$0xff]  ;;  %v3791_v56 = vld [vmem:[%s6418_s5 + $0x140] sm:$0xff]  ;;  %v2427_v21 = vld [vmem:[%s6418_s5 + $0x88] sm:$0xff] }
 0x795   :  { %v2139_v48 = vadd.f32 %v2100_v54, %v2049_v23  ;;  %v3793_v54 = vld [vmem:[%s6418_s5 + $0x150] sm:$0xf] }
 0x796   :  { %v3789_v23 = vld [vmem:[%s6418_s5 + $0x130] sm:$0xff] }
 0x797   :  { %v2153_v57 = vadd.f32 %v2145_v9, %v2139_v48  ;;  %v3787_v48 = vld [vmem:[%s6418_s5 + $0x120] sm:$0xff] }
 0x799   :  { %v2161_v62 = vmax.f32 %v2153_v57, 0.0  ;;  %v2326_v12 = vpop.f32.mrf.mxu3  ;;  %v2340_v57 = vld [vmem:[%s6416_s3 + $0x8] sm:$0x3f] }
 0x79a   :  { %v2013_v63 = vpop.f32.mrf.mxu2 }
 0x79b   :  { %v2051_v1 = vadd.f32 %v2013_v63, %v1961_v59  ;;  %2220 = vmatmul.f32.gmra.mxu2 %v2161_v62  ;;  %2299 = vmatmul.f32.gmra.mxu1 %v2161_v62  ;;  %v2250_v60 = vpop.f32.mrf.mxu0  ;;  %v3769_v59 = vld [vmem:[%s6416_s3 + $0x18] sm:$0x3f]  ;;  %v2423_v62 = vld [vmem:[%s6418_s5 + $0x68] sm:$0xff]  ;;  %v3785_v63 = vld [vmem:[%s6418_s5 + $0x110] sm:$0xff] }
 0x79d   :  { %v2141_v44 = vadd.f32 %v2103_v0, %v2051_v1  ;;  %v2421_v0 = vld [vmem:[%s6418_s5 + $0x58] sm:$0xff]  ;;  %v3783_v1 = vld [vmem:[%s6418_s5 + $0x100] sm:$0xff] }
 0x79f   :  { %v2155_v2 = vadd.f32 %v2145_v9, %v2141_v44  ;;  %v2419_v44 = vld [vmem:[%s6418_s5 + $0x48] sm:$0xff] }
 0x7a1   :  { %v2163_v3 = vmax.f32 %v2155_v2, 0.0  ;;  %v2329_v17 = vpop.f32.mrf.mxu3  ;;  %v2417_v2 = vld [vmem:[%s6418_s5 + $0x38] sm:$0xff] }
 0x7a3   :  { %2223 = vmatmul.f32.gmra.mxu2 %v2163_v3  ;;  %2302 = vmatmul.f32.gmra.mxu1 %v2163_v3  ;;  %v2253_v36 = vpop.f32.mrf.mxu0  ;;  %v3781_v3 = vld [vmem:[%s6418_s5 + $0xf0] sm:$0xff] }
 0x7a9   :  { %v2332_v37 = vpop.f32.mrf.mxu3 }
 0x808   :  { %v2294_v7 = vpop.f32.mrf.mxu1 }
 0x809   :  { %v2324_v47 = vadd.f32 %v2323_v32, %v2294_v7  ;;  %v2414_v32 = vld [vmem:[%s6418_s5 + $0x20] sm:$0xff]  ;;  %v2415_v7 = vld [vmem:[%s6418_s5 + $0x28] sm:$0xff] }
 0x80a   :  { %2539 = vmatpush.msrb.mxu3 %v2414_v32 }
 0x80e   :  { %v2215_v10 = vpop.f32.mrf.mxu2 }
 0x80f   :  { %v2245_v43 = vadd.f32 %v2244_v6, %v2215_v10  ;;  %v3782_v6 = vld [vmem:[%s6418_s5 + $0xf8] sm:$0xff]  ;;  %v3779_v10 = vld [vmem:[%s6418_s5 + $0xe0] sm:$0xff] }
 0x810   :  { %v2297_v11 = vpop.f32.mrf.mxu1  ;;  %2502 = vmatpush.msrb.mxu1 %v3782_v6 }
 0x811   :  { %v2327_v45 = vadd.f32 %v2326_v12, %v2297_v11  ;;  %v2335_v52 = vmax.f32 %v2245_v43, %v2324_v47  ;;  %v3780_v11 = vld [vmem:[%s6418_s5 + $0xe8] sm:$0xff]  ;;  %v2413_v12 = vld [vmem:[%s6418_s5 + $0x18] sm:$0xff]  ;;  %v3817_v47 = vld [vmem:[%s6418_s5 + $0x1b0] sm:$0xff] }
 0x812   :  { %2503 = vmatpush.msrb.mxu1 %v3780_v11  ;;  %v3820_v43 = vld [vmem:[%s6418_s5 + $0x1c8] sm:$0xff] }
 0x816   :  { %v2218_v13 = vpop.f32.mrf.mxu2 }
 0x817   :  { %v2248_v9 = vadd.f32 %v2247_v51, %v2218_v13  ;;  %v2412_v51 = vld [vmem:[%s6418_s5 + $0x10] sm:$0xff] }
 0x818   :  { %v2300_v14 = vpop.f32.mrf.mxu1  ;;  %v3777_v13 = vld [vmem:[%s6418_s5 + $0xd0] sm:$0xff]  ;;  %2540 = vmatpush.msrb.mxu3 %v2412_v51  ;;  %v3883_v51 = vld [vmem:[%s6418_s5 + $0x360] sm:$0xf] }
 0x819   :  { %v2330_v31 = vadd.f32 %v2329_v17, %v2300_v14  ;;  %v2336_v50 = vmax.f32 %v2248_v9, %v2327_v45  ;;  %v3778_v14 = vld [vmem:[%s6418_s5 + $0xd8] sm:$0xff]  ;;  %v3776_v17 = vld [vmem:[%s6418_s5 + $0xc8] sm:$0xff]  ;;  %v3845_v9 = vld [vmem:[%s6418_s5 + $0x260] sm:$0xff] }
 0x81a   :  { %2504 = vmatpush.msrb.mxu1 %v3778_v14  ;;  %2541 = vmatpush.msrb.mxu3 %v2410_v15  ;;  %v3843_v45 = vld [vmem:[%s6418_s5 + $0x250] sm:$0xff]  ;;  %v3884_v14 = vld [vmem:[%s6418_s5 + $0x368] sm:$0xf] }
 0x81b   :  { %v3881_v15 = vld [vmem:[%s6418_s5 + $0x350] sm:$0xff] }
 0x81c   :  { %2505 = vmatpush.msrb.mxu1 %v3776_v17  ;;  %3857 = vmatpush.msk.msra.mxu3 %vm700_vm2, %v3855_v18  ;;  %v3880_v17 = vld [vmem:[%s6418_s5 + $0x348] sm:$0xff] }
 0x81e   :  { %v2221_v26 = vpop.f32.mrf.mxu2  ;;  %2700 = vmatpush.msra.mxu3 %v3853_v27  ;;  %v3875_v27 = vld [vmem:[%s6418_s5 + $0x320] sm:$0xff] }
 0x81f   :  { %v2251_v20 = vadd.f32 %v2250_v60, %v2221_v26  ;;  %v2411_v60 = vld [vmem:[%s6418_s5 + $0x8] sm:$0xff]  ;;  %v3774_v26 = vld [vmem:[%s6418_s5 + $0xb8] sm:$0xff] }
 0x820   :  { %v2303_v19 = vpop.f32.mrf.mxu1  ;;  %2506 = vmatpush.msrb.mxu1 %v3774_v26  ;;  %2701 = vmatpush.msra.mxu3 %v3851_v16 }
 0x821   :  { %v2333_v35 = vadd.f32 %v2332_v37, %v2303_v19  ;;  %v2337_v46 = vmax.f32 %v2251_v20, %v2330_v31  ;;  %v3825_v19 = vld [vmem:[%s6418_s5 + $0x1f0] sm:$0xff]  ;;  %v3823_v37 = vld [vmem:[%s6418_s5 + $0x1e0] sm:$0xff]  ;;  %v3848_v20 = vld [vmem:[%s6418_s5 + $0x278] sm:$0xff] }
 0x822   :  { %3832 = vmatpush.msk.msra.mxu1 %vm700_vm2, %v3828_v8  ;;  %2702 = vmatpush.msra.mxu3 %v3849_v34  ;;  %v3846_v31 = vld [vmem:[%s6418_s5 + $0x268] sm:$0xff]  ;;  %v3874_v8 = vld [vmem:[%s6418_s5 + $0x318] sm:$0xff]  ;;  %v3869_v34 = vld [vmem:[%s6418_s5 + $0x2f0] sm:$0xff] }
 0x824   :  { %2637 = vmatpush.msra.mxu1 %v3826_v33  ;;  %2703 = vmatpush.msra.mxu3 %v3847_v40  ;;  %v3865_v40 = vld [vmem:[%s6418_s5 + $0x2d0] sm:$0xff] }
 0x826   :  { %v2224_v39 = vpop.f32.mrf.mxu2  ;;  %2704 = vmatpush.msra.mxu3 %v3845_v9  ;;  %v3864_v9 = vld [vmem:[%s6418_s5 + $0x2c8] sm:$0xff] }
 0x827   :  { %v2254_v41 = vadd.f32 %v2253_v36, %v2224_v39  ;;  %v3850_v36 = vld [vmem:[%s6418_s5 + $0x288] sm:$0xff] }
 0x828   :  { %v3824_v39 = vld [vmem:[%s6418_s5 + $0x1e8] sm:$0xff]  ;;  %2705 = vmatpush.msra.mxu3 %v3843_v45  ;;  %v3908_v45 = vld [vmem:[%s6421_s8 + $0x118] sm:$0xff] }
 0x829   :  { %v2338_v42 = vmax.f32 %v2254_v41, %v2333_v35  ;;  %v3821_v35 = vld [vmem:[%s6418_s5 + $0x1d0] sm:$0xff]  ;;  %v3822_v41 = vld [vmem:[%s6418_s5 + $0x1d8] sm:$0xff]  ;;  %2638 = vmatpush.msra.mxu1 %v3824_v39  ;;  %v3868_v39 = vld [vmem:[%s6418_s5 + $0x2e8] sm:$0xff] }
 0x82b   :  { %3765 = vmatpush.msk.msrb.mxu2 %vm700_vm2, %v2338_v42  ;;  %3770 = vmatpush.msk.msra.mxu0 %vm700_vm2, %v2338_v42  ;;  %v3819_v42 = vld [vmem:[%s6418_s5 + $0x1c0] sm:$0xff] }
 0x82c   :  { %2639 = vmatpush.msra.mxu1 %v3822_v41  ;;  %v3863_v41 = vld [vmem:[%s6418_s5 + $0x2c0] sm:$0xff] }
 0x82d   :  { %2363 = vmatpush.msrb.mxu2 %v2337_v46  ;;  %2394 = vmatpush.msra.mxu0 %v2337_v46  ;;  %v3844_v46 = vld [vmem:[%s6418_s5 + $0x258] sm:$0xff] }
 0x82e   :  { %2640 = vmatpush.msra.mxu1 %v3820_v43  ;;  %v2859_v43 = vld [vmem:[%s6421_s8 + $0x78] sm:$0xff] }
 0x82f   :  { %2364 = vmatpush.msrb.mxu2 %v2336_v50  ;;  %2395 = vmatpush.msra.mxu0 %v2336_v50  ;;  %v3818_v50 = vld [vmem:[%s6418_s5 + $0x1b8] sm:$0xff] }
 0x830   :  { %2641 = vmatpush.msra.mxu1 %v3818_v50  ;;  %v2857_v50 = vld [vmem:[%s6421_s8 + $0x68] sm:$0xff] }
 0x831   :  { %2365 = vmatpush.msrb.mxu2 %v2335_v52  ;;  %2396 = vmatpush.msra.mxu0 %v2335_v52  ;;  %v3841_v52 = vld [vmem:[%s6418_s5 + $0x240] sm:$0xff] }
 0x832   :  { %3766 = vmatmul.msk.f32.vlgmr.msrb.gmra.mxu2 %vm693_vm3, %v2339_v53  ;;  %3771 = vmatmul.msk.f32.vlgmr.msra.gmra.mxu0 %vm693_vm3, %v3768_v4  ;;  %v3842_v53 = vld [vmem:[%s6418_s5 + $0x248] sm:$0xff]  ;;  %v3815_v4 = vld [vmem:[%s6418_s5 + $0x1a0] sm:$0xff] }
 0x833   :  { %3804 = vmatpush.msk.msrb.mxu0 %vm700_vm2, %v2431_v30  ;;  %3795 = vmatpush.msk.msra.mxu2 %vm700_vm2, %v3793_v54  ;;  %v3816_v30 = vld [vmem:[%s6418_s5 + $0x1a8] sm:$0xff]  ;;  %v3839_v54 = vld [vmem:[%s6418_s5 + $0x230] sm:$0xff] }
 0x834   :  { %2706 = vmatpush.msra.mxu3 %v3841_v52  ;;  %2642 = vmatpush.msra.mxu1 %v3816_v30  ;;  %v3906_v52 = vld [vmem:[%s6421_s8 + $0x108] sm:$0xff]  ;;  %v2855_v30 = vld [vmem:[%s6421_s8 + $0x58] sm:$0xff] }
 0x835   :  { %2555 = vmatpush.msrb.mxu0 %v2429_v55  ;;  %2474 = vmatpush.msra.mxu2 %v3791_v56  ;;  %v3840_v55 = vld [vmem:[%s6418_s5 + $0x238] sm:$0xff]  ;;  %v3813_v56 = vld [vmem:[%s6418_s5 + $0x190] sm:$0xff] }
 0x836   :  { %2707 = vmatpush.msra.mxu3 %v3839_v54  ;;  %v3904_v54 = vld [vmem:[%s6421_s8 + $0xf8] sm:$0xff] }
 0x837   :  { %2556 = vmatpush.msrb.mxu0 %v2427_v21  ;;  %2475 = vmatpush.msra.mxu2 %v3789_v23  ;;  %v3814_v21 = vld [vmem:[%s6418_s5 + $0x198] sm:$0xff]  ;;  %v3837_v23 = vld [vmem:[%s6418_s5 + $0x220] sm:$0xff] }
 0x838   :  { %2643 = vmatpush.msra.mxu1 %v3814_v21  ;;  %2708 = vmatpush.msra.mxu3 %v3837_v23  ;;  %v2853_v21 = vld [vmem:[%s6421_s8 + $0x48] sm:$0xff] }
 0x839   :  { %2557 = vmatpush.msrb.mxu0 %v2425_v38  ;;  %2476 = vmatpush.msra.mxu2 %v3787_v48  ;;  %v3838_v38 = vld [vmem:[%s6418_s5 + $0x228] sm:$0xff]  ;;  %v3811_v48 = vld [vmem:[%s6418_s5 + $0x180] sm:$0xff] }
 0x83a   :  { %3767 = vmatmul.msk.f32.gmra.mxu2 %vm693_vm3, %v2340_v57  ;;  %3772 = vmatmul.msk.f32.gmra.mxu0 %vm693_vm3, %v3769_v59  ;;  %v3812_v57 = vld [vmem:[%s6418_s5 + $0x188] sm:$0xff]  ;;  %v3835_v59 = vld [vmem:[%s6418_s5 + $0x210] sm:$0xff]  ;;  %vm3339_vm3 = vcmask 74752  }
 0x83b   :  { %2558 = vmatpush.msrb.mxu0 %v2423_v62  ;;  %2477 = vmatpush.msra.mxu2 %v3785_v63  ;;  %v3836_v62 = vld [vmem:[%s6418_s5 + $0x218] sm:$0xff]  ;;  %v3809_v63 = vld [vmem:[%s6418_s5 + $0x170] sm:$0xff]  ;;  %v3902_v23 = vld [vmem:[%s6421_s8 + $0xe8] sm:$0xff] }
 0x83c   :  { %2644 = vmatpush.msra.mxu1 %v3812_v57  ;;  %2709 = vmatpush.msra.mxu3 %v3835_v59  ;;  %v2851_v57 = vld [vmem:[%s6421_s8 + $0x38] sm:$0xff] }
 0x83d   :  { %2559 = vmatpush.msrb.mxu0 %v2421_v0  ;;  %2478 = vmatpush.msra.mxu2 %v3783_v1  ;;  %v3810_v0 = vld [vmem:[%s6418_s5 + $0x178] sm:$0xff] }
 0x83e   :  { %2645 = vmatpush.msra.mxu1 %v3810_v0  ;;  %v3900_v59 = vld [vmem:[%s6421_s8 + $0xd8] sm:$0xff] }
 0x83f   :  { %2560 = vmatpush.msrb.mxu0 %v2419_v44  ;;  %2479 = vmatpush.msra.mxu2 %v3781_v3  ;;  %v3807_v44 = vld [vmem:[%s6418_s5 + $0x160] sm:$0xff]  ;;  %v2863_v0 = vld [vmem:[%s6421_s8 + $0x98] sm:$0xff] }
 0x841   :  { %2561 = vmatpush.msrb.mxu0 %v2417_v2  ;;  %2480 = vmatpush.msra.mxu2 %v3779_v10  ;;  %v3808_v2 = vld [vmem:[%s6418_s5 + $0x168] sm:$0xff] }
 0x842   :  { %2646 = vmatpush.msra.mxu1 %v3808_v2  ;;  %v2862_v2 = vld [vmem:[%s6421_s8 + $0x90] sm:$0xff] }
 0x843   :  { %2562 = vmatpush.msrb.mxu0 %v2415_v7  ;;  %2481 = vmatpush.msra.mxu2 %v3777_v13 }
 0x845   :  { %2563 = vmatpush.msrb.mxu0 %v2413_v12  ;;  %2482 = vmatpush.msra.mxu2 %v3775_v5  ;;  %v3879_v5 = vld [vmem:[%s6418_s5 + $0x340] sm:$0xff] }
 0x847   :  { %2564 = vmatpush.msrb.mxu0 %v2411_v60  ;;  %2483 = vmatpush.msra.mxu2 %v3773_v25  ;;  %v3882_v60 = vld [vmem:[%s6418_s5 + $0x358] sm:$0xff] }
 0x848   :  { %v3878_v25 = vld [vmem:[%s6418_s5 + $0x338] sm:$0xff] }
 0x849   :  { %3860 = vmatpush.msk.msra.mxu0 %vm700_vm2, %v3856_v24  ;;  %3829 = vmatpush.msk.msrb.mxu2 %vm700_vm2, %v3827_v29  ;;  %v3877_v24 = vld [vmem:[%s6418_s5 + $0x330] sm:$0xff] }
 0x84a   :  { %v3873_v29 = vld [vmem:[%s6418_s5 + $0x310] sm:$0xff] }
 0x84b   :  { %2723 = vmatpush.msra.mxu0 %v3854_v28  ;;  %2614 = vmatpush.msrb.mxu2 %v3825_v19  ;;  %v3876_v28 = vld [vmem:[%s6418_s5 + $0x328] sm:$0xff] }
 0x84c   :  { %v3872_v19 = vld [vmem:[%s6418_s5 + $0x308] sm:$0xff] }
 0x84d   :  { %2724 = vmatpush.msra.mxu0 %v3852_v61  ;;  %2615 = vmatpush.msrb.mxu2 %v3823_v37  ;;  %v3871_v61 = vld [vmem:[%s6418_s5 + $0x300] sm:$0xff] }
 0x84e   :  { %v3867_v37 = vld [vmem:[%s6418_s5 + $0x2e0] sm:$0xff] }
 0x84f   :  { %2725 = vmatpush.msra.mxu0 %v3850_v36  ;;  %2616 = vmatpush.msrb.mxu2 %v3821_v35  ;;  %v3870_v36 = vld [vmem:[%s6418_s5 + $0x2f8] sm:$0xff] }
 0x851   :  { %2726 = vmatpush.msra.mxu0 %v3848_v20  ;;  %2617 = vmatpush.msrb.mxu2 %v3819_v42  ;;  %v3866_v20 = vld [vmem:[%s6418_s5 + $0x2d8] sm:$0xff] }
 0x853   :  { %2727 = vmatpush.msra.mxu0 %v3846_v31  ;;  %2618 = vmatpush.msrb.mxu2 %v3817_v47  ;;  %v3907_v47 = vld [vmem:[%s6421_s8 + $0x110] sm:$0xff] }
 0x855   :  { %2728 = vmatpush.msra.mxu0 %v3844_v46  ;;  %2619 = vmatpush.msrb.mxu2 %v3815_v4  ;;  %v2858_v46 = vld [vmem:[%s6421_s8 + $0x70] sm:$0xff]  ;;  %v3905_v4 = vld [vmem:[%s6421_s8 + $0x100] sm:$0xff] }
 0x857   :  { %2729 = vmatpush.msra.mxu0 %v3842_v53  ;;  %2620 = vmatpush.msrb.mxu2 %v3813_v56  ;;  %v2856_v53 = vld [vmem:[%s6421_s8 + $0x60] sm:$0xff]  ;;  %v3903_v56 = vld [vmem:[%s6421_s8 + $0xf0] sm:$0xff] }
 0x859   :  { %2730 = vmatpush.msra.mxu0 %v3840_v55  ;;  %2621 = vmatpush.msrb.mxu2 %v3811_v48  ;;  %v2854_v55 = vld [vmem:[%s6421_s8 + $0x50] sm:$0xff]  ;;  %v3901_v48 = vld [vmem:[%s6421_s8 + $0xe0] sm:$0xff] }
 0x85b   :  { %2731 = vmatpush.msra.mxu0 %v3838_v38  ;;  %2622 = vmatpush.msrb.mxu2 %v3809_v63  ;;  %v2852_v38 = vld [vmem:[%s6421_s8 + $0x40] sm:$0xff]  ;;  %v2850_v63 = vld [vmem:[%s6421_s8 + $0x30] sm:$0xff] }
 0x85d   :  { %2732 = vmatpush.msra.mxu0 %v3836_v62  ;;  %2623 = vmatpush.msrb.mxu2 %v3807_v44  ;;  %v2849_v44 = vld [vmem:[%s6421_s8 + $0x28] sm:$0xff] }
 0x8af   :  { %v2398_v1 = vpop.f32.mrf.mxu0 }
 0x8b5   :  { %v2367_v3 = vpop.f32.mrf.mxu2 }
 0x8b6   :  { %v2404_v6 = vmax.f32 %v2367_v3, %v2398_v1  ;;  %v3899_v1 = vld [vmem:[%s6421_s8 + $0xd0] sm:$0xff]  ;;  %v3898_v3 = vld [vmem:[%s6421_s8 + $0xc8] sm:$0xff] }
 0x8b7   :  { %v2401_v32 = vpop.f32.mrf.mxu0 }
 0x8b8   :  { %2406 = vst.msk [vmem:[#allocation3] sm:$0xff] %vm761_vm4, %v2404_v6  ;;  %v2848_v6 = vld [vmem:[%s6421_s8 + $0x20] sm:$0xff] }
 0x8bd   :  { %v2370_v7 = vpop.f32.mrf.mxu2 }
 0x8be   :  { %v2405_v10 = vmax.f32 %v2370_v7, %v2401_v32  ;;  %v2861_v32 = vld [vmem:[%s6421_s8 + $0x88] sm:$0xff]  ;;  %v3897_v7 = vld [vmem:[%s6421_s8 + $0xc0] sm:$0xff] }
 0x8bf   :  { %v2408_v11 = vld [vmem:[#allocation3] sm:$0xff] }
 0x8c0   :  { %2407 = vst.msk [vmem:[#allocation3 + $0x8] sm:$0x3f] %vm763_vm5, %v2405_v10  ;;  %3802 = vmatmul.msk.f32.vlgmr.msrb.gmra.mxu3 %vm761_vm4, %v2408_v11  ;;  %3805 = vmatmul.msk.f32.vlgmr.msrb.gmra.mxu0 %vm761_vm4, %v2408_v11  ;;  %v2847_v11 = vld [vmem:[%s6421_s8 + $0x18] sm:$0xff] }
 0x8c1   :  { %2870 = vmatpush.msrb.mxu3 %v2859_v43  ;;  %2905 = vmatpush.msrb.mxu0 %v2863_v0 }
 0x8c3   :  { %2871 = vmatpush.msrb.mxu3 %v2858_v46  ;;  %2906 = vmatpush.msrb.mxu0 %v2862_v2 }
 0x8c5   :  { %2872 = vmatpush.msrb.mxu3 %v2857_v50  ;;  %2907 = vmatpush.msrb.mxu0 %v2861_v32 }
 0x8c7   :  { %v2432_v12 = vld [vmem:[#allocation3 + $0x1] sm:$0xff]  ;;  %v2433_v18 = vld [vmem:[#allocation3 + $0x9] sm:$0x3]  ;;  %v2659_v33 = vld [vmem:[#allocation3 + $0xb] sm:$0x3]  ;;  %2873 = vmatpush.msrb.mxu3 %v2856_v53 }
 0x8c8   :  { %v2409_v13 = vld [vmem:[#allocation3 + $0x8] sm:$0x3]  ;;  %3796 = vmatmul.msk.f32.vlgmr.msra.gmra.mxu2 %vm761_vm4, %v2432_v12  ;;  %3799 = vmatmul.msk.f32.vlgmr.msrb.gmra.mxu1 %vm761_vm4, %v2432_v12  ;;  %v2573_v35 = vld [vmem:[#allocation3 + $0xa] sm:$0x3]  ;;  %v2745_v42 = vld [vmem:[#allocation3 + $0xc] sm:$0x3] }
 0x8c9   :  { %3803 = vmatmul.msk.f32.gmra.mxu3 %vm761_vm4, %v2409_v13  ;;  %3806 = vmatmul.msk.f32.gmra.mxu0 %vm761_vm4, %v2409_v13  ;;  %v2658_v26 = vld [vmem:[#allocation3 + $0x3] sm:$0xff] }
 0x8ca   :  { %3885 = vmatpush.msk.msra.mxu2 %vm700_vm2, %v3883_v51  ;;  %3888 = vmatpush.msk.msrb.mxu1 %vm700_vm2, %v3884_v14  ;;  %v2572_v16 = vld [vmem:[#allocation3 + $0x2] sm:$0xff]  ;;  %v2860_v51 = vld [vmem:[%s6421_s8 + $0x80] sm:$0xff]  ;;  %vm3337_vm2 = vcmask 1040384  }
 0x8cb   :  { %v2744_v31 = vld [vmem:[#allocation3 + $0x4] sm:$0xff]  ;;  %2874 = vmatpush.msrb.mxu3 %v2855_v30  ;;  %2908 = vmatpush.msrb.mxu0 %v2860_v51 }
 0x8cc   :  { %2786 = vmatpush.msra.mxu2 %v3881_v15  ;;  %2809 = vmatpush.msrb.mxu1 %v3882_v60  ;;  %v3896_v12 = vld [vmem:[%s6421_s8 + $0xb8] sm:$0xff]  ;;  %v2846_v15 = vld [vmem:[%s6421_s8 + $0x10] sm:$0xff] }
 0x8cd   :  { %2875 = vmatpush.msrb.mxu3 %v2854_v55  ;;  %v3895_v60 = vld [vmem:[%s6421_s8 + $0xb0] sm:$0xff]  ;;  %v3046_v51 = vld [vmem:[%s6422_s9 + $0x38] sm:$0xff] }
 0x8ce   :  { %2787 = vmatpush.msra.mxu2 %v3879_v5  ;;  %2810 = vmatpush.msrb.mxu1 %v3880_v17  ;;  %v2845_v5 = vld [vmem:[%s6421_s8 + $0x8] sm:$0xff] }
 0x8cf   :  { %2876 = vmatpush.msrb.mxu3 %v2853_v21  ;;  %v3894_v17 = vld [vmem:[%s6421_s8 + $0xa8] sm:$0xff] }
 0x8d0   :  { %3797 = vmatmul.msk.f32.gmra.mxu2 %vm761_vm4, %v2433_v18  ;;  %3800 = vmatmul.msk.f32.gmra.mxu1 %vm761_vm4, %v2433_v18  ;;  %v2844_v18 = vld [vmem:[%s6421_s8] sm:$0xff] }
 0x8d1   :  { %3858 = vmatmul.msk.f32.vlgmr.msra.gmra.mxu3 %vm761_vm4, %v2658_v26  ;;  %3861 = vmatmul.msk.f32.vlgmr.msra.gmra.mxu0 %vm761_vm4, %v2658_v26 }
 0x8d2   :  { %2788 = vmatpush.msra.mxu2 %v3877_v24  ;;  %2811 = vmatpush.msrb.mxu1 %v3878_v25  ;;  %v3893_v24 = vld [vmem:[%s6421_s8 + $0xa0] sm:$0xff] }
 0x8d3   :  { %2877 = vmatpush.msrb.mxu3 %v2852_v38 }
 0x8d4   :  { %2789 = vmatpush.msra.mxu2 %v3875_v27  ;;  %2812 = vmatpush.msrb.mxu1 %v3876_v28  ;;  %v3912_v28 = vld [vmem:[%s6421_s8 + $0x138] sm:$0xff] }
 0x8d5   :  { %2878 = vmatpush.msrb.mxu3 %v2851_v57  ;;  %2971 = vmatpush.msra.mxu0 %v3912_v28 }
 0x8d6   :  { %2790 = vmatpush.msra.mxu2 %v3873_v29  ;;  %2813 = vmatpush.msrb.mxu1 %v3874_v8  ;;  %v3911_v8 = vld [vmem:[%s6421_s8 + $0x130] sm:$0xff] }
 0x8d7   :  { %2879 = vmatpush.msrb.mxu3 %v2850_v63  ;;  %2972 = vmatpush.msra.mxu0 %v3911_v8 }
 0x8d8   :  { %3830 = vmatmul.msk.f32.vlgmr.msrb.gmra.mxu2 %vm761_vm4, %v2572_v16  ;;  %3833 = vmatmul.msk.f32.vlgmr.msra.gmra.mxu1 %vm761_vm4, %v2572_v16  ;;  %v3910_v16 = vld [vmem:[%s6421_s8 + $0x128] sm:$0xff] }
 0x8d9   :  { %3859 = vmatmul.msk.f32.gmra.mxu3 %vm761_vm4, %v2659_v33  ;;  %3862 = vmatmul.msk.f32.gmra.mxu0 %vm761_vm4, %v2659_v33 }
 0x8da   :  { %2791 = vmatpush.msra.mxu2 %v3871_v61  ;;  %2814 = vmatpush.msrb.mxu1 %v3872_v19  ;;  %v3909_v61 = vld [vmem:[%s6421_s8 + $0x120] sm:$0xff] }
 0x8db   :  { %2880 = vmatpush.msrb.mxu3 %v2849_v44  ;;  %2973 = vmatpush.msra.mxu0 %v3910_v16  ;;  %v2984_v16 = vld [vmem:[%s6420_s7] sm:$0x1f] }
 0x8dc   :  { %2792 = vmatpush.msra.mxu2 %v3869_v34  ;;  %2815 = vmatpush.msrb.mxu1 %v3870_v36 }
 0x8dd   :  { %2881 = vmatpush.msrb.mxu3 %v2848_v6  ;;  %2974 = vmatpush.msra.mxu0 %v3909_v61  ;;  %v3917_v61 = vld [vmem:[%s6420_s7 + $0x8] sm:$0x1f] }
 0x8de   :  { %2793 = vmatpush.msra.mxu2 %v3867_v37  ;;  %2816 = vmatpush.msrb.mxu1 %v3868_v39 }
 0x8df   :  { %2882 = vmatpush.msrb.mxu3 %v2847_v11  ;;  %v3047_v11 = vld [vmem:[%s6422_s9 + $0x40] sm:$0xff] }
 0x8e0   :  { %3831 = vmatmul.msk.f32.gmra.mxu2 %vm761_vm4, %v2573_v35  ;;  %3834 = vmatmul.msk.f32.gmra.mxu1 %vm761_vm4, %v2573_v35 }
 0x8e1   :  { %2794 = vmatpush.msra.mxu2 %v3865_v40  ;;  %2817 = vmatpush.msrb.mxu1 %v3866_v20  ;;  %v2830_v40 = vld [vmem:[%s6419_s6] sm:$0x3] }
 0x8e2   :  { %2883 = vmatpush.msrb.mxu3 %v2846_v15  ;;  %v3044_v15 = vld [vmem:[%s6422_s9 + $0x28] sm:$0xff] }
 0x8e3   :  { %2795 = vmatpush.msra.mxu2 %v3863_v41  ;;  %2818 = vmatpush.msrb.mxu1 %v3864_v9  ;;  %v2833_v9 = vperm.slane %v2830_v40, 1 }
 0x8e4   :  { %2884 = vmatpush.msrb.mxu3 %v2845_v5  ;;  %v3043_v5 = vld [vmem:[%s6422_s9 + $0x20] sm:$0xff] }
 0x8e5   :  { %2936 = vmatpush.msrb.mxu2 %v3908_v45 }
 0x8e6   :  { %2885 = vmatpush.msrb.mxu3 %v2844_v18 }
 0x8e7   :  { %2937 = vmatpush.msrb.mxu2 %v3907_v47 }
 0x8e8   :  { %3886 = vmatmul.msk.f32.vlgmr.msra.gmra.mxu2 %vm761_vm4, %v2744_v31  ;;  %3889 = vmatmul.msk.f32.vlgmr.msrb.gmra.mxu1 %vm761_vm4, %v2744_v31 }
 0x8e9   :  { %2938 = vmatpush.msrb.mxu2 %v3906_v52 }
 0x8eb   :  { %2939 = vmatpush.msrb.mxu2 %v3905_v4  ;;  %v2832_v4 = vperm.slane %v2830_v40, 0  ;;  %v3951_v40 = vld [vmem:[%s6422_s9 + $0x130] sm:$0xff] }
 0x8ed   :  { %2940 = vmatpush.msrb.mxu2 %v3904_v54 }
 0x8ef   :  { %2941 = vmatpush.msrb.mxu2 %v3903_v56 }
 0x8f0   :  { %3887 = vmatmul.msk.f32.gmra.mxu2 %vm761_vm4, %v2745_v42  ;;  %3890 = vmatmul.msk.f32.gmra.mxu1 %vm761_vm4, %v2745_v42 }
 0x8f1   :  { %2942 = vmatpush.msrb.mxu2 %v3902_v23 }
 0x8f3   :  { %2943 = vmatpush.msrb.mxu2 %v3901_v48 }
 0x8f5   :  { %2944 = vmatpush.msrb.mxu2 %v3900_v59 }
 0x8f7   :  { %2945 = vmatpush.msrb.mxu2 %v3899_v1 }
 0x8f9   :  { %2946 = vmatpush.msrb.mxu2 %v3898_v3 }
 0x8fb   :  { %2947 = vmatpush.msrb.mxu2 %v3897_v7 }
 0x8fd   :  { %2948 = vmatpush.msrb.mxu2 %v3896_v12 }
 0x8ff   :  { %2949 = vmatpush.msrb.mxu2 %v3895_v60 }
 0x901   :  { %2950 = vmatpush.msrb.mxu2 %v3894_v17 }
 0x903   :  { %2951 = vmatpush.msrb.mxu2 %v3893_v24 }
 0x93d   :  { %v2566_v13 = vpop.f32.mrf.mxu0 }
 0x943   :  { %v2543_v25 = vpop.f32.mrf.mxu3 }
 0x945   :  { %v2508_v62 = vpop.f32.mrf.mxu1 }
 0x946   :  { %v2569_v29 = vpop.f32.mrf.mxu0  ;;  %v2567_v36 = vadd.f32 %v2566_v13, %v2508_v62  ;;  %v3045_v13 = vld [vmem:[%s6422_s9 + $0x30] sm:$0xff] }
 0x94b   :  { %v2485_v10 = vpop.f32.mrf.mxu2 }
 0x94c   :  { %v2546_v33 = vpop.f32.mrf.mxu3  ;;  %v2544_v35 = vadd.f32 %v2543_v25, %v2485_v10  ;;  %v3048_v10 = vld [vmem:[%s6422_s9 + $0x48] sm:$0xff] }
 0x94d   :  { %v2511_v14 = vpop.f32.mrf.mxu1  ;;  %3058 = vmatpush.msra.mxu3 %v3048_v10  ;;  %v3932_v10 = vld [vmem:[%s6422_s9 + $0xa0] sm:$0xff] }
 0x94e   :  { %v2734_v39 = vpop.f32.mrf.mxu0  ;;  %v2570_v42 = vadd.f32 %v2569_v29, %v2511_v14 }
 0x94f   :  { %3059 = vmatpush.msra.mxu3 %v3047_v11  ;;  %v3955_v11 = vld [vmem:[%s6422_s9 + $0x148] sm:$0xff] }
 0x951   :  { %3060 = vmatpush.msra.mxu3 %v3046_v51  ;;  %v3954_v51 = vld [vmem:[%s6422_s9 + $0x140] sm:$0xff] }
 0x953   :  { %v2488_v26 = vpop.f32.mrf.mxu2  ;;  %3061 = vmatpush.msra.mxu3 %v3045_v13 }
 0x954   :  { %v2711_v46 = vpop.f32.mrf.mxu3  ;;  %v2547_v55 = vadd.f32 %v2546_v33, %v2488_v26  ;;  %v3041_v33 = vld [vmem:[%s6422_s9 + $0x10] sm:$0xff] }
 0x955   :  { %v2648_v27 = vpop.f32.mrf.mxu1  ;;  %3062 = vmatpush.msra.mxu3 %v3044_v15 }
 0x956   :  { %v2655_v37 = vadd.f32 %v2648_v27, %v2567_v36  ;;  %v2737_v30 = vpop.f32.mrf.mxu0  ;;  %v3930_v36 = vld [vmem:[%s6422_s9 + $0x98] sm:$0xff] }
 0x957   :  { %3063 = vmatpush.msra.mxu3 %v3043_v5 }
 0x958   :  { %v2741_v41 = vadd.f32 %v2734_v39, %v2655_v37  ;;  %v3040_v37 = vld [vmem:[%s6422_s9 + $0x8] sm:$0xff] }
 0x959   :  { %v3941_v39 = vld [vmem:[%s6422_s9 + $0xe8] sm:$0xff] }
 0x95b   :  { %v2625_v19 = vpop.f32.mrf.mxu2 }
 0x95c   :  { %v2654_v43 = vadd.f32 %v2625_v19, %v2544_v35  ;;  %v2714_v63 = vpop.f32.mrf.mxu3  ;;  %v3042_v19 = vld [vmem:[%s6422_s9 + $0x18] sm:$0xff]  ;;  %v3940_v35 = vld [vmem:[%s6422_s9 + $0xe0] sm:$0xff] }
 0x95d   :  { %v2651_v34 = vpop.f32.mrf.mxu1  ;;  %3064 = vmatpush.msra.mxu3 %v3042_v19 }
 0x95e   :  { %v2657_v47 = vadd.f32 %v2651_v34, %v2570_v42  ;;  %v2740_v53 = vadd.f32 %v2711_v46, %v2654_v43  ;;  %v3952_v34 = vld [vmem:[%s6422_s9 + $0x138] sm:$0xff]  ;;  %v3949_v43 = vld [vmem:[%s6422_s9 + $0x120] sm:$0xff]  ;;  %v3938_v46 = vld [vmem:[%s6422_s9 + $0xd0] sm:$0xff] }
 0x95f   :  { %3163 = vmatpush.msra.mxu2 %v3952_v34  ;;  %3065 = vmatpush.msra.mxu3 %v3041_v33  ;;  %v3939_v42 = vld [vmem:[%s6422_s9 + $0xd8] sm:$0xff] }
 0x960   :  { %v2743_v21 = vadd.f32 %v2737_v30, %v2657_v47  ;;  %v3963_v47 = vld [vmem:[%s6422_s9 + $0x188] sm:$0xff]  ;;  %v3961_v30 = vld [vmem:[%s6422_s9 + $0x178] sm:$0xff] }
 0x961   :  { %3164 = vmatpush.msra.mxu2 %v3951_v40  ;;  %3066 = vmatpush.msra.mxu3 %v3040_v37 }
 0x963   :  { %v2628_v20 = vpop.f32.mrf.mxu2 }
 0x964   :  { %v2656_v38 = vadd.f32 %v2628_v20, %v2547_v55  ;;  %v3929_v20 = vld [vmem:[%s6422_s9 + $0x90] sm:$0xff] }
 0x965   :  { %v2820_v31 = vpop.f32.mrf.mxu1  ;;  %v3925_v55 = vld [vmem:[%s6422_s9 + $0x70] sm:$0xff] }
 0x966   :  { %v2827_v45 = vadd.f32 %v2820_v31, %v2741_v41  ;;  %v2742_v1 = vadd.f32 %v2714_v63, %v2656_v38  ;;  %v3039_v41 = vld [vmem:[%s6422_s9] sm:$0xff]  ;;  %v3928_v31 = vld [vmem:[%s6422_s9 + $0x88] sm:$0xff] }
 0x967   :  { %3067 = vmatpush.msra.mxu3 %v3039_v41  ;;  %v3959_v38 = vld [vmem:[%s6422_s9 + $0x168] sm:$0xff]  ;;  %v3958_v63 = vld [vmem:[%s6422_s9 + $0x160] sm:$0xff]  ;;  %v3251_v41 = vld [vmem:[%s6424_s11 + $0x70] sm:$0xff] }
 0x968   :  { %v2837_v50 = vadd.f32 %v2833_v9, %v2827_v45  ;;  %v3927_v45 = vld [vmem:[%s6422_s9 + $0x80] sm:$0xff] }
 0x96a   :  { %v2841_v52 = vmax.f32 %v2837_v50, 0.0  ;;  %v3948_v50 = vld [vmem:[%s6422_s9 + $0x118] sm:$0xff] }
 0x96b   :  { %v2797_v54 = vpop.f32.mrf.mxu2 }
 0x96c   :  { %v2826_v56 = vadd.f32 %v2797_v54, %v2740_v53  ;;  %3891 = vmatmul.msk.f32.vlgmr.msrb.gmra.mxu0 %vm79_vm0, %v2841_v52  ;;  %v3937_v53 = vld [vmem:[%s6422_s9 + $0xc8] sm:$0xff]  ;;  %v3947_v54 = vld [vmem:[%s6422_s9 + $0x110] sm:$0xff] }
 0x96d   :  { %v2823_v23 = vpop.f32.mrf.mxu1  ;;  %3093 = vmatpush.msrb.mxu0 %v3930_v36 }
 0x96e   :  { %v2836_v48 = vadd.f32 %v2832_v4, %v2826_v56  ;;  %v2829_v57 = vadd.f32 %v2823_v23, %v2743_v21  ;;  %v3960_v56 = vld [vmem:[%s6422_s9 + $0x170] sm:$0xff]  ;;  %v3946_v21 = vld [vmem:[%s6422_s9 + $0x108] sm:$0xff] }
 0x96f   :  { %3094 = vmatpush.msrb.mxu0 %v3929_v20  ;;  %v3924_v23 = vld [vmem:[%s6422_s9 + $0x68] sm:$0xff] }
 0x970   :  { %v2840_v59 = vmax.f32 %v2836_v48, 0.0  ;;  %v2839_v62 = vadd.f32 %v2833_v9, %v2829_v57  ;;  %v3950_v9 = vld [vmem:[%s6422_s9 + $0x128] sm:$0xff]  ;;  %v3936_v48 = vld [vmem:[%s6422_s9 + $0xc0] sm:$0xff] }
 0x971   :  { %3165 = vmatpush.msra.mxu2 %v3950_v9  ;;  %3095 = vmatpush.msrb.mxu0 %v3928_v31  ;;  %v3945_v57 = vld [vmem:[%s6422_s9 + $0x100] sm:$0xff]  ;;  %v3250_v9 = vld [vmem:[%s6424_s11 + $0x68] sm:$0xff] }
 0x972   :  { %v2843_v0 = vmax.f32 %v2839_v62, 0.0  ;;  %2886 = vmatmul.f32.vlgmr.msrb.gmra.mxu3 %v2840_v59  ;;  %2952 = vmatmul.f32.vlgmr.msrb.gmra.mxu2 %v2840_v59  ;;  %v3923_v59 = vld [vmem:[%s6422_s9 + $0x60] sm:$0xff]  ;;  %v3935_v62 = vld [vmem:[%s6422_s9 + $0xb8] sm:$0xff] }
 0x973   :  { %v2800_v44 = vpop.f32.mrf.mxu2  ;;  %3166 = vmatpush.msra.mxu2 %v3949_v43  ;;  %3096 = vmatpush.msrb.mxu0 %v3927_v45  ;;  %v3249_v31 = vld [vmem:[%s6424_s11 + $0x60] sm:$0xff]  ;;  %v3247_v43 = vld [vmem:[%s6424_s11 + $0x50] sm:$0xff]  ;;  %v3246_v45 = vld [vmem:[%s6424_s11 + $0x48] sm:$0xff] }
 0x974   :  { %v2828_v2 = vadd.f32 %v2800_v44, %v2742_v1  ;;  %3892 = vmatmul.msk.f32.gmra.mxu0 %vm79_vm0, %v2843_v0  ;;  %3198 = vmatpush.msrb.mxu3 %v3963_v47  ;;  %v3922_v1 = vld [vmem:[%s6422_s9 + $0x58] sm:$0xff]  ;;  %v3934_v44 = vld [vmem:[%s6422_s9 + $0xb0] sm:$0xff] }
 0x975   :  { %3167 = vmatpush.msra.mxu2 %v3948_v50  ;;  %v3244_v47 = vld [vmem:[%s6424_s11 + $0x38] sm:$0xff]  ;;  %v3243_v50 = vld [vmem:[%s6424_s11 + $0x30] sm:$0xff] }
 0x976   :  { %v2838_v3 = vadd.f32 %v2832_v4, %v2828_v2  ;;  %v3962_v4 = vld [vmem:[%s6422_s9 + $0x180] sm:$0xff]  ;;  %v3957_v2 = vld [vmem:[%s6422_s9 + $0x158] sm:$0xff] }
 0x977   :  { %3199 = vmatpush.msrb.mxu3 %v3962_v4  ;;  %3168 = vmatpush.msra.mxu2 %v3947_v54  ;;  %v3240_v4 = vld [vmem:[%s6424_s11 + $0x18] sm:$0xff] }
 0x978   :  { %v2842_v6 = vmax.f32 %v2838_v3, 0.0  ;;  %v3943_v3 = vld [vmem:[%s6422_s9 + $0xf0] sm:$0xff] }
 0x979   :  { %3200 = vmatpush.msrb.mxu3 %v3961_v30  ;;  %3169 = vmatpush.msra.mxu2 %v3946_v21  ;;  %v3239_v21 = vld [vmem:[%s6424_s11 + $0x10] sm:$0xff] }
 0x97a   :  { %2889 = vmatmul.f32.gmra.mxu3 %v2842_v6  ;;  %2955 = vmatmul.f32.gmra.mxu2 %v2842_v6  ;;  %v3933_v6 = vld [vmem:[%s6422_s9 + $0xa8] sm:$0xff] }
 0x97b   :  { %3201 = vmatpush.msrb.mxu3 %v3960_v56  ;;  %3170 = vmatpush.msra.mxu2 %v3945_v57 }
 0x97c   :  { %3913 = vmatmul.msk.f32.vlgmr.msra.gmra.mxu0 %vm79_vm0, %v2841_v52  ;;  %v3926_v52 = vld [vmem:[%s6422_s9 + $0x78] sm:$0xff] }
 0x97d   :  { %3097 = vmatpush.msrb.mxu0 %v3926_v52  ;;  %3202 = vmatpush.msrb.mxu3 %v3959_v38  ;;  %v3242_v52 = vld [vmem:[%s6424_s11 + $0x28] sm:$0xff]  ;;  %v3237_v38 = vld [vmem:[%s6424_s11] sm:$0xff] }
 0x97f   :  { %3098 = vmatpush.msrb.mxu0 %v3925_v55  ;;  %3203 = vmatpush.msrb.mxu3 %v3958_v63 }
 0x981   :  { %3099 = vmatpush.msrb.mxu0 %v3924_v23  ;;  %3204 = vmatpush.msrb.mxu3 %v3957_v2  ;;  %v3238_v23 = vld [vmem:[%s6424_s11 + $0x8] sm:$0xff] }
 0x983   :  { %3100 = vmatpush.msrb.mxu0 %v3923_v59 }
 0x984   :  { %3914 = vmatmul.msk.f32.gmra.mxu0 %vm79_vm0, %v2843_v0  ;;  %v3944_v0 = vld [vmem:[%s6422_s9 + $0xf8] sm:$0xff] }
 0x985   :  { %3171 = vmatpush.msra.mxu2 %v3944_v0  ;;  %3101 = vmatpush.msrb.mxu0 %v3922_v1 }
 0x987   :  { %3172 = vmatpush.msra.mxu2 %v3943_v3  ;;  %v3306_v3 = vld [vmem:[%s6427_s14 + $0x8] sm:$0x3] }
 0x989   :  { %3969 = vmatpush.msk.msrb.mxu2 %vm1351_vm6, %v3306_v3 }
 0x9e9   :  { %v2910_v32 = vpop.f32.mrf.mxu0 }
 0x9f1   :  { %v2913_v7 = vpop.f32.mrf.mxu0 }
 0x9f5   :  { %v2887_v12 = vpop.f32.mrf.mxu3  ;;  %v2953_v14 = vpop.f32.mrf.mxu2 }
 0x9f6   :  { %v2911_v28 = vadd.f32 %v2910_v32, %v2887_v12  ;;  %v3921_v32 = vld [vmem:[%s6422_s9 + $0x50] sm:$0xff] }
 0x9f7   :  { %3102 = vmatpush.msrb.mxu0 %v3921_v32 }
 0x9f9   :  { %v2976_v60 = vpop.f32.mrf.mxu0  ;;  %3256 = vmatpush.msra.mxu0 %v3251_v41 }
 0x9fa   :  { %v2977_v25 = vadd.f32 %v2976_v60, %v2953_v14 }
 0x9fb   :  { %3257 = vmatpush.msra.mxu0 %v3250_v9 }
 0x9fc   :  { %v2982_v8 = vmax.f32 %v2911_v28, %v2977_v25 }
 0x9fd   :  { %v2890_v17 = vpop.f32.mrf.mxu3  ;;  %v2956_v18 = vpop.f32.mrf.mxu2  ;;  %3258 = vmatpush.msra.mxu0 %v3249_v31 }
 0x9fe   :  { %v2914_v26 = vadd.f32 %v2913_v7, %v2890_v17  ;;  %v3956_v7 = vld [vmem:[%s6422_s9 + $0x150] sm:$0xff] }
 0x9ff   :  { %3205 = vmatpush.msrb.mxu3 %v3956_v7 }
 0xa01   :  { %v2979_v24 = vpop.f32.mrf.mxu0  ;;  %3206 = vmatpush.msrb.mxu3 %v3955_v11  ;;  %v1682_v11 = vld [vmem:[%s6428_s15] sm:$0x1] }
 0xa02   :  { %v2980_v27 = vadd.f32 %v2979_v24, %v2956_v18  ;;  %v3037_v24 = vld [vmem:[%s6423_s10] sm:$0x1] }
 0xa03   :  { %3207 = vmatpush.msrb.mxu3 %v3954_v51 }
 0xa04   :  { %v2983_v29 = vmax.f32 %v2914_v26, %v2980_v27 }
 0xa06   :  { %3915 = vmatpush.msk.msra.mxu1 %vm1351_vm6, %v2983_v29 }
 0xa08   :  { %3006 = vmatpush.msra.mxu1 %v2982_v8 }
 0xa09   :  { %3916 = vmatmul.msk.f32.vlgmr.msra.gmra.mxu1 %vm1347_vm7, %v2984_v16 }
 0xa0a   :  { %3918 = vmatpush.msk.msrb.mxu1 %vm1351_vm6, %v2983_v29 }
 0xa0c   :  { %3030 = vmatpush.msrb.mxu1 %v2982_v8 }
 0xa0e   :  { %3128 = vmatpush.msra.mxu1 %v3941_v39 }
 0xa10   :  { %3129 = vmatpush.msra.mxu1 %v3940_v35 }
 0xa11   :  { %3919 = vmatmul.msk.f32.vlgmr.msrb.gmra.mxu1 %vm1347_vm7, %v3917_v61 }
 0xa12   :  { %3130 = vmatpush.msra.mxu1 %v3939_v42  ;;  %v3248_v42 = vld [vmem:[%s6424_s11 + $0x58] sm:$0xff] }
 0xa13   :  { %3259 = vmatpush.msra.mxu0 %v3248_v42 }
 0xa14   :  { %3131 = vmatpush.msra.mxu1 %v3938_v46  ;;  %v3245_v46 = vld [vmem:[%s6424_s11 + $0x40] sm:$0xff] }
 0xa15   :  { %3260 = vmatpush.msra.mxu0 %v3247_v43 }
 0xa16   :  { %3132 = vmatpush.msra.mxu1 %v3937_v53  ;;  %v3241_v53 = vld [vmem:[%s6424_s11 + $0x20] sm:$0xff] }
 0xa17   :  { %3261 = vmatpush.msra.mxu0 %v3246_v45 }
 0xa18   :  { %3133 = vmatpush.msra.mxu1 %v3936_v48  ;;  %v3276_v48 = vld [vmem:[%s6425_s12 + $0x8] sm:$0x3] }
 0xa19   :  { %3262 = vmatpush.msra.mxu0 %v3245_v46 }
 0xa1a   :  { %3134 = vmatpush.msra.mxu1 %v3935_v62 }
 0xa1b   :  { %3263 = vmatpush.msra.mxu0 %v3244_v47 }
 0xa1c   :  { %3135 = vmatpush.msra.mxu1 %v3934_v44  ;;  %v3275_v44 = vld [vmem:[%s6425_s12] sm:$0xff] }
 0xa1d   :  { %3264 = vmatpush.msra.mxu0 %v3243_v50 }
 0xa1e   :  { %3136 = vmatpush.msra.mxu1 %v3933_v6 }
 0xa1f   :  { %3265 = vmatpush.msra.mxu0 %v3242_v52 }
 0xa20   :  { %3137 = vmatpush.msra.mxu1 %v3932_v10  ;;  %v3307_v10 = vld [vmem:[%s6428_s15] sm:$0x1] }
 0xa21   :  { %3266 = vmatpush.msra.mxu0 %v3241_v53 }
 0xa22   :  { %3967 = vmatpush.msk.msrb.mxu1 %vm1351_vm6, %v3276_v48 }
 0xa23   :  { %3267 = vmatpush.msra.mxu0 %v3240_v4 }
 0xa24   :  { %3299 = vmatpush.msrb.mxu1 %v3275_v44 }
 0xa25   :  { %3268 = vmatpush.msra.mxu0 %v3239_v21 }
 0xa27   :  { %3269 = vmatpush.msra.mxu0 %v3238_v23 }
 0xa29   :  { %3270 = vmatpush.msra.mxu0 %v3237_v38 }
 0xa86   :  { %v3008_v12 = vpop.f32.mrf.mxu1 }
 0xa8e   :  { %v3032_v13 = vpop.f32.mrf.mxu1 }
 0xa8f   :  { %v3035_v14 = vmax.f32 %v3008_v12, %v3032_v13  ;;  %v1707_v13 = vadd.f32 %v5596_v58, %v1682_v11 }
 0xa91   :  { %3036 = vst.msk [vmem:[#allocation5] sm:$0x1f] %vm1401_vm8, %v3035_v14 }
 0xa98   :  { %v3038_v15 = vld [vmem:[#allocation5] sm:$0x1]  ;;  %v3143_v60 = vld [vmem:[#allocation5 + $0x3] sm:$0x1]  ;;  %v3073_v5 = vld [vmem:[#allocation5 + $0x1] sm:$0x1] }
 0xa99   :  { %3920 = vmatmul.msk.f32.vlgmr.msra.gmra.mxu3 %vm1415_vm9, %v3038_v15  ;;  %3953 = vmatmul.msk.f32.vlgmr.msra.gmra.mxu2 %vm1415_vm9, %v3143_v60  ;;  %v3108_v17 = vld [vmem:[#allocation5 + $0x2] sm:$0x1]  ;;  %v3178_v18 = vld [vmem:[#allocation5 + $0x4] sm:$0x1] }
 0xa9a   :  { %3931 = vmatmul.msk.f32.vlgmr.msrb.gmra.mxu0 %vm1415_vm9, %v3073_v5  ;;  %3942 = vmatmul.msk.f32.vlgmr.msra.gmra.mxu1 %vm1415_vm9, %v3108_v17 }
 0xaa1   :  { %3964 = vmatmul.msk.f32.vlgmr.msrb.gmra.mxu3 %vm1415_vm9, %v3178_v18 }
 0xb17   :  { %v3104_v27 = vpop.f32.mrf.mxu0  ;;  %v3139_v29 = vpop.f32.mrf.mxu1 }
 0xb1c   :  { %v3069_v25 = vpop.f32.mrf.mxu3  ;;  %v3174_v16 = vpop.f32.mrf.mxu2 }
 0xb1d   :  { %v3072_v26 = vadd.f32 %v3069_v25, %v3037_v24 }
 0xb1f   :  { %v3107_v28 = vadd.f32 %v3104_v27, %v3072_v26 }
 0xb21   :  { %v3142_v8 = vadd.f32 %v3139_v29, %v3107_v28 }
 0xb23   :  { %v3177_v61 = vadd.f32 %v3174_v16, %v3142_v8 }
 0xb24   :  { %v3209_v19 = vpop.f32.mrf.mxu3 }
 0xb25   :  { %v3212_v33 = vadd.f32 %v3209_v19, %v3177_v61 }
 0xb27   :  { %v3213_v34 = vmax.f32 %v3212_v33, 0.0 }
 0xb29   :  { %v3214_v36 = vsel %vm1587_vm10, %v3213_v34, -inf }
 0xb2a   :  { %3215 = vmax.xlane.f32.xlu1 %v3214_v36 }
 0xb9d   :  { %v3216_v37 = vpop.xlane.xlu1 %3215 }
 0xb9e   :  { %vm3217_vm15 = vcmp.eq.f32.partialorder %v3213_v34, %v3216_v37 }
 0xb9f   :  { %v3218_v39 = vsel %vm3217_vm15, %v5179_v22, 120 }
 0xba0   :  { %v3219_v40 = vsel %vm1587_vm10, %v3218_v39, 2147483647 }
 0xba1   :  { %v3221_v20 = vshra.s32 %v3219_v40, 16  ;;  %v3220_v30 = vand.u32 65535, %v3219_v40 }
 0xba3   :  { %v3223_v35 = vcvt.s32.f32 %v3221_v20  ;;  %v3222_v55 = vcvt.s32.f32 %v3220_v30 }
 0xba5   :  { %3224 = vmin.xlane.f32.xlu2 %v3223_v35 }
 0xc18   :  { %v3225_v54 = vpop.xlane.xlu2 %3224 }
 0xc19   :  { %vm3226_vm0 = vcmp.eq.f32.partialorder %v3223_v35, %v3225_v54  ;;  %v3231_v57 = vcvt.f32.s32 %v3225_v54 }
 0xc1a   :  { %v3227_v56 = vsel %vm3226_vm0, %v3222_v55, inf }
 0xc1b   :  { %3228 = vmin.xlane.f32.xlu2 %v3227_v56  ;;  %v3232_v62 = vshll.u32 %v3231_v57, 16 }
 0xc8e   :  { %v3229_v59 = vpop.xlane.xlu2 %3228 }
 0xc8f   :  { %v3230_v63 = vcvt.f32.s32 %v3229_v59 }
 0xc91   :  { %v3233_v0 = vadd.s32 %v3232_v62, %v3230_v63 }
 0xc93   :  { %vm3234_vm1 = vcmp.eq.s32.totalorder %v5179_v22, %v3233_v0  ;;  %v3305_v22 = vld [vmem:[%s6427_s14] sm:$0xff]  ;;  %s4004_s14 = smov [#allocation6]  }
 0xc94   :  { %v3965_v1 = vsel %vm3234_vm1, 1.0, %v4003_v49  ;;  %3329 = vmatpush.msrb.mxu2 %v3305_v22  ;;  %v3277_v49 = vld [vmem:[%s6426_s13] sm:$0x1]  ;;  %s3346_s22 = sshll.u32 %s4004_s14, 4  ;;  %s3348_s13 = sshll.u32 %s6429_s16, 4  ;;  %s3347_s22 = int_to_ptr.vmem [resolvable:$true] %s3346_s22  ;;  %s3349_s13 = int_to_ptr.hbm [resolvable:$true] %s3348_s13 }
 0xc95   :  { %3966 = vmatmul.msk.f32.vlgmr.msra.gmra.mxu0 %vm1626_vm13, %v3965_v1 }
 0xd12   :  { %v3272_v2 = vpop.f32.mrf.mxu0 }
 0xd13   :  { %3968 = vmatmul.msk.f32.vlgmr.msrb.gmra.mxu1 %vm1347_vm7, %v3272_v2 }
 0xd90   :  { %v3301_v6 = vpop.f32.mrf.mxu1 }
 0xd91   :  { %v3302_v32 = vadd.f32 %v3301_v6, %v3277_v49 }
 0xd93   :  { %v3304_v7 = vmax.f32 %v3302_v32, 0.0 }
 0xd95   :  { %3970 = vmatmul.msk.f32.vlgmr.msrb.gmra.mxu2 %vm1347_vm7, %v3304_v7 }
 0xe18   :  { %v3331_v51 = vpop.f32.mrf.mxu2 }
 0xe19   :  { %v3332_v12 = vadd.f32 %v3331_v51, %v3307_v10 }
 0xe1b   :  { %v3335_v14 = vrot.slane %v3332_v12, 7 }
 0xe1d   :  { %v3338_v15 = vsel %vm3337_vm2, %v1707_v13, %v3335_v14 }
 0xe1e   :  { %3340 = vst.msk [vmem:[#allocation6] sm:$0x3] %vm3339_vm3, %v3338_v15 }
 0xe1f   :  { %3351 = dma.vmem_to_hbm [thread:$0]  %s3347_s22, 32, %s3349_s13, [#allocation7]  }
 0xe20   :  { %4001 = dma.done.wait [#allocation7], 32  }
 0xe21   :  { %4002 = vsyncadd [#allocation7], 4294967264 }
 0xe22   :  { %3356 = vsyncpa [#allocation7], 1 }

</bundles_post_ra>
